<compile_context>
chip_gen: v7x
topology: tpu7x:2x2x1
jax: 0.10.0
libtpu: 0.0.40
codegen_flags: <defaults>
</compile_context>

<pallas_src>
import functools
import math

import jax
import jax.numpy as jnp
from jax.experimental import pallas as pl
from jax.experimental.pallas import tpu as pltpu


# ---------------------------------------------------------------------------
# Shared math helpers (pure jnp; usable both inside kernels and in reference)
# ---------------------------------------------------------------------------
def _layer_norm(x, gamma, beta, eps=1e-5):
    mean = jnp.mean(x, axis=-1, keepdims=True)
    centered = x - mean
    var = jnp.mean(centered * centered, axis=-1, keepdims=True)
    return centered * jax.lax.rsqrt(var + eps) * gamma + beta


def make_positional_encoding(d_model, max_len=5000, dtype=jnp.float32):
    """Sinusoidal table, matching the PyTorch __init__ (odd-d_model fixed)."""
    position = jnp.arange(max_len, dtype=jnp.float32)[:, None]           # (L, 1)
    div_term = jnp.exp(
        jnp.arange(0, d_model, 2, dtype=jnp.float32)
        * (-math.log(10000.0) / d_model)
    )                                                                     # (ceil(D/2),)
    angles = position * div_term                                          # (L, ceil(D/2))
    pe = jnp.zeros((max_len, d_model), jnp.float32)
    pe = pe.at[:, 0::2].set(jnp.sin(angles))
    pe = pe.at[:, 1::2].set(jnp.cos(angles)[:, : d_model // 2])
    # Cast to the model compute dtype up front (halves pe HBM traffic for bf16).
    return pe.astype(dtype)


def _seq_tile(S, target=512):
    """Pick a seq-tile: whole S if small, else a multiple-of-8 divisor <= target."""
    if S <= target:
        return S
    for ts in range(target, 7, -1):
        if S % ts == 0 and ts % 8 == 0:
            return ts
    return S  # fallback: whole sequence per step


# ---------------------------------------------------------------------------
# Kernel 1: fused input embedding + positional-encoding add
# ---------------------------------------------------------------------------
def _embed_pe_kernel(x_ref, w_ref, b_ref, pe_ref, o_ref):
    x = x_ref[0]                                           # (ts, F)
    y = jnp.dot(x, w_ref[...], preferred_element_type=jnp.float32)
    y = y + b_ref[...] + pe_ref[...]                       # bias (1,D) + pe (ts,D)
    o_ref[0] = y.astype(o_ref.dtype)


def _embed_pos_encode(x, w, b, pe):
    B, S, F = x.shape
    D = w.shape[1]
    assert S <= pe.shape[0], "sequence longer than positional-encoding table"
    ts = _seq_tile(S)
    n_s = S // ts

    if ts % 8 == 0:
        # Pass the full pe table; index the (ts, D) block by the seq-tile.
        pe_in = pe
        pe_spec = pl.BlockSpec((ts, D), lambda bi, si: (si, 0))
    else:
        # ts == S here (small, non-multiple-of-8 seq); one small slice upfront.
        pe_in = jax.lax.slice(pe, (0, 0), (S, D))
        pe_spec = pl.BlockSpec((S, D), lambda bi, si: (0, 0))

    return pl.pallas_call(
        _embed_pe_kernel,
        out_shape=jax.ShapeDtypeStruct((B, S, D), x.dtype),
        grid_spec=pltpu.PrefetchScalarGridSpec(
            num_scalar_prefetch=0,
            grid=(B, n_s),
            in_specs=[
                pl.BlockSpec((1, ts, F), lambda bi, si: (bi, si, 0)),
                pl.BlockSpec((F, D), lambda bi, si: (0, 0)),
                pl.BlockSpec((1, D), lambda bi, si: (0, 0)),
                pe_spec,
            ],
            out_specs=pl.BlockSpec((1, ts, D), lambda bi, si: (bi, si, 0)),
        ),
        compiler_params=pltpu.CompilerParams(
            # Two parallel axes -> both v7x TensorCores stay busy even for B=1.
            dimension_semantics=("parallel", "parallel"),
        ),
    )(x, w, b, pe_in)


# ---------------------------------------------------------------------------
# Kernel 2: one post-norm TransformerEncoderLayer (batch_first semantics)
# ---------------------------------------------------------------------------
def _encoder_layer_kernel(x_ref, wq_ref, bq_ref, wk_ref, bk_ref, wv_ref, bv_ref,
                          wo_ref, bo_ref, ln1_g_ref, ln1_b_ref,
                          w1_ref, b1_ref, w2_ref, b2_ref, ln2_g_ref, ln2_b_ref,
                          o_ref, *, num_heads):
    x = x_ref[0].astype(jnp.float32)                       # (S, D)
    S, D = x.shape
    hd = D // num_heads
    scale = 1.0 / math.sqrt(hd)

    q = jnp.dot(x, wq_ref[...], preferred_element_type=jnp.float32) + bq_ref[...]
    k = jnp.dot(x, wk_ref[...], preferred_element_type=jnp.float32) + bk_ref[...]
    v = jnp.dot(x, wv_ref[...], preferred_element_type=jnp.float32) + bv_ref[...]

    # Per-head attention (static unroll over heads; 2-D MXU matmuls only).
    head_outs = []
    for h in range(num_heads):
        sl = slice(h * hd, (h + 1) * hd)
        qh, kh, vh = q[:, sl], k[:, sl], v[:, sl]
        s = jnp.dot(qh, kh.T, preferred_element_type=jnp.float32) * scale   # (S, S)
        s = s - jnp.max(s, axis=-1, keepdims=True)
        p = jnp.exp(s)
        p = p * pl.reciprocal(jnp.sum(p, axis=-1, keepdims=True), approx=True)
        head_outs.append(jnp.dot(p, vh, preferred_element_type=jnp.float32))
    attn = jnp.concatenate(head_outs, axis=-1)                               # (S, D)
    attn = jnp.dot(attn, wo_ref[...], preferred_element_type=jnp.float32) + bo_ref[...]

    y = _layer_norm(x + attn, ln1_g_ref[...], ln1_b_ref[...])

    f = jnp.dot(y, w1_ref[...], preferred_element_type=jnp.float32) + b1_ref[...]
    f = jnp.maximum(f, 0.0)
    f = jnp.dot(f, w2_ref[...], preferred_element_type=jnp.float32) + b2_ref[...]

    out = _layer_norm(y + f, ln2_g_ref[...], ln2_b_ref[...])
    o_ref[0] = out.astype(o_ref.dtype)


def _encoder_layer(x, lp, *, num_heads):
    B, S, D = x.shape
    d_ff = lp["w1"].shape[1]

    def ws(shape):
        nd = len(shape)
        return pl.BlockSpec(shape, lambda b, _nd=nd: (0,) * _nd)

    kernel = functools.partial(_encoder_layer_kernel, num_heads=num_heads)
    return pl.pallas_call(
        kernel,
        out_shape=jax.ShapeDtypeStruct((B, S, D), x.dtype),
        grid_spec=pltpu.PrefetchScalarGridSpec(
            num_scalar_prefetch=0,
            grid=(B,),
            in_specs=[
                pl.BlockSpec((1, S, D), lambda b: (b, 0, 0)),
                ws((D, D)), ws((1, D)),        # wq, bq
                ws((D, D)), ws((1, D)),        # wk, bk
                ws((D, D)), ws((1, D)),        # wv, bv
                ws((D, D)), ws((1, D)),        # wo, bo
                ws((1, D)), ws((1, D)),        # ln1 gamma, beta
                ws((D, d_ff)), ws((1, d_ff)),  # ffn w1, b1
                ws((d_ff, D)), ws((1, D)),     # ffn w2, b2
                ws((1, D)), ws((1, D)),        # ln2 gamma, beta
            ],
            out_specs=pl.BlockSpec((1, S, D), lambda b: (b, 0, 0)),
        ),
        # Logically in-place: donate the activation buffer (same shape/dtype).
        input_output_aliases={0: 0},
        compiler_params=pltpu.CompilerParams(dimension_semantics=("parallel",)),
    )(x, lp["wq"], lp["bq"], lp["wk"], lp["bk"], lp["wv"], lp["bv"],
      lp["wo"], lp["bo"], lp["ln1_g"], lp["ln1_b"],
      lp["w1"], lp["b1"], lp["w2"], lp["b2"], lp["ln2_g"], lp["ln2_b"])


# ---------------------------------------------------------------------------
# Kernel 3: mean over sequence + classifier (Linear -> ReLU -> Linear)
# ---------------------------------------------------------------------------
def _pool_classifier_kernel(x_ref, w1_ref, b1_ref, w2_ref, b2_ref, o_ref):
    x = x_ref[...]                                         # (B, S, D)
    pooled = jnp.mean(x, axis=1)                           # (B, D)
    h = jnp.dot(pooled, w1_ref[...], preferred_element_type=jnp.float32) + b1_ref[...]
    h = jnp.maximum(h, 0.0)
    out = jnp.dot(h, w2_ref[...], preferred_element_type=jnp.float32) + b2_ref[...]
    o_ref[...] = out.astype(o_ref.dtype)


def _pool_classify(x, w1, b1, w2, b2):
    B = x.shape[0]
    C = w2.shape[1]
    # Tiny tensors: whole-array blocks, no grid.
    return pl.pallas_call(
        _pool_classifier_kernel,
        out_shape=jax.ShapeDtypeStruct((B, C), x.dtype),
    )(x, w1, b1, w2, b2)


# ---------------------------------------------------------------------------
# Full forward (matches KeypointTransformer.forward, eval mode)
# ---------------------------------------------------------------------------
@functools.partial(jax.jit, static_argnames=("num_heads",))
def keypoint_transformer_forward(x, params, *, num_heads):
    B, S = x.shape[0], x.shape[1]
    xf = x.reshape(B, S, -1)                               # (B, S, max_persons*17*2)
    h = _embed_pos_encode(xf, params["emb_w"], params["emb_b"], params["pe"])
    for lp in params["layers"]:
        h = _encoder_layer(h, lp, num_heads=num_heads)
    return _pool_classify(h, params["cls_w1"], params["cls_b1"],
                          params["cls_w2"], params["cls_b2"])


# ---------------------------------------------------------------------------
# Parameter construction (deterministic) and plain-JAX reference
# ---------------------------------------------------------------------------
def init_params(key, *, num_classes, max_persons, d_model, num_layers,
                max_len=5000, dtype=jnp.float32):
    input_size = max_persons * 17 * 2
    d_ff = d_model * 4
    keys = jax.random.split(key, 2 + num_layers)

    def dense(k, fan_in, fan_out):
        kw, kb = jax.random.split(k)
        w = jax.random.normal(kw, (fan_in, fan_out), dtype) / math.sqrt(fan_in)
        b = jax.random.normal(kb, (1, fan_out), dtype) * 0.01
        return w, b

    emb_w, emb_b = dense(keys[0], input_size, d_model)

    layers = []
    for i in range(num_layers):
        lk = jax.random.split(keys[2 + i], 6)
        wq, bq = dense(lk[0], d_model, d_model)
        wk, bk = dense(lk[1], d_model, d_model)
        wv, bv = dense(lk[2], d_model, d_model)
        wo, bo = dense(lk[3], d_model, d_model)
        w1, b1 = dense(lk[4], d_model, d_ff)
        w2, b2 = dense(lk[5], d_ff, d_model)
        layers.append(dict(
            wq=wq, bq=bq, wk=wk, bk=bk, wv=wv, bv=bv, wo=wo, bo=bo,
            ln1_g=jnp.ones((1, d_model), dtype), ln1_b=jnp.zeros((1, d_model), dtype),
            w1=w1, b1=b1, w2=w2, b2=b2,
            ln2_g=jnp.ones((1, d_model), dtype), ln2_b=jnp.zeros((1, d_model), dtype)))

    ck = jax.random.split(keys[1], 2)
    cls_w1, cls_b1 = dense(ck[0], d_model, 64)
    cls_w2, cls_b2 = dense(ck[1], 64, num_classes)

    return dict(emb_w=emb_w, emb_b=emb_b,
                pe=make_positional_encoding(d_model, max_len=max_len, dtype=dtype),
                layers=layers,
                cls_w1=cls_w1, cls_b1=cls_b1, cls_w2=cls_w2, cls_b2=cls_b2)


def _reference_layer(x, lp, num_heads):
    B, S, D = x.shape
    hd = D // num_heads
    q = jnp.einsum("bsd,de->bse", x, lp["wq"]) + lp["bq"]
    k = jnp.einsum("bsd,de->bse", x, lp["wk"]) + lp["bk"]
    v = jnp.einsum("bsd,de->bse", x, lp["wv"]) + lp["bv"]
    q = q.reshape(B, S, num_heads, hd).transpose(0, 2, 1, 3)
    k = k.reshape(B, S, num_heads, hd).transpose(0, 2, 1, 3)
    v = v.reshape(B, S, num_heads, hd).transpose(0, 2, 1, 3)
    s = jnp.einsum("bhqd,bhkd->bhqk", q, k) / math.sqrt(hd)
    p = jax.nn.softmax(s, axis=-1)
    o = jnp.einsum("bhqk,bhkd->bhqd", p, v).transpose(0, 2, 1, 3).reshape(B, S, D)
    attn = jnp.einsum("bsd,de->bse", o, lp["wo"]) + lp["bo"]
    y = _layer_norm(x + attn, lp["ln1_g"], lp["ln1_b"])
    f = jnp.maximum(jnp.einsum("bsd,df->bsf", y, lp["w1"]) + lp["b1"], 0.0)
    f = jnp.einsum("bsf,fd->bsd", f, lp["w2"]) + lp["b2"]
    return _layer_norm(y + f, lp["ln2_g"], lp["ln2_b"])


def _reference_forward(x, params, num_heads):
    B, S = x.shape[0], x.shape[1]
    h = x.reshape(B, S, -1)
    h = jnp.einsum("bsf,fd->bsd", h, params["emb_w"]) + params["emb_b"] + params["pe"][:S]
    for lp in params["layers"]:
        h = _reference_layer(h, lp, num_heads)
    pooled = jnp.mean(h, axis=1)
    z = jnp.maximum(pooled @ params["cls_w1"] + params["cls_b1"], 0.0)
    return z @ params["cls_w2"] + params["cls_b2"]


# ---------------------------------------------------------------------------
if __name__ == "__main__":
    # Small shapes consistent with the module: (B, S, max_persons, 17, 2),
    # d_model=128 / nhead=8 / num_layers=4 / num_classes=10.
    B, S = 2, 8
    max_persons, num_classes = 5, 10
    d_model, nhead, num_layers = 128, 8, 4

    key = jax.random.PRNGKey(0)
    kx, kp = jax.random.split(key)
    x = jax.random.normal(kx, (B, S, max_persons, 17, 2), dtype=jnp.float32)
    params = init_params(kp, num_classes=num_classes, max_persons=max_persons,
                         d_model=d_model, num_layers=num_layers)

    out = keypoint_transformer_forward(x, params, num_heads=nhead)
    out = jax.block_until_ready(out)

    assert out.shape == (B, num_classes)
    assert bool(jnp.all(jnp.isfinite(out)))

    ref = _reference_forward(x, params, nhead)
    # Tolerance absorbs MXU default-precision differences between the Pallas
    # matmuls and XLA's reference matmuls; real math errors would be O(1).
    assert jnp.allclose(out, ref, rtol=2e-2, atol=2e-2), (
        f"mismatch vs reference, max|diff|={float(jnp.max(jnp.abs(out - ref)))}")

    print("KERNEL_OK")
</pallas_src>

<mosaic_0001>
module attributes {stable_mosaic.version = 11 : i64} {
  func.func @_embed_pe_kernel(%arg0: i32, %arg1: i32, %arg2: memref<1x8x170xf32, #tpu.memory_space<vmem>>, %arg3: memref<170x128xf32, #tpu.memory_space<vmem>>, %arg4: memref<1x128xf32, #tpu.memory_space<vmem>>, %arg5: memref<8x128xf32, #tpu.memory_space<vmem>>, %arg6: memref<1x8x128xf32, #tpu.memory_space<vmem>>) attributes {dimension_semantics = [#tpu.dimension_semantics<parallel>, #tpu.dimension_semantics<parallel>], iteration_bounds = array<i64: 2, 1>, scalar_prefetch = 0 : i64, scratch_operands = 0 : i64, tpu.core_type = #tpu.core_type<tc>, window_params = [{transform_indices = @transform_0, window_bounds = array<i64: 1, 8, 170>}, {pipeline_mode = #tpu.pipeline_mode<synchronous>, transform_indices = @transform_1, window_bounds = array<i64: 170, 128>}, {pipeline_mode = #tpu.pipeline_mode<synchronous>, transform_indices = @transform_2, window_bounds = array<i64: 1, 128>}, {transform_indices = @transform_3, window_bounds = array<i64: 8, 128>}, {transform_indices = @transform_4, window_bounds = array<i64: 1, 8, 128>}]} {
    %c0 = arith.constant 0 : index
    %c0_0 = arith.constant 0 : index
    %c0_1 = arith.constant 0 : index
    %0 = vector.load %arg2[%c0, %c0_0, %c0_1] : memref<1x8x170xf32, #tpu.memory_space<vmem>>, vector<1x8x170xf32>
    %1 = vector.shape_cast %0 : vector<1x8x170xf32> to vector<8x170xf32>
    %c0_2 = arith.constant 0 : index
    %c0_3 = arith.constant 0 : index
    %2 = vector.load %arg3[%c0_2, %c0_3] : memref<170x128xf32, #tpu.memory_space<vmem>>, vector<170x128xf32>
    %cst = arith.constant dense<0.000000e+00> : vector<8x128xf32>
    %3 = tpu.matmul %1, %2, %cst {dimension_numbers = #tpu.dot_dimension_numbers<[1], [0], [0], [1], [0, 0, 1, 1], [], []>} : vector<8x170xf32>, vector<170x128xf32>, vector<8x128xf32> -> vector<8x128xf32>
    %c0_4 = arith.constant 0 : index
    %c0_5 = arith.constant 0 : index
    %4 = vector.load %arg4[%c0_4, %c0_5] : memref<1x128xf32, #tpu.memory_space<vmem>>, vector<1x128xf32>
    %5 = vector.broadcast %4 : vector<1x128xf32> to vector<8x128xf32>
    %6 = arith.addf %3, %5 : vector<8x128xf32>
    %c0_6 = arith.constant 0 : index
    %c0_7 = arith.constant 0 : index
    %7 = vector.load %arg5[%c0_6, %c0_7] : memref<8x128xf32, #tpu.memory_space<vmem>>, vector<8x128xf32>
    %8 = arith.addf %6, %7 : vector<8x128xf32>
    %c0_8 = arith.constant 0 : index
    %c0_9 = arith.constant 0 : index
    %c0_10 = arith.constant 0 : index
    %9 = vector.load %arg6[%c0_8, %c0_9, %c0_10] : memref<1x8x128xf32, #tpu.memory_space<vmem>>, vector<1x8x128xf32>
    %10 = vector.shape_cast %9 : vector<1x8x128xf32> to vector<8x128xf32>
    %11 = vector.shape_cast %8 : vector<8x128xf32> to vector<1x8x128xf32>
    tpu.vector_store %arg6[%c0_8, %c0_9, %c0_10], %11 {strides = array<i32>} : memref<1x8x128xf32, #tpu.memory_space<vmem>>, vector<1x8x128xf32>,
    return
  }
  func.func @transform_0(%arg0: i32, %arg1: i32) -> (i32, i32, i32) {
    %c0_i32 = arith.constant 0 : i32
    %c0_i32_0 = arith.constant 0 : i32
    return %arg0, %arg1, %c0_i32 : i32, i32, i32
  }
  func.func @transform_1(%arg0: i32, %arg1: i32) -> (i32, i32) {
    %c0_i32 = arith.constant 0 : i32
    %c0_i32_0 = arith.constant 0 : i32
    %c0_i32_1 = arith.constant 0 : i32
    return %c0_i32, %c0_i32_0 : i32, i32
  }
  func.func @transform_2(%arg0: i32, %arg1: i32) -> (i32, i32) {
    %c0_i32 = arith.constant 0 : i32
    %c0_i32_0 = arith.constant 0 : i32
    %c0_i32_1 = arith.constant 0 : i32
    return %c0_i32, %c0_i32_0 : i32, i32
  }
  func.func @transform_3(%arg0: i32, %arg1: i32) -> (i32, i32) {
    %c0_i32 = arith.constant 0 : i32
    %c0_i32_0 = arith.constant 0 : i32
    return %arg1, %c0_i32 : i32, i32
  }
  func.func @transform_4(%arg0: i32, %arg1: i32) -> (i32, i32, i32) {
    %c0_i32 = arith.constant 0 : i32
    %c0_i32_0 = arith.constant 0 : i32
    return %arg0, %arg1, %c0_i32 : i32, i32, i32
  }
}

module attributes {stable_mosaic.version = 11 : i64} {
  func.func @_encoder_layer_kernel(%arg0: i32, %arg1: memref<1x8x128xf32, #tpu.memory_space<vmem>>, %arg2: memref<128x128xf32, #tpu.memory_space<vmem>>, %arg3: memref<1x128xf32, #tpu.memory_space<vmem>>, %arg4: memref<128x128xf32, #tpu.memory_space<vmem>>, %arg5: memref<1x128xf32, #tpu.memory_space<vmem>>, %arg6: memref<128x128xf32, #tpu.memory_space<vmem>>, %arg7: memref<1x128xf32, #tpu.memory_space<vmem>>, %arg8: memref<128x128xf32, #tpu.memory_space<vmem>>, %arg9: memref<1x128xf32, #tpu.memory_space<vmem>>, %arg10: memref<1x128xf32, #tpu.memory_space<vmem>>, %arg11: memref<1x128xf32, #tpu.memory_space<vmem>>, %arg12: memref<128x512xf32, #tpu.memory_space<vmem>>, %arg13: memref<1x512xf32, #tpu.memory_space<vmem>>, %arg14: memref<512x128xf32, #tpu.memory_space<vmem>>, %arg15: memref<1x128xf32, #tpu.memory_space<vmem>>, %arg16: memref<1x128xf32, #tpu.memory_space<vmem>>, %arg17: memref<1x128xf32, #tpu.memory_space<vmem>>, %arg18: memref<1x8x128xf32, #tpu.memory_space<vmem>>) attributes {dimension_semantics = [#tpu.dimension_semantics<parallel>], iteration_bounds = array<i64: 2>, scalar_prefetch = 0 : i64, scratch_operands = 0 : i64, tpu.core_type = #tpu.core_type<tc>, window_params = [{transform_indices = @transform_0, window_bounds = array<i64: 1, 8, 128>}, {pipeline_mode = #tpu.pipeline_mode<synchronous>, transform_indices = @transform_1, window_bounds = array<i64: 128, 128>}, {pipeline_mode = #tpu.pipeline_mode<synchronous>, transform_indices = @transform_2, window_bounds = array<i64: 1, 128>}, {pipeline_mode = #tpu.pipeline_mode<synchronous>, transform_indices = @transform_3, window_bounds = array<i64: 128, 128>}, {pipeline_mode = #tpu.pipeline_mode<synchronous>, transform_indices = @transform_4, window_bounds = array<i64: 1, 128>}, {pipeline_mode = #tpu.pipeline_mode<synchronous>, transform_indices = @transform_5, window_bounds = array<i64: 128, 128>}, {pipeline_mode = #tpu.pipeline_mode<synchronous>, transform_indices = @transform_6, window_bounds = array<i64: 1, 128>}, {pipeline_mode = #tpu.pipeline_mode<synchronous>, transform_indices = @transform_7, window_bounds = array<i64: 128, 128>}, {pipeline_mode = #tpu.pipeline_mode<synchronous>, transform_indices = @transform_8, window_bounds = array<i64: 1, 128>}, {pipeline_mode = #tpu.pipeline_mode<synchronous>, transform_indices = @transform_9, window_bounds = array<i64: 1, 128>}, {pipeline_mode = #tpu.pipeline_mode<synchronous>, transform_indices = @transform_10, window_bounds = array<i64: 1, 128>}, {pipeline_mode = #tpu.pipeline_mode<synchronous>, transform_indices = @transform_11, window_bounds = array<i64: 128, 512>}, {pipeline_mode = #tpu.pipeline_mode<synchronous>, transform_indices = @transform_12, window_bounds = array<i64: 1, 512>}, {pipeline_mode = #tpu.pipeline_mode<synchronous>, transform_indices = @transform_13, window_bounds = array<i64: 512, 128>}, {pipeline_mode = #tpu.pipeline_mode<synchronous>, transform_indices = @transform_14, window_bounds = array<i64: 1, 128>}, {pipeline_mode = #tpu.pipeline_mode<synchronous>, transform_indices = @transform_15, window_bounds = array<i64: 1, 128>}, {pipeline_mode = #tpu.pipeline_mode<synchronous>, transform_indices = @transform_16, window_bounds = array<i64: 1, 128>}, {transform_indices = @transform_17, window_bounds = array<i64: 1, 8, 128>}]} {
    %c0 = arith.constant 0 : index
    %c0_0 = arith.constant 0 : index
    %c0_1 = arith.constant 0 : index
    %0 = vector.load %arg1[%c0, %c0_0, %c0_1] : memref<1x8x128xf32, #tpu.memory_space<vmem>>, vector<1x8x128xf32>
    %1 = vector.shape_cast %0 : vector<1x8x128xf32> to vector<8x128xf32>
    %c0_2 = arith.constant 0 : index
    %c0_3 = arith.constant 0 : index
    %2 = vector.load %arg2[%c0_2, %c0_3] : memref<128x128xf32, #tpu.memory_space<vmem>>, vector<128x128xf32>
    %cst = arith.constant dense<0.000000e+00> : vector<8x128xf32>
    %3 = tpu.matmul %1, %2, %cst {dimension_numbers = #tpu.dot_dimension_numbers<[1], [0], [0], [1], [0, 0, 1, 1], [], []>} : vector<8x128xf32>, vector<128x128xf32>, vector<8x128xf32> -> vector<8x128xf32>
    %c0_4 = arith.constant 0 : index
    %c0_5 = arith.constant 0 : index
    %4 = vector.load %arg3[%c0_4, %c0_5] : memref<1x128xf32, #tpu.memory_space<vmem>>, vector<1x128xf32>
    %5 = vector.broadcast %4 : vector<1x128xf32> to vector<8x128xf32>
    %6 = arith.addf %3, %5 : vector<8x128xf32>
    %c0_6 = arith.constant 0 : index
    %c0_7 = arith.constant 0 : index
    %7 = vector.load %arg4[%c0_6, %c0_7] : memref<128x128xf32, #tpu.memory_space<vmem>>, vector<128x128xf32>
    %cst_8 = arith.constant dense<0.000000e+00> : vector<8x128xf32>
    %8 = tpu.matmul %1, %7, %cst_8 {dimension_numbers = #tpu.dot_dimension_numbers<[1], [0], [0], [1], [0, 0, 1, 1], [], []>} : vector<8x128xf32>, vector<128x128xf32>, vector<8x128xf32> -> vector<8x128xf32>
    %c0_9 = arith.constant 0 : index
    %c0_10 = arith.constant 0 : index
    %9 = vector.load %arg5[%c0_9, %c0_10] : memref<1x128xf32, #tpu.memory_space<vmem>>, vector<1x128xf32>
    %10 = vector.broadcast %9 : vector<1x128xf32> to vector<8x128xf32>
    %11 = arith.addf %8, %10 : vector<8x128xf32>
    %c0_11 = arith.constant 0 : index
    %c0_12 = arith.constant 0 : index
    %12 = vector.load %arg6[%c0_11, %c0_12] : memref<128x128xf32, #tpu.memory_space<vmem>>, vector<128x128xf32>
    %cst_13 = arith.constant dense<0.000000e+00> : vector<8x128xf32>
    %13 = tpu.matmul %1, %12, %cst_13 {dimension_numbers = #tpu.dot_dimension_numbers<[1], [0], [0], [1], [0, 0, 1, 1], [], []>} : vector<8x128xf32>, vector<128x128xf32>, vector<8x128xf32> -> vector<8x128xf32>
    %c0_14 = arith.constant 0 : index
    %c0_15 = arith.constant 0 : index
    %14 = vector.load %arg7[%c0_14, %c0_15] : memref<1x128xf32, #tpu.memory_space<vmem>>, vector<1x128xf32>
    %15 = vector.broadcast %14 : vector<1x128xf32> to vector<8x128xf32>
    %16 = arith.addf %13, %15 : vector<8x128xf32>
    %17 = vector.extract_strided_slice %6 {offsets = [0, 0], sizes = [8, 16], strides = [1, 1]} : vector<8x128xf32> to vector<8x16xf32>
    %18 = vector.extract_strided_slice %11 {offsets = [0, 0], sizes = [8, 16], strides = [1, 1]} : vector<8x128xf32> to vector<8x16xf32>
    %19 = vector.extract_strided_slice %16 {offsets = [0, 0], sizes = [8, 16], strides = [1, 1]} : vector<8x128xf32> to vector<8x16xf32>
    %20 = tpu.transpose %18, [1, 0] : vector<8x16xf32> -> vector<16x8xf32>
    %cst_16 = arith.constant dense<0.000000e+00> : vector<8x8xf32>
    %21 = tpu.matmul %17, %20, %cst_16 {dimension_numbers = #tpu.dot_dimension_numbers<[1], [0], [0], [1], [0, 0, 1, 1], [], []>} : vector<8x16xf32>, vector<16x8xf32>, vector<8x8xf32> -> vector<8x8xf32>
    %cst_17 = arith.constant 2.500000e-01 : f32
    %22 = vector.broadcast %cst_17 : f32 to vector<8x8xf32>
    %23 = arith.mulf %21, %22 : vector<8x8xf32>
    %cst_18 = arith.constant dense<0xFF800000> : vector<8xf32>
    %24 = vector.multi_reduction <maximumf>, %23, %cst_18 [1] : vector<8x8xf32> to vector<8xf32>
    %25 = vector.shape_cast %24 : vector<8xf32> to vector<8x1xf32>
    %26 = vector.broadcast %25 : vector<8x1xf32> to vector<8x8xf32>
    %27 = arith.subf %23, %26 : vector<8x8xf32>
    %28 = math.exp %27 : vector<8x8xf32>
    %cst_19 = arith.constant dense<0.000000e+00> : vector<8xf32>
    %29 = vector.multi_reduction <add>, %28, %cst_19 [1] : vector<8x8xf32> to vector<8xf32>
    %30 = vector.shape_cast %29 : vector<8xf32> to vector<8x1xf32>
    %31 = tpu.reciprocal %30 {approx = true} : vector<8x1xf32> -> vector<8x1xf32>
    %32 = vector.broadcast %31 : vector<8x1xf32> to vector<8x8xf32>
    %33 = arith.mulf %28, %32 : vector<8x8xf32>
    %cst_20 = arith.constant dense<0.000000e+00> : vector<8x16xf32>
    %34 = tpu.matmul %33, %19, %cst_20 {dimension_numbers = #tpu.dot_dimension_numbers<[1], [0], [0], [1], [0, 0, 1, 1], [], []>} : vector<8x8xf32>, vector<8x16xf32>, vector<8x16xf32> -> vector<8x16xf32>
    %35 = vector.extract_strided_slice %6 {offsets = [0, 16], sizes = [8, 16], strides = [1, 1]} : vector<8x128xf32> to vector<8x16xf32>
    %36 = vector.extract_strided_slice %11 {offsets = [0, 16], sizes = [8, 16], strides = [1, 1]} : vector<8x128xf32> to vector<8x16xf32>
    %37 = vector.extract_strided_slice %16 {offsets = [0, 16], sizes = [8, 16], strides = [1, 1]} : vector<8x128xf32> to vector<8x16xf32>
    %38 = tpu.transpose %36, [1, 0] : vector<8x16xf32> -> vector<16x8xf32>
    %cst_21 = arith.constant dense<0.000000e+00> : vector<8x8xf32>
    %39 = tpu.matmul %35, %38, %cst_21 {dimension_numbers = #tpu.dot_dimension_numbers<[1], [0], [0], [1], [0, 0, 1, 1], [], []>} : vector<8x16xf32>, vector<16x8xf32>, vector<8x8xf32> -> vector<8x8xf32>
    %cst_22 = arith.constant 2.500000e-01 : f32
    %40 = vector.broadcast %cst_22 : f32 to vector<8x8xf32>
    %41 = arith.mulf %39, %40 : vector<8x8xf32>
    %cst_23 = arith.constant dense<0xFF800000> : vector<8xf32>
    %42 = vector.multi_reduction <maximumf>, %41, %cst_23 [1] : vector<8x8xf32> to vector<8xf32>
    %43 = vector.shape_cast %42 : vector<8xf32> to vector<8x1xf32>
    %44 = vector.broadcast %43 : vector<8x1xf32> to vector<8x8xf32>
    %45 = arith.subf %41, %44 : vector<8x8xf32>
    %46 = math.exp %45 : vector<8x8xf32>
    %cst_24 = arith.constant dense<0.000000e+00> : vector<8xf32>
    %47 = vector.multi_reduction <add>, %46, %cst_24 [1] : vector<8x8xf32> to vector<8xf32>
    %48 = vector.shape_cast %47 : vector<8xf32> to vector<8x1xf32>
    %49 = tpu.reciprocal %48 {approx = true} : vector<8x1xf32> -> vector<8x1xf32>
    %50 = vector.broadcast %49 : vector<8x1xf32> to vector<8x8xf32>
    %51 = arith.mulf %46, %50 : vector<8x8xf32>
    %cst_25 = arith.constant dense<0.000000e+00> : vector<8x16xf32>
    %52 = tpu.matmul %51, %37, %cst_25 {dimension_numbers = #tpu.dot_dimension_numbers<[1], [0], [0], [1], [0, 0, 1, 1], [], []>} : vector<8x8xf32>, vector<8x16xf32>, vector<8x16xf32> -> vector<8x16xf32>
    %53 = vector.extract_strided_slice %6 {offsets = [0, 32], sizes = [8, 16], strides = [1, 1]} : vector<8x128xf32> to vector<8x16xf32>
    %54 = vector.extract_strided_slice %11 {offsets = [0, 32], sizes = [8, 16], strides = [1, 1]} : vector<8x128xf32> to vector<8x16xf32>
    %55 = vector.extract_strided_slice %16 {offsets = [0, 32], sizes = [8, 16], strides = [1, 1]} : vector<8x128xf32> to vector<8x16xf32>
    %56 = tpu.transpose %54, [1, 0] : vector<8x16xf32> -> vector<16x8xf32>
    %cst_26 = arith.constant dense<0.000000e+00> : vector<8x8xf32>
    %57 = tpu.matmul %53, %56, %cst_26 {dimension_numbers = #tpu.dot_dimension_numbers<[1], [0], [0], [1], [0, 0, 1, 1], [], []>} : vector<8x16xf32>, vector<16x8xf32>, vector<8x8xf32> -> vector<8x8xf32>
    %cst_27 = arith.constant 2.500000e-01 : f32
    %58 = vector.broadcast %cst_27 : f32 to vector<8x8xf32>
    %59 = arith.mulf %57, %58 : vector<8x8xf32>
    %cst_28 = arith.constant dense<0xFF800000> : vector<8xf32>
    %60 = vector.multi_reduction <maximumf>, %59, %cst_28 [1] : vector<8x8xf32> to vector<8xf32>
    %61 = vector.shape_cast %60 : vector<8xf32> to vector<8x1xf32>
    %62 = vector.broadcast %61 : vector<8x1xf32> to vector<8x8xf32>
    %63 = arith.subf %59, %62 : vector<8x8xf32>
    %64 = math.exp %63 : vector<8x8xf32>
    %cst_29 = arith.constant dense<0.000000e+00> : vector<8xf32>
    %65 = vector.multi_reduction <add>, %64, %cst_29 [1] : vector<8x8xf32> to vector<8xf32>
    %66 = vector.shape_cast %65 : vector<8xf32> to vector<8x1xf32>
    %67 = tpu.reciprocal %66 {approx = true} : vector<8x1xf32> -> vector<8x1xf32>
    %68 = vector.broadcast %67 : vector<8x1xf32> to vector<8x8xf32>
    %69 = arith.mulf %64, %68 : vector<8x8xf32>
    %cst_30 = arith.constant dense<0.000000e+00> : vector<8x16xf32>
    %70 = tpu.matmul %69, %55, %cst_30 {dimension_numbers = #tpu.dot_dimension_numbers<[1], [0], [0], [1], [0, 0, 1, 1], [], []>} : vector<8x8xf32>, vector<8x16xf32>, vector<8x16xf32> -> vector<8x16xf32>
    %71 = vector.extract_strided_slice %6 {offsets = [0, 48], sizes = [8, 16], strides = [1, 1]} : vector<8x128xf32> to vector<8x16xf32>
    %72 = vector.extract_strided_slice %11 {offsets = [0, 48], sizes = [8, 16], strides = [1, 1]} : vector<8x128xf32> to vector<8x16xf32>
    %73 = vector.extract_strided_slice %16 {offsets = [0, 48], sizes = [8, 16], strides = [1, 1]} : vector<8x128xf32> to vector<8x16xf32>
    %74 = tpu.transpose %72, [1, 0] : vector<8x16xf32> -> vector<16x8xf32>
    %cst_31 = arith.constant dense<0.000000e+00> : vector<8x8xf32>
    %75 = tpu.matmul %71, %74, %cst_31 {dimension_numbers = #tpu.dot_dimension_numbers<[1], [0], [0], [1], [0, 0, 1, 1], [], []>} : vector<8x16xf32>, vector<16x8xf32>, vector<8x8xf32> -> vector<8x8xf32>
    %cst_32 = arith.constant 2.500000e-01 : f32
    %76 = vector.broadcast %cst_32 : f32 to vector<8x8xf32>
    %77 = arith.mulf %75, %76 : vector<8x8xf32>
    %cst_33 = arith.constant dense<0xFF800000> : vector<8xf32>
    %78 = vector.multi_reduction <maximumf>, %77, %cst_33 [1] : vector<8x8xf32> to vector<8xf32>
    %79 = vector.shape_cast %78 : vector<8xf32> to vector<8x1xf32>
    %80 = vector.broadcast %79 : vector<8x1xf32> to vector<8x8xf32>
    %81 = arith.subf %77, %80 : vector<8x8xf32>
    %82 = math.exp %81 : vector<8x8xf32>
    %cst_34 = arith.constant dense<0.000000e+00> : vector<8xf32>
    %83 = vector.multi_reduction <add>, %82, %cst_34 [1] : vector<8x8xf32> to vector<8xf32>
    %84 = vector.shape_cast %83 : vector<8xf32> to vector<8x1xf32>
    %85 = tpu.reciprocal %84 {approx = true} : vector<8x1xf32> -> vector<8x1xf32>
    %86 = vector.broadcast %85 : vector<8x1xf32> to vector<8x8xf32>
    %87 = arith.mulf %82, %86 : vector<8x8xf32>
    %cst_35 = arith.constant dense<0.000000e+00> : vector<8x16xf32>
    %88 = tpu.matmul %87, %73, %cst_35 {dimension_numbers = #tpu.dot_dimension_numbers<[1], [0], [0], [1], [0, 0, 1, 1], [], []>} : vector<8x8xf32>, vector<8x16xf32>, vector<8x16xf32> -> vector<8x16xf32>
    %89 = vector.extract_strided_slice %6 {offsets = [0, 64], sizes = [8, 16], strides = [1, 1]} : vector<8x128xf32> to vector<8x16xf32>
    %90 = vector.extract_strided_slice %11 {offsets = [0, 64], sizes = [8, 16], strides = [1, 1]} : vector<8x128xf32> to vector<8x16xf32>
    %91 = vector.extract_strided_slice %16 {offsets = [0, 64], sizes = [8, 16], strides = [1, 1]} : vector<8x128xf32> to vector<8x16xf32>
    %92 = tpu.transpose %90, [1, 0] : vector<8x16xf32> -> vector<16x8xf32>
    %cst_36 = arith.constant dense<0.000000e+00> : vector<8x8xf32>
    %93 = tpu.matmul %89, %92, %cst_36 {dimension_numbers = #tpu.dot_dimension_numbers<[1], [0], [0], [1], [0, 0, 1, 1], [], []>} : vector<8x16xf32>, vector<16x8xf32>, vector<8x8xf32> -> vector<8x8xf32>
    %cst_37 = arith.constant 2.500000e-01 : f32
    %94 = vector.broadcast %cst_37 : f32 to vector<8x8xf32>
    %95 = arith.mulf %93, %94 : vector<8x8xf32>
    %cst_38 = arith.constant dense<0xFF800000> : vector<8xf32>
    %96 = vector.multi_reduction <maximumf>, %95, %cst_38 [1] : vector<8x8xf32> to vector<8xf32>
    %97 = vector.shape_cast %96 : vector<8xf32> to vector<8x1xf32>
    %98 = vector.broadcast %97 : vector<8x1xf32> to vector<8x8xf32>
    %99 = arith.subf %95, %98 : vector<8x8xf32>
    %100 = math.exp %99 : vector<8x8xf32>
    %cst_39 = arith.constant dense<0.000000e+00> : vector<8xf32>
    %101 = vector.multi_reduction <add>, %100, %cst_39 [1] : vector<8x8xf32> to vector<8xf32>
    %102 = vector.shape_cast %101 : vector<8xf32> to vector<8x1xf32>
    %103 = tpu.reciprocal %102 {approx = true} : vector<8x1xf32> -> vector<8x1xf32>
    %104 = vector.broadcast %103 : vector<8x1xf32> to vector<8x8xf32>
    %105 = arith.mulf %100, %104 : vector<8x8xf32>
    %cst_40 = arith.constant dense<0.000000e+00> : vector<8x16xf32>
    %106 = tpu.matmul %105, %91, %cst_40 {dimension_numbers = #tpu.dot_dimension_numbers<[1], [0], [0], [1], [0, 0, 1, 1], [], []>} : vector<8x8xf32>, vector<8x16xf32>, vector<8x16xf32> -> vector<8x16xf32>
    %107 = vector.extract_strided_slice %6 {offsets = [0, 80], sizes = [8, 16], strides = [1, 1]} : vector<8x128xf32> to vector<8x16xf32>
    %108 = vector.extract_strided_slice %11 {offsets = [0, 80], sizes = [8, 16], strides = [1, 1]} : vector<8x128xf32> to vector<8x16xf32>
    %109 = vector.extract_strided_slice %16 {offsets = [0, 80], sizes = [8, 16], strides = [1, 1]} : vector<8x128xf32> to vector<8x16xf32>
    %110 = tpu.transpose %108, [1, 0] : vector<8x16xf32> -> vector<16x8xf32>
    %cst_41 = arith.constant dense<0.000000e+00> : vector<8x8xf32>
    %111 = tpu.matmul %107, %110, %cst_41 {dimension_numbers = #tpu.dot_dimension_numbers<[1], [0], [0], [1], [0, 0, 1, 1], [], []>} : vector<8x16xf32>, vector<16x8xf32>, vector<8x8xf32> -> vector<8x8xf32>
    %cst_42 = arith.constant 2.500000e-01 : f32
    %112 = vector.broadcast %cst_42 : f32 to vector<8x8xf32>
    %113 = arith.mulf %111, %112 : vector<8x8xf32>
    %cst_43 = arith.constant dense<0xFF800000> : vector<8xf32>
    %114 = vector.multi_reduction <maximumf>, %113, %cst_43 [1] : vector<8x8xf32> to vector<8xf32>
    %115 = vector.shape_cast %114 : vector<8xf32> to vector<8x1xf32>
    %116 = vector.broadcast %115 : vector<8x1xf32> to vector<8x8xf32>
    %117 = arith.subf %113, %116 : vector<8x8xf32>
    %118 = math.exp %117 : vector<8x8xf32>
    %cst_44 = arith.constant dense<0.000000e+00> : vector<8xf32>
    %119 = vector.multi_reduction <add>, %118, %cst_44 [1] : vector<8x8xf32> to vector<8xf32>
    %120 = vector.shape_cast %119 : vector<8xf32> to vector<8x1xf32>
    %121 = tpu.reciprocal %120 {approx = true} : vector<8x1xf32> -> vector<8x1xf32>
    %122 = vector.broadcast %121 : vector<8x1xf32> to vector<8x8xf32>
    %123 = arith.mulf %118, %122 : vector<8x8xf32>
    %cst_45 = arith.constant dense<0.000000e+00> : vector<8x16xf32>
    %124 = tpu.matmul %123, %109, %cst_45 {dimension_numbers = #tpu.dot_dimension_numbers<[1], [0], [0], [1], [0, 0, 1, 1], [], []>} : vector<8x8xf32>, vector<8x16xf32>, vector<8x16xf32> -> vector<8x16xf32>
    %125 = vector.extract_strided_slice %6 {offsets = [0, 96], sizes = [8, 16], strides = [1, 1]} : vector<8x128xf32> to vector<8x16xf32>
    %126 = vector.extract_strided_slice %11 {offsets = [0, 96], sizes = [8, 16], strides = [1, 1]} : vector<8x128xf32> to vector<8x16xf32>
    %127 = vector.extract_strided_slice %16 {offsets = [0, 96], sizes = [8, 16], strides = [1, 1]} : vector<8x128xf32> to vector<8x16xf32>
    %128 = tpu.transpose %126, [1, 0] : vector<8x16xf32> -> vector<16x8xf32>
    %cst_46 = arith.constant dense<0.000000e+00> : vector<8x8xf32>
    %129 = tpu.matmul %125, %128, %cst_46 {dimension_numbers = #tpu.dot_dimension_numbers<[1], [0], [0], [1], [0, 0, 1, 1], [], []>} : vector<8x16xf32>, vector<16x8xf32>, vector<8x8xf32> -> vector<8x8xf32>
    %cst_47 = arith.constant 2.500000e-01 : f32
    %130 = vector.broadcast %cst_47 : f32 to vector<8x8xf32>
    %131 = arith.mulf %129, %130 : vector<8x8xf32>
    %cst_48 = arith.constant dense<0xFF800000> : vector<8xf32>
    %132 = vector.multi_reduction <maximumf>, %131, %cst_48 [1] : vector<8x8xf32> to vector<8xf32>
    %133 = vector.shape_cast %132 : vector<8xf32> to vector<8x1xf32>
    %134 = vector.broadcast %133 : vector<8x1xf32> to vector<8x8xf32>
    %135 = arith.subf %131, %134 : vector<8x8xf32>
    %136 = math.exp %135 : vector<8x8xf32>
    %cst_49 = arith.constant dense<0.000000e+00> : vector<8xf32>
    %137 = vector.multi_reduction <add>, %136, %cst_49 [1] : vector<8x8xf32> to vector<8xf32>
    %138 = vector.shape_cast %137 : vector<8xf32> to vector<8x1xf32>
    %139 = tpu.reciprocal %138 {approx = true} : vector<8x1xf32> -> vector<8x1xf32>
    %140 = vector.broadcast %139 : vector<8x1xf32> to vector<8x8xf32>
    %141 = arith.mulf %136, %140 : vector<8x8xf32>
    %cst_50 = arith.constant dense<0.000000e+00> : vector<8x16xf32>
    %142 = tpu.matmul %141, %127, %cst_50 {dimension_numbers = #tpu.dot_dimension_numbers<[1], [0], [0], [1], [0, 0, 1, 1], [], []>} : vector<8x8xf32>, vector<8x16xf32>, vector<8x16xf32> -> vector<8x16xf32>
    %143 = vector.extract_strided_slice %6 {offsets = [0, 112], sizes = [8, 16], strides = [1, 1]} : vector<8x128xf32> to vector<8x16xf32>
    %144 = vector.extract_strided_slice %11 {offsets = [0, 112], sizes = [8, 16], strides = [1, 1]} : vector<8x128xf32> to vector<8x16xf32>
    %145 = vector.extract_strided_slice %16 {offsets = [0, 112], sizes = [8, 16], strides = [1, 1]} : vector<8x128xf32> to vector<8x16xf32>
    %146 = tpu.transpose %144, [1, 0] : vector<8x16xf32> -> vector<16x8xf32>
    %cst_51 = arith.constant dense<0.000000e+00> : vector<8x8xf32>
    %147 = tpu.matmul %143, %146, %cst_51 {dimension_numbers = #tpu.dot_dimension_numbers<[1], [0], [0], [1], [0, 0, 1, 1], [], []>} : vector<8x16xf32>, vector<16x8xf32>, vector<8x8xf32> -> vector<8x8xf32>
    %cst_52 = arith.constant 2.500000e-01 : f32
    %148 = vector.broadcast %cst_52 : f32 to vector<8x8xf32>
    %149 = arith.mulf %147, %148 : vector<8x8xf32>
    %cst_53 = arith.constant dense<0xFF800000> : vector<8xf32>
    %150 = vector.multi_reduction <maximumf>, %149, %cst_53 [1] : vector<8x8xf32> to vector<8xf32>
    %151 = vector.shape_cast %150 : vector<8xf32> to vector<8x1xf32>
    %152 = vector.broadcast %151 : vector<8x1xf32> to vector<8x8xf32>
    %153 = arith.subf %149, %152 : vector<8x8xf32>
    %154 = math.exp %153 : vector<8x8xf32>
    %cst_54 = arith.constant dense<0.000000e+00> : vector<8xf32>
    %155 = vector.multi_reduction <add>, %154, %cst_54 [1] : vector<8x8xf32> to vector<8xf32>
    %156 = vector.shape_cast %155 : vector<8xf32> to vector<8x1xf32>
    %157 = tpu.reciprocal %156 {approx = true} : vector<8x1xf32> -> vector<8x1xf32>
    %158 = vector.broadcast %157 : vector<8x1xf32> to vector<8x8xf32>
    %159 = arith.mulf %154, %158 : vector<8x8xf32>
    %cst_55 = arith.constant dense<0.000000e+00> : vector<8x16xf32>
    %160 = tpu.matmul %159, %145, %cst_55 {dimension_numbers = #tpu.dot_dimension_numbers<[1], [0], [0], [1], [0, 0, 1, 1], [], []>} : vector<8x8xf32>, vector<8x16xf32>, vector<8x16xf32> -> vector<8x16xf32>
    %161 = tpu.concatenate %34, %52, %70, %88, %106, %124, %142, %160 in 1 : vector<8x16xf32>, vector<8x16xf32>, vector<8x16xf32>, vector<8x16xf32>, vector<8x16xf32>, vector<8x16xf32>, vector<8x16xf32>, vector<8x16xf32> -> vector<8x128xf32>
    %c0_56 = arith.constant 0 : index
    %c0_57 = arith.constant 0 : index
    %162 = vector.load %arg8[%c0_56, %c0_57] : memref<128x128xf32, #tpu.memory_space<vmem>>, vector<128x128xf32>
    %cst_58 = arith.constant dense<0.000000e+00> : vector<8x128xf32>
    %163 = tpu.matmul %161, %162, %cst_58 {dimension_numbers = #tpu.dot_dimension_numbers<[1], [0], [0], [1], [0, 0, 1, 1], [], []>} : vector<8x128xf32>, vector<128x128xf32>, vector<8x128xf32> -> vector<8x128xf32>
    %c0_59 = arith.constant 0 : index
    %c0_60 = arith.constant 0 : index
    %164 = vector.load %arg9[%c0_59, %c0_60] : memref<1x128xf32, #tpu.memory_space<vmem>>, vector<1x128xf32>
    %165 = vector.broadcast %164 : vector<1x128xf32> to vector<8x128xf32>
    %166 = arith.addf %163, %165 : vector<8x128xf32>
    %167 = arith.addf %1, %166 : vector<8x128xf32>
    %c0_61 = arith.constant 0 : index
    %c0_62 = arith.constant 0 : index
    %168 = vector.load %arg10[%c0_61, %c0_62] : memref<1x128xf32, #tpu.memory_space<vmem>>, vector<1x128xf32>
    %c0_63 = arith.constant 0 : index
    %c0_64 = arith.constant 0 : index
    %169 = vector.load %arg11[%c0_63, %c0_64] : memref<1x128xf32, #tpu.memory_space<vmem>>, vector<1x128xf32>
    %cst_65 = arith.constant dense<0.000000e+00> : vector<8xf32>
    %170 = vector.multi_reduction <add>, %167, %cst_65 [1] : vector<8x128xf32> to vector<8xf32>
    %171 = vector.shape_cast %170 : vector<8xf32> to vector<8x1xf32>
    %cst_66 = arith.constant 1.280000e+02 : f32
    %172 = vector.broadcast %cst_66 : f32 to vector<8x1xf32>
    %173 = arith.divf %171, %172 : vector<8x1xf32>
    %174 = vector.broadcast %173 : vector<8x1xf32> to vector<8x128xf32>
    %175 = arith.subf %167, %174 : vector<8x128xf32>
    %176 = arith.mulf %175, %175 : vector<8x128xf32>
    %cst_67 = arith.constant dense<0.000000e+00> : vector<8xf32>
    %177 = vector.multi_reduction <add>, %176, %cst_67 [1] : vector<8x128xf32> to vector<8xf32>
    %178 = vector.shape_cast %177 : vector<8xf32> to vector<8x1xf32>
    %cst_68 = arith.constant 1.280000e+02 : f32
    %179 = vector.broadcast %cst_68 : f32 to vector<8x1xf32>
    %180 = arith.divf %178, %179 : vector<8x1xf32>
    %cst_69 = arith.constant 9.99999974E-6 : f32
    %181 = vector.broadcast %cst_69 : f32 to vector<8x1xf32>
    %182 = arith.addf %180, %181 : vector<8x1xf32>
    %183 = math.rsqrt %182 : vector<8x1xf32>
    %184 = vector.broadcast %183 : vector<8x1xf32> to vector<8x128xf32>
    %185 = arith.mulf %175, %184 : vector<8x128xf32>
    %186 = vector.broadcast %168 : vector<1x128xf32> to vector<8x128xf32>
    %187 = arith.mulf %185, %186 : vector<8x128xf32>
    %188 = vector.broadcast %169 : vector<1x128xf32> to vector<8x128xf32>
    %189 = arith.addf %187, %188 : vector<8x128xf32>
    %c0_70 = arith.constant 0 : index
    %c0_71 = arith.constant 0 : index
    %190 = vector.load %arg12[%c0_70, %c0_71] : memref<128x512xf32, #tpu.memory_space<vmem>>, vector<128x512xf32>
    %cst_72 = arith.constant dense<0.000000e+00> : vector<8x512xf32>
    %191 = tpu.matmul %189, %190, %cst_72 {dimension_numbers = #tpu.dot_dimension_numbers<[1], [0], [0], [1], [0, 0, 1, 1], [], []>} : vector<8x128xf32>, vector<128x512xf32>, vector<8x512xf32> -> vector<8x512xf32>
    %c0_73 = arith.constant 0 : index
    %c0_74 = arith.constant 0 : index
    %192 = vector.load %arg13[%c0_73, %c0_74] : memref<1x512xf32, #tpu.memory_space<vmem>>, vector<1x512xf32>
    %193 = vector.broadcast %192 : vector<1x512xf32> to vector<8x512xf32>
    %194 = arith.addf %191, %193 : vector<8x512xf32>
    %cst_75 = arith.constant 0.000000e+00 : f32
    %195 = vector.broadcast %cst_75 : f32 to vector<8x512xf32>
    %196 = arith.maximumf %194, %195 : vector<8x512xf32>
    %c0_76 = arith.constant 0 : index
    %c0_77 = arith.constant 0 : index
    %197 = vector.load %arg14[%c0_76, %c0_77] : memref<512x128xf32, #tpu.memory_space<vmem>>, vector<512x128xf32>
    %cst_78 = arith.constant dense<0.000000e+00> : vector<8x128xf32>
    %198 = tpu.matmul %196, %197, %cst_78 {dimension_numbers = #tpu.dot_dimension_numbers<[1], [0], [0], [1], [0, 0, 1, 1], [], []>} : vector<8x512xf32>, vector<512x128xf32>, vector<8x128xf32> -> vector<8x128xf32>
    %c0_79 = arith.constant 0 : index
    %c0_80 = arith.constant 0 : index
    %199 = vector.load %arg15[%c0_79, %c0_80] : memref<1x128xf32, #tpu.memory_space<vmem>>, vector<1x128xf32>
    %200 = vector.broadcast %199 : vector<1x128xf32> to vector<8x128xf32>
    %201 = arith.addf %198, %200 : vector<8x128xf32>
    %202 = arith.addf %189, %201 : vector<8x128xf32>
    %c0_81 = arith.constant 0 : index
    %c0_82 = arith.constant 0 : index
    %203 = vector.load %arg16[%c0_81, %c0_82] : memref<1x128xf32, #tpu.memory_space<vmem>>, vector<1x128xf32>
    %c0_83 = arith.constant 0 : index
    %c0_84 = arith.constant 0 : index
    %204 = vector.load %arg17[%c0_83, %c0_84] : memref<1x128xf32, #tpu.memory_space<vmem>>, vector<1x128xf32>
    %cst_85 = arith.constant dense<0.000000e+00> : vector<8xf32>
    %205 = vector.multi_reduction <add>, %202, %cst_85 [1] : vector<8x128xf32> to vector<8xf32>
    %206 = vector.shape_cast %205 : vector<8xf32> to vector<8x1xf32>
    %cst_86 = arith.constant 1.280000e+02 : f32
    %207 = vector.broadcast %cst_86 : f32 to vector<8x1xf32>
    %208 = arith.divf %206, %207 : vector<8x1xf32>
    %209 = vector.broadcast %208 : vector<8x1xf32> to vector<8x128xf32>
    %210 = arith.subf %202, %209 : vector<8x128xf32>
    %211 = arith.mulf %210, %210 : vector<8x128xf32>
    %cst_87 = arith.constant dense<0.000000e+00> : vector<8xf32>
    %212 = vector.multi_reduction <add>, %211, %cst_87 [1] : vector<8x128xf32> to vector<8xf32>
    %213 = vector.shape_cast %212 : vector<8xf32> to vector<8x1xf32>
    %cst_88 = arith.constant 1.280000e+02 : f32
    %214 = vector.broadcast %cst_88 : f32 to vector<8x1xf32>
    %215 = arith.divf %213, %214 : vector<8x1xf32>
    %cst_89 = arith.constant 9.99999974E-6 : f32
    %216 = vector.broadcast %cst_89 : f32 to vector<8x1xf32>
    %217 = arith.addf %215, %216 : vector<8x1xf32>
    %218 = math.rsqrt %217 : vector<8x1xf32>
    %219 = vector.broadcast %218 : vector<8x1xf32> to vector<8x128xf32>
    %220 = arith.mulf %210, %219 : vector<8x128xf32>
    %221 = vector.broadcast %203 : vector<1x128xf32> to vector<8x128xf32>
    %222 = arith.mulf %220, %221 : vector<8x128xf32>
    %223 = vector.broadcast %204 : vector<1x128xf32> to vector<8x128xf32>
    %224 = arith.addf %222, %223 : vector<8x128xf32>
    %c0_90 = arith.constant 0 : index
    %c0_91 = arith.constant 0 : index
    %c0_92 = arith.constant 0 : index
    %225 = vector.load %arg18[%c0_90, %c0_91, %c0_92] : memref<1x8x128xf32, #tpu.memory_space<vmem>>, vector<1x8x128xf32>
    %226 = vector.shape_cast %225 : vector<1x8x128xf32> to vector<8x128xf32>
    %227 = vector.shape_cast %224 : vector<8x128xf32> to vector<1x8x128xf32>
    tpu.vector_store %arg18[%c0_90, %c0_91, %c0_92], %227 {strides = array<i32>} : memref<1x8x128xf32, #tpu.memory_space<vmem>>, vector<1x8x128xf32>,
    return
  }
  func.func @transform_0(%arg0: i32) -> (i32, i32, i32) {
    %c0_i32 = arith.constant 0 : i32
    %c0_i32_0 = arith.constant 0 : i32
    %c0_i32_1 = arith.constant 0 : i32
    return %arg0, %c0_i32, %c0_i32_0 : i32, i32, i32
  }
  func.func @transform_1(%arg0: i32) -> (i32, i32) {
    %c0_i32 = arith.constant 0 : i32
    %c0_i32_0 = arith.constant 0 : i32
    %c0_i32_1 = arith.constant 0 : i32
    return %c0_i32, %c0_i32_0 : i32, i32
  }
  func.func @transform_2(%arg0: i32) -> (i32, i32) {
    %c0_i32 = arith.constant 0 : i32
    %c0_i32_0 = arith.constant 0 : i32
    %c0_i32_1 = arith.constant 0 : i32
    return %c0_i32, %c0_i32_0 : i32, i32
  }
  func.func @transform_3(%arg0: i32) -> (i32, i32) {
    %c0_i32 = arith.constant 0 : i32
    %c0_i32_0 = arith.constant 0 : i32
    %c0_i32_1 = arith.constant 0 : i32
    return %c0_i32, %c0_i32_0 : i32, i32
  }
  func.func @transform_4(%arg0: i32) -> (i32, i32) {
    %c0_i32 = arith.constant 0 : i32
    %c0_i32_0 = arith.constant 0 : i32
    %c0_i32_1 = arith.constant 0 : i32
    return %c0_i32, %c0_i32_0 : i32, i32
  }
  func.func @transform_5(%arg0: i32) -> (i32, i32) {
    %c0_i32 = arith.constant 0 : i32
    %c0_i32_0 = arith.constant 0 : i32
    %c0_i32_1 = arith.constant 0 : i32
    return %c0_i32, %c0_i32_0 : i32, i32
  }
  func.func @transform_6(%arg0: i32) -> (i32, i32) {
    %c0_i32 = arith.constant 0 : i32
    %c0_i32_0 = arith.constant 0 : i32
    %c0_i32_1 = arith.constant 0 : i32
    return %c0_i32, %c0_i32_0 : i32, i32
  }
  func.func @transform_7(%arg0: i32) -> (i32, i32) {
    %c0_i32 = arith.constant 0 : i32
    %c0_i32_0 = arith.constant 0 : i32
    %c0_i32_1 = arith.constant 0 : i32
    return %c0_i32, %c0_i32_0 : i32, i32
  }
  func.func @transform_8(%arg0: i32) -> (i32, i32) {
    %c0_i32 = arith.constant 0 : i32
    %c0_i32_0 = arith.constant 0 : i32
    %c0_i32_1 = arith.constant 0 : i32
    return %c0_i32, %c0_i32_0 : i32, i32
  }
  func.func @transform_9(%arg0: i32) -> (i32, i32) {
    %c0_i32 = arith.constant 0 : i32
    %c0_i32_0 = arith.constant 0 : i32
    %c0_i32_1 = arith.constant 0 : i32
    return %c0_i32, %c0_i32_0 : i32, i32
  }
  func.func @transform_10(%arg0: i32) -> (i32, i32) {
    %c0_i32 = arith.constant 0 : i32
    %c0_i32_0 = arith.constant 0 : i32
    %c0_i32_1 = arith.constant 0 : i32
    return %c0_i32, %c0_i32_0 : i32, i32
  }
  func.func @transform_11(%arg0: i32) -> (i32, i32) {
    %c0_i32 = arith.constant 0 : i32
    %c0_i32_0 = arith.constant 0 : i32
    %c0_i32_1 = arith.constant 0 : i32
    return %c0_i32, %c0_i32_0 : i32, i32
  }
  func.func @transform_12(%arg0: i32) -> (i32, i32) {
    %c0_i32 = arith.constant 0 : i32
    %c0_i32_0 = arith.constant 0 : i32
    %c0_i32_1 = arith.constant 0 : i32
    return %c0_i32, %c0_i32_0 : i32, i32
  }
  func.func @transform_13(%arg0: i32) -> (i32, i32) {
    %c0_i32 = arith.constant 0 : i32
    %c0_i32_0 = arith.constant 0 : i32
    %c0_i32_1 = arith.constant 0 : i32
    return %c0_i32, %c0_i32_0 : i32, i32
  }
  func.func @transform_14(%arg0: i32) -> (i32, i32) {
    %c0_i32 = arith.constant 0 : i32
    %c0_i32_0 = arith.constant 0 : i32
    %c0_i32_1 = arith.constant 0 : i32
    return %c0_i32, %c0_i32_0 : i32, i32
  }
  func.func @transform_15(%arg0: i32) -> (i32, i32) {
    %c0_i32 = arith.constant 0 : i32
    %c0_i32_0 = arith.constant 0 : i32
    %c0_i32_1 = arith.constant 0 : i32
    return %c0_i32, %c0_i32_0 : i32, i32
  }
  func.func @transform_16(%arg0: i32) -> (i32, i32) {
    %c0_i32 = arith.constant 0 : i32
    %c0_i32_0 = arith.constant 0 : i32
    %c0_i32_1 = arith.constant 0 : i32
    return %c0_i32, %c0_i32_0 : i32, i32
  }
  func.func @transform_17(%arg0: i32) -> (i32, i32, i32) {
    %c0_i32 = arith.constant 0 : i32
    %c0_i32_0 = arith.constant 0 : i32
    %c0_i32_1 = arith.constant 0 : i32
    return %arg0, %c0_i32, %c0_i32_0 : i32, i32, i32
  }
}

module attributes {stable_mosaic.version = 11 : i64} {
  func.func @_encoder_layer_kernel(%arg0: i32, %arg1: memref<1x8x128xf32, #tpu.memory_space<vmem>>, %arg2: memref<128x128xf32, #tpu.memory_space<vmem>>, %arg3: memref<1x128xf32, #tpu.memory_space<vmem>>, %arg4: memref<128x128xf32, #tpu.memory_space<vmem>>, %arg5: memref<1x128xf32, #tpu.memory_space<vmem>>, %arg6: memref<128x128xf32, #tpu.memory_space<vmem>>, %arg7: memref<1x128xf32, #tpu.memory_space<vmem>>, %arg8: memref<128x128xf32, #tpu.memory_space<vmem>>, %arg9: memref<1x128xf32, #tpu.memory_space<vmem>>, %arg10: memref<1x128xf32, #tpu.memory_space<vmem>>, %arg11: memref<1x128xf32, #tpu.memory_space<vmem>>, %arg12: memref<128x512xf32, #tpu.memory_space<vmem>>, %arg13: memref<1x512xf32, #tpu.memory_space<vmem>>, %arg14: memref<512x128xf32, #tpu.memory_space<vmem>>, %arg15: memref<1x128xf32, #tpu.memory_space<vmem>>, %arg16: memref<1x128xf32, #tpu.memory_space<vmem>>, %arg17: memref<1x128xf32, #tpu.memory_space<vmem>>, %arg18: memref<1x8x128xf32, #tpu.memory_space<vmem>>) attributes {dimension_semantics = [#tpu.dimension_semantics<parallel>], iteration_bounds = array<i64: 2>, scalar_prefetch = 0 : i64, scratch_operands = 0 : i64, tpu.core_type = #tpu.core_type<tc>, window_params = [{transform_indices = @transform_0, window_bounds = array<i64: 1, 8, 128>}, {pipeline_mode = #tpu.pipeline_mode<synchronous>, transform_indices = @transform_1, window_bounds = array<i64: 128, 128>}, {pipeline_mode = #tpu.pipeline_mode<synchronous>, transform_indices = @transform_2, window_bounds = array<i64: 1, 128>}, {pipeline_mode = #tpu.pipeline_mode<synchronous>, transform_indices = @transform_3, window_bounds = array<i64: 128, 128>}, {pipeline_mode = #tpu.pipeline_mode<synchronous>, transform_indices = @transform_4, window_bounds = array<i64: 1, 128>}, {pipeline_mode = #tpu.pipeline_mode<synchronous>, transform_indices = @transform_5, window_bounds = array<i64: 128, 128>}, {pipeline_mode = #tpu.pipeline_mode<synchronous>, transform_indices = @transform_6, window_bounds = array<i64: 1, 128>}, {pipeline_mode = #tpu.pipeline_mode<synchronous>, transform_indices = @transform_7, window_bounds = array<i64: 128, 128>}, {pipeline_mode = #tpu.pipeline_mode<synchronous>, transform_indices = @transform_8, window_bounds = array<i64: 1, 128>}, {pipeline_mode = #tpu.pipeline_mode<synchronous>, transform_indices = @transform_9, window_bounds = array<i64: 1, 128>}, {pipeline_mode = #tpu.pipeline_mode<synchronous>, transform_indices = @transform_10, window_bounds = array<i64: 1, 128>}, {pipeline_mode = #tpu.pipeline_mode<synchronous>, transform_indices = @transform_11, window_bounds = array<i64: 128, 512>}, {pipeline_mode = #tpu.pipeline_mode<synchronous>, transform_indices = @transform_12, window_bounds = array<i64: 1, 512>}, {pipeline_mode = #tpu.pipeline_mode<synchronous>, transform_indices = @transform_13, window_bounds = array<i64: 512, 128>}, {pipeline_mode = #tpu.pipeline_mode<synchronous>, transform_indices = @transform_14, window_bounds = array<i64: 1, 128>}, {pipeline_mode = #tpu.pipeline_mode<synchronous>, transform_indices = @transform_15, window_bounds = array<i64: 1, 128>}, {pipeline_mode = #tpu.pipeline_mode<synchronous>, transform_indices = @transform_16, window_bounds = array<i64: 1, 128>}, {transform_indices = @transform_17, window_bounds = array<i64: 1, 8, 128>}]} {
    %c0 = arith.constant 0 : index
    %c0_0 = arith.constant 0 : index
    %c0_1 = arith.constant 0 : index
    %0 = vector.load %arg1[%c0, %c0_0, %c0_1] : memref<1x8x128xf32, #tpu.memory_space<vmem>>, vector<1x8x128xf32>
    %1 = vector.shape_cast %0 : vector<1x8x128xf32> to vector<8x128xf32>
    %c0_2 = arith.constant 0 : index
    %c0_3 = arith.constant 0 : index
    %2 = vector.load %arg2[%c0_2, %c0_3] : memref<128x128xf32, #tpu.memory_space<vmem>>, vector<128x128xf32>
    %cst = arith.constant dense<0.000000e+00> : vector<8x128xf32>
    %3 = tpu.matmul %1, %2, %cst {dimension_numbers = #tpu.dot_dimension_numbers<[1], [0], [0], [1], [0, 0, 1, 1], [], []>} : vector<8x128xf32>, vector<128x128xf32>, vector<8x128xf32> -> vector<8x128xf32>
    %c0_4 = arith.constant 0 : index
    %c0_5 = arith.constant 0 : index
    %4 = vector.load %arg3[%c0_4, %c0_5] : memref<1x128xf32, #tpu.memory_space<vmem>>, vector<1x128xf32>
    %5 = vector.broadcast %4 : vector<1x128xf32> to vector<8x128xf32>
    %6 = arith.addf %3, %5 : vector<8x128xf32>
    %c0_6 = arith.constant 0 : index
    %c0_7 = arith.constant 0 : index
    %7 = vector.load %arg4[%c0_6, %c0_7] : memref<128x128xf32, #tpu.memory_space<vmem>>, vector<128x128xf32>
    %cst_8 = arith.constant dense<0.000000e+00> : vector<8x128xf32>
    %8 = tpu.matmul %1, %7, %cst_8 {dimension_numbers = #tpu.dot_dimension_numbers<[1], [0], [0], [1], [0, 0, 1, 1], [], []>} : vector<8x128xf32>, vector<128x128xf32>, vector<8x128xf32> -> vector<8x128xf32>
    %c0_9 = arith.constant 0 : index
    %c0_10 = arith.constant 0 : index
    %9 = vector.load %arg5[%c0_9, %c0_10] : memref<1x128xf32, #tpu.memory_space<vmem>>, vector<1x128xf32>
    %10 = vector.broadcast %9 : vector<1x128xf32> to vector<8x128xf32>
    %11 = arith.addf %8, %10 : vector<8x128xf32>
    %c0_11 = arith.constant 0 : index
    %c0_12 = arith.constant 0 : index
    %12 = vector.load %arg6[%c0_11, %c0_12] : memref<128x128xf32, #tpu.memory_space<vmem>>, vector<128x128xf32>
    %cst_13 = arith.constant dense<0.000000e+00> : vector<8x128xf32>
    %13 = tpu.matmul %1, %12, %cst_13 {dimension_numbers = #tpu.dot_dimension_numbers<[1], [0], [0], [1], [0, 0, 1, 1], [], []>} : vector<8x128xf32>, vector<128x128xf32>, vector<8x128xf32> -> vector<8x128xf32>
    %c0_14 = arith.constant 0 : index
    %c0_15 = arith.constant 0 : index
    %14 = vector.load %arg7[%c0_14, %c0_15] : memref<1x128xf32, #tpu.memory_space<vmem>>, vector<1x128xf32>
    %15 = vector.broadcast %14 : vector<1x128xf32> to vector<8x128xf32>
    %16 = arith.addf %13, %15 : vector<8x128xf32>
    %17 = vector.extract_strided_slice %6 {offsets = [0, 0], sizes = [8, 16], strides = [1, 1]} : vector<8x128xf32> to vector<8x16xf32>
    %18 = vector.extract_strided_slice %11 {offsets = [0, 0], sizes = [8, 16], strides = [1, 1]} : vector<8x128xf32> to vector<8x16xf32>
    %19 = vector.extract_strided_slice %16 {offsets = [0, 0], sizes = [8, 16], strides = [1, 1]} : vector<8x128xf32> to vector<8x16xf32>
    %20 = tpu.transpose %18, [1, 0] : vector<8x16xf32> -> vector<16x8xf32>
    %cst_16 = arith.constant dense<0.000000e+00> : vector<8x8xf32>
    %21 = tpu.matmul %17, %20, %cst_16 {dimension_numbers = #tpu.dot_dimension_numbers<[1], [0], [0], [1], [0, 0, 1, 1], [], []>} : vector<8x16xf32>, vector<16x8xf32>, vector<8x8xf32> -> vector<8x8xf32>
    %cst_17 = arith.constant 2.500000e-01 : f32
    %22 = vector.broadcast %cst_17 : f32 to vector<8x8xf32>
    %23 = arith.mulf %21, %22 : vector<8x8xf32>
    %cst_18 = arith.constant dense<0xFF800000> : vector<8xf32>
    %24 = vector.multi_reduction <maximumf>, %23, %cst_18 [1] : vector<8x8xf32> to vector<8xf32>
    %25 = vector.shape_cast %24 : vector<8xf32> to vector<8x1xf32>
    %26 = vector.broadcast %25 : vector<8x1xf32> to vector<8x8xf32>
    %27 = arith.subf %23, %26 : vector<8x8xf32>
    %28 = math.exp %27 : vector<8x8xf32>
    %cst_19 = arith.constant dense<0.000000e+00> : vector<8xf32>
    %29 = vector.multi_reduction <add>, %28, %cst_19 [1] : vector<8x8xf32> to vector<8xf32>
    %30 = vector.shape_cast %29 : vector<8xf32> to vector<8x1xf32>
    %31 = tpu.reciprocal %30 {approx = true} : vector<8x1xf32> -> vector<8x1xf32>
    %32 = vector.broadcast %31 : vector<8x1xf32> to vector<8x8xf32>
    %33 = arith.mulf %28, %32 : vector<8x8xf32>
    %cst_20 = arith.constant dense<0.000000e+00> : vector<8x16xf32>
    %34 = tpu.matmul %33, %19, %cst_20 {dimension_numbers = #tpu.dot_dimension_numbers<[1], [0], [0], [1], [0, 0, 1, 1], [], []>} : vector<8x8xf32>, vector<8x16xf32>, vector<8x16xf32> -> vector<8x16xf32>
    %35 = vector.extract_strided_slice %6 {offsets = [0, 16], sizes = [8, 16], strides = [1, 1]} : vector<8x128xf32> to vector<8x16xf32>
    %36 = vector.extract_strided_slice %11 {offsets = [0, 16], sizes = [8, 16], strides = [1, 1]} : vector<8x128xf32> to vector<8x16xf32>
    %37 = vector.extract_strided_slice %16 {offsets = [0, 16], sizes = [8, 16], strides = [1, 1]} : vector<8x128xf32> to vector<8x16xf32>
    %38 = tpu.transpose %36, [1, 0] : vector<8x16xf32> -> vector<16x8xf32>
    %cst_21 = arith.constant dense<0.000000e+00> : vector<8x8xf32>
    %39 = tpu.matmul %35, %38, %cst_21 {dimension_numbers = #tpu.dot_dimension_numbers<[1], [0], [0], [1], [0, 0, 1, 1], [], []>} : vector<8x16xf32>, vector<16x8xf32>, vector<8x8xf32> -> vector<8x8xf32>
    %cst_22 = arith.constant 2.500000e-01 : f32
    %40 = vector.broadcast %cst_22 : f32 to vector<8x8xf32>
    %41 = arith.mulf %39, %40 : vector<8x8xf32>
    %cst_23 = arith.constant dense<0xFF800000> : vector<8xf32>
    %42 = vector.multi_reduction <maximumf>, %41, %cst_23 [1] : vector<8x8xf32> to vector<8xf32>
    %43 = vector.shape_cast %42 : vector<8xf32> to vector<8x1xf32>
    %44 = vector.broadcast %43 : vector<8x1xf32> to vector<8x8xf32>
    %45 = arith.subf %41, %44 : vector<8x8xf32>
    %46 = math.exp %45 : vector<8x8xf32>
    %cst_24 = arith.constant dense<0.000000e+00> : vector<8xf32>
    %47 = vector.multi_reduction <add>, %46, %cst_24 [1] : vector<8x8xf32> to vector<8xf32>
    %48 = vector.shape_cast %47 : vector<8xf32> to vector<8x1xf32>
    %49 = tpu.reciprocal %48 {approx = true} : vector<8x1xf32> -> vector<8x1xf32>
    %50 = vector.broadcast %49 : vector<8x1xf32> to vector<8x8xf32>
    %51 = arith.mulf %46, %50 : vector<8x8xf32>
    %cst_25 = arith.constant dense<0.000000e+00> : vector<8x16xf32>
    %52 = tpu.matmul %51, %37, %cst_25 {dimension_numbers = #tpu.dot_dimension_numbers<[1], [0], [0], [1], [0, 0, 1, 1], [], []>} : vector<8x8xf32>, vector<8x16xf32>, vector<8x16xf32> -> vector<8x16xf32>
    %53 = vector.extract_strided_slice %6 {offsets = [0, 32], sizes = [8, 16], strides = [1, 1]} : vector<8x128xf32> to vector<8x16xf32>
    %54 = vector.extract_strided_slice %11 {offsets = [0, 32], sizes = [8, 16], strides = [1, 1]} : vector<8x128xf32> to vector<8x16xf32>
    %55 = vector.extract_strided_slice %16 {offsets = [0, 32], sizes = [8, 16], strides = [1, 1]} : vector<8x128xf32> to vector<8x16xf32>
    %56 = tpu.transpose %54, [1, 0] : vector<8x16xf32> -> vector<16x8xf32>
    %cst_26 = arith.constant dense<0.000000e+00> : vector<8x8xf32>
    %57 = tpu.matmul %53, %56, %cst_26 {dimension_numbers = #tpu.dot_dimension_numbers<[1], [0], [0], [1], [0, 0, 1, 1], [], []>} : vector<8x16xf32>, vector<16x8xf32>, vector<8x8xf32> -> vector<8x8xf32>
    %cst_27 = arith.constant 2.500000e-01 : f32
    %58 = vector.broadcast %cst_27 : f32 to vector<8x8xf32>
    %59 = arith.mulf %57, %58 : vector<8x8xf32>
    %cst_28 = arith.constant dense<0xFF800000> : vector<8xf32>
    %60 = vector.multi_reduction <maximumf>, %59, %cst_28 [1] : vector<8x8xf32> to vector<8xf32>
    %61 = vector.shape_cast %60 : vector<8xf32> to vector<8x1xf32>
    %62 = vector.broadcast %61 : vector<8x1xf32> to vector<8x8xf32>
    %63 = arith.subf %59, %62 : vector<8x8xf32>
    %64 = math.exp %63 : vector<8x8xf32>
    %cst_29 = arith.constant dense<0.000000e+00> : vector<8xf32>
    %65 = vector.multi_reduction <add>, %64, %cst_29 [1] : vector<8x8xf32> to vector<8xf32>
    %66 = vector.shape_cast %65 : vector<8xf32> to vector<8x1xf32>
    %67 = tpu.reciprocal %66 {approx = true} : vector<8x1xf32> -> vector<8x1xf32>
    %68 = vector.broadcast %67 : vector<8x1xf32> to vector<8x8xf32>
    %69 = arith.mulf %64, %68 : vector<8x8xf32>
    %cst_30 = arith.constant dense<0.000000e+00> : vector<8x16xf32>
    %70 = tpu.matmul %69, %55, %cst_30 {dimension_numbers = #tpu.dot_dimension_numbers<[1], [0], [0], [1], [0, 0, 1, 1], [], []>} : vector<8x8xf32>, vector<8x16xf32>, vector<8x16xf32> -> vector<8x16xf32>
    %71 = vector.extract_strided_slice %6 {offsets = [0, 48], sizes = [8, 16], strides = [1, 1]} : vector<8x128xf32> to vector<8x16xf32>
    %72 = vector.extract_strided_slice %11 {offsets = [0, 48], sizes = [8, 16], strides = [1, 1]} : vector<8x128xf32> to vector<8x16xf32>
    %73 = vector.extract_strided_slice %16 {offsets = [0, 48], sizes = [8, 16], strides = [1, 1]} : vector<8x128xf32> to vector<8x16xf32>
    %74 = tpu.transpose %72, [1, 0] : vector<8x16xf32> -> vector<16x8xf32>
    %cst_31 = arith.constant dense<0.000000e+00> : vector<8x8xf32>
    %75 = tpu.matmul %71, %74, %cst_31 {dimension_numbers = #tpu.dot_dimension_numbers<[1], [0], [0], [1], [0, 0, 1, 1], [], []>} : vector<8x16xf32>, vector<16x8xf32>, vector<8x8xf32> -> vector<8x8xf32>
    %cst_32 = arith.constant 2.500000e-01 : f32
    %76 = vector.broadcast %cst_32 : f32 to vector<8x8xf32>
    %77 = arith.mulf %75, %76 : vector<8x8xf32>
    %cst_33 = arith.constant dense<0xFF800000> : vector<8xf32>
    %78 = vector.multi_reduction <maximumf>, %77, %cst_33 [1] : vector<8x8xf32> to vector<8xf32>
    %79 = vector.shape_cast %78 : vector<8xf32> to vector<8x1xf32>
    %80 = vector.broadcast %79 : vector<8x1xf32> to vector<8x8xf32>
    %81 = arith.subf %77, %80 : vector<8x8xf32>
    %82 = math.exp %81 : vector<8x8xf32>
    %cst_34 = arith.constant dense<0.000000e+00> : vector<8xf32>
    %83 = vector.multi_reduction <add>, %82, %cst_34 [1] : vector<8x8xf32> to vector<8xf32>
    %84 = vector.shape_cast %83 : vector<8xf32> to vector<8x1xf32>
    %85 = tpu.reciprocal %84 {approx = true} : vector<8x1xf32> -> vector<8x1xf32>
    %86 = vector.broadcast %85 : vector<8x1xf32> to vector<8x8xf32>
    %87 = arith.mulf %82, %86 : vector<8x8xf32>
    %cst_35 = arith.constant dense<0.000000e+00> : vector<8x16xf32>
    %88 = tpu.matmul %87, %73, %cst_35 {dimension_numbers = #tpu.dot_dimension_numbers<[1], [0], [0], [1], [0, 0, 1, 1], [], []>} : vector<8x8xf32>, vector<8x16xf32>, vector<8x16xf32> -> vector<8x16xf32>
    %89 = vector.extract_strided_slice %6 {offsets = [0, 64], sizes = [8, 16], strides = [1, 1]} : vector<8x128xf32> to vector<8x16xf32>
    %90 = vector.extract_strided_slice %11 {offsets = [0, 64], sizes = [8, 16], strides = [1, 1]} : vector<8x128xf32> to vector<8x16xf32>
    %91 = vector.extract_strided_slice %16 {offsets = [0, 64], sizes = [8, 16], strides = [1, 1]} : vector<8x128xf32> to vector<8x16xf32>
    %92 = tpu.transpose %90, [1, 0] : vector<8x16xf32> -> vector<16x8xf32>
    %cst_36 = arith.constant dense<0.000000e+00> : vector<8x8xf32>
    %93 = tpu.matmul %89, %92, %cst_36 {dimension_numbers = #tpu.dot_dimension_numbers<[1], [0], [0], [1], [0, 0, 1, 1], [], []>} : vector<8x16xf32>, vector<16x8xf32>, vector<8x8xf32> -> vector<8x8xf32>
    %cst_37 = arith.constant 2.500000e-01 : f32
    %94 = vector.broadcast %cst_37 : f32 to vector<8x8xf32>
    %95 = arith.mulf %93, %94 : vector<8x8xf32>
    %cst_38 = arith.constant dense<0xFF800000> : vector<8xf32>
    %96 = vector.multi_reduction <maximumf>, %95, %cst_38 [1] : vector<8x8xf32> to vector<8xf32>
    %97 = vector.shape_cast %96 : vector<8xf32> to vector<8x1xf32>
    %98 = vector.broadcast %97 : vector<8x1xf32> to vector<8x8xf32>
    %99 = arith.subf %95, %98 : vector<8x8xf32>
    %100 = math.exp %99 : vector<8x8xf32>
    %cst_39 = arith.constant dense<0.000000e+00> : vector<8xf32>
    %101 = vector.multi_reduction <add>, %100, %cst_39 [1] : vector<8x8xf32> to vector<8xf32>
    %102 = vector.shape_cast %101 : vector<8xf32> to vector<8x1xf32>
    %103 = tpu.reciprocal %102 {approx = true} : vector<8x1xf32> -> vector<8x1xf32>
    %104 = vector.broadcast %103 : vector<8x1xf32> to vector<8x8xf32>
    %105 = arith.mulf %100, %104 : vector<8x8xf32>
    %cst_40 = arith.constant dense<0.000000e+00> : vector<8x16xf32>
    %106 = tpu.matmul %105, %91, %cst_40 {dimension_numbers = #tpu.dot_dimension_numbers<[1], [0], [0], [1], [0, 0, 1, 1], [], []>} : vector<8x8xf32>, vector<8x16xf32>, vector<8x16xf32> -> vector<8x16xf32>
    %107 = vector.extract_strided_slice %6 {offsets = [0, 80], sizes = [8, 16], strides = [1, 1]} : vector<8x128xf32> to vector<8x16xf32>
    %108 = vector.extract_strided_slice %11 {offsets = [0, 80], sizes = [8, 16], strides = [1, 1]} : vector<8x128xf32> to vector<8x16xf32>
    %109 = vector.extract_strided_slice %16 {offsets = [0, 80], sizes = [8, 16], strides = [1, 1]} : vector<8x128xf32> to vector<8x16xf32>
    %110 = tpu.transpose %108, [1, 0] : vector<8x16xf32> -> vector<16x8xf32>
    %cst_41 = arith.constant dense<0.000000e+00> : vector<8x8xf32>
    %111 = tpu.matmul %107, %110, %cst_41 {dimension_numbers = #tpu.dot_dimension_numbers<[1], [0], [0], [1], [0, 0, 1, 1], [], []>} : vector<8x16xf32>, vector<16x8xf32>, vector<8x8xf32> -> vector<8x8xf32>
    %cst_42 = arith.constant 2.500000e-01 : f32
    %112 = vector.broadcast %cst_42 : f32 to vector<8x8xf32>
    %113 = arith.mulf %111, %112 : vector<8x8xf32>
    %cst_43 = arith.constant dense<0xFF800000> : vector<8xf32>
    %114 = vector.multi_reduction <maximumf>, %113, %cst_43 [1] : vector<8x8xf32> to vector<8xf32>
    %115 = vector.shape_cast %114 : vector<8xf32> to vector<8x1xf32>
    %116 = vector.broadcast %115 : vector<8x1xf32> to vector<8x8xf32>
    %117 = arith.subf %113, %116 : vector<8x8xf32>
    %118 = math.exp %117 : vector<8x8xf32>
    %cst_44 = arith.constant dense<0.000000e+00> : vector<8xf32>
    %119 = vector.multi_reduction <add>, %118, %cst_44 [1] : vector<8x8xf32> to vector<8xf32>
    %120 = vector.shape_cast %119 : vector<8xf32> to vector<8x1xf32>
    %121 = tpu.reciprocal %120 {approx = true} : vector<8x1xf32> -> vector<8x1xf32>
    %122 = vector.broadcast %121 : vector<8x1xf32> to vector<8x8xf32>
    %123 = arith.mulf %118, %122 : vector<8x8xf32>
    %cst_45 = arith.constant dense<0.000000e+00> : vector<8x16xf32>
    %124 = tpu.matmul %123, %109, %cst_45 {dimension_numbers = #tpu.dot_dimension_numbers<[1], [0], [0], [1], [0, 0, 1, 1], [], []>} : vector<8x8xf32>, vector<8x16xf32>, vector<8x16xf32> -> vector<8x16xf32>
    %125 = vector.extract_strided_slice %6 {offsets = [0, 96], sizes = [8, 16], strides = [1, 1]} : vector<8x128xf32> to vector<8x16xf32>
    %126 = vector.extract_strided_slice %11 {offsets = [0, 96], sizes = [8, 16], strides = [1, 1]} : vector<8x128xf32> to vector<8x16xf32>
    %127 = vector.extract_strided_slice %16 {offsets = [0, 96], sizes = [8, 16], strides = [1, 1]} : vector<8x128xf32> to vector<8x16xf32>
    %128 = tpu.transpose %126, [1, 0] : vector<8x16xf32> -> vector<16x8xf32>
    %cst_46 = arith.constant dense<0.000000e+00> : vector<8x8xf32>
    %129 = tpu.matmul %125, %128, %cst_46 {dimension_numbers = #tpu.dot_dimension_numbers<[1], [0], [0], [1], [0, 0, 1, 1], [], []>} : vector<8x16xf32>, vector<16x8xf32>, vector<8x8xf32> -> vector<8x8xf32>
    %cst_47 = arith.constant 2.500000e-01 : f32
    %130 = vector.broadcast %cst_47 : f32 to vector<8x8xf32>
    %131 = arith.mulf %129, %130 : vector<8x8xf32>
    %cst_48 = arith.constant dense<0xFF800000> : vector<8xf32>
    %132 = vector.multi_reduction <maximumf>, %131, %cst_48 [1] : vector<8x8xf32> to vector<8xf32>
    %133 = vector.shape_cast %132 : vector<8xf32> to vector<8x1xf32>
    %134 = vector.broadcast %133 : vector<8x1xf32> to vector<8x8xf32>
    %135 = arith.subf %131, %134 : vector<8x8xf32>
    %136 = math.exp %135 : vector<8x8xf32>
    %cst_49 = arith.constant dense<0.000000e+00> : vector<8xf32>
    %137 = vector.multi_reduction <add>, %136, %cst_49 [1] : vector<8x8xf32> to vector<8xf32>
    %138 = vector.shape_cast %137 : vector<8xf32> to vector<8x1xf32>
    %139 = tpu.reciprocal %138 {approx = true} : vector<8x1xf32> -> vector<8x1xf32>
    %140 = vector.broadcast %139 : vector<8x1xf32> to vector<8x8xf32>
    %141 = arith.mulf %136, %140 : vector<8x8xf32>
    %cst_50 = arith.constant dense<0.000000e+00> : vector<8x16xf32>
    %142 = tpu.matmul %141, %127, %cst_50 {dimension_numbers = #tpu.dot_dimension_numbers<[1], [0], [0], [1], [0, 0, 1, 1], [], []>} : vector<8x8xf32>, vector<8x16xf32>, vector<8x16xf32> -> vector<8x16xf32>
    %143 = vector.extract_strided_slice %6 {offsets = [0, 112], sizes = [8, 16], strides = [1, 1]} : vector<8x128xf32> to vector<8x16xf32>
    %144 = vector.extract_strided_slice %11 {offsets = [0, 112], sizes = [8, 16], strides = [1, 1]} : vector<8x128xf32> to vector<8x16xf32>
    %145 = vector.extract_strided_slice %16 {offsets = [0, 112], sizes = [8, 16], strides = [1, 1]} : vector<8x128xf32> to vector<8x16xf32>
    %146 = tpu.transpose %144, [1, 0] : vector<8x16xf32> -> vector<16x8xf32>
    %cst_51 = arith.constant dense<0.000000e+00> : vector<8x8xf32>
    %147 = tpu.matmul %143, %146, %cst_51 {dimension_numbers = #tpu.dot_dimension_numbers<[1], [0], [0], [1], [0, 0, 1, 1], [], []>} : vector<8x16xf32>, vector<16x8xf32>, vector<8x8xf32> -> vector<8x8xf32>
    %cst_52 = arith.constant 2.500000e-01 : f32
    %148 = vector.broadcast %cst_52 : f32 to vector<8x8xf32>
    %149 = arith.mulf %147, %148 : vector<8x8xf32>
    %cst_53 = arith.constant dense<0xFF800000> : vector<8xf32>
    %150 = vector.multi_reduction <maximumf>, %149, %cst_53 [1] : vector<8x8xf32> to vector<8xf32>
    %151 = vector.shape_cast %150 : vector<8xf32> to vector<8x1xf32>
    %152 = vector.broadcast %151 : vector<8x1xf32> to vector<8x8xf32>
    %153 = arith.subf %149, %152 : vector<8x8xf32>
    %154 = math.exp %153 : vector<8x8xf32>
    %cst_54 = arith.constant dense<0.000000e+00> : vector<8xf32>
    %155 = vector.multi_reduction <add>, %154, %cst_54 [1] : vector<8x8xf32> to vector<8xf32>
    %156 = vector.shape_cast %155 : vector<8xf32> to vector<8x1xf32>
    %157 = tpu.reciprocal %156 {approx = true} : vector<8x1xf32> -> vector<8x1xf32>
    %158 = vector.broadcast %157 : vector<8x1xf32> to vector<8x8xf32>
    %159 = arith.mulf %154, %158 : vector<8x8xf32>
    %cst_55 = arith.constant dense<0.000000e+00> : vector<8x16xf32>
    %160 = tpu.matmul %159, %145, %cst_55 {dimension_numbers = #tpu.dot_dimension_numbers<[1], [0], [0], [1], [0, 0, 1, 1], [], []>} : vector<8x8xf32>, vector<8x16xf32>, vector<8x16xf32> -> vector<8x16xf32>
    %161 = tpu.concatenate %34, %52, %70, %88, %106, %124, %142, %160 in 1 : vector<8x16xf32>, vector<8x16xf32>, vector<8x16xf32>, vector<8x16xf32>, vector<8x16xf32>, vector<8x16xf32>, vector<8x16xf32>, vector<8x16xf32> -> vector<8x128xf32>
    %c0_56 = arith.constant 0 : index
    %c0_57 = arith.constant 0 : index
    %162 = vector.load %arg8[%c0_56, %c0_57] : memref<128x128xf32, #tpu.memory_space<vmem>>, vector<128x128xf32>
    %cst_58 = arith.constant dense<0.000000e+00> : vector<8x128xf32>
    %163 = tpu.matmul %161, %162, %cst_58 {dimension_numbers = #tpu.dot_dimension_numbers<[1], [0], [0], [1], [0, 0, 1, 1], [], []>} : vector<8x128xf32>, vector<128x128xf32>, vector<8x128xf32> -> vector<8x128xf32>
    %c0_59 = arith.constant 0 : index
    %c0_60 = arith.constant 0 : index
    %164 = vector.load %arg9[%c0_59, %c0_60] : memref<1x128xf32, #tpu.memory_space<vmem>>, vector<1x128xf32>
    %165 = vector.broadcast %164 : vector<1x128xf32> to vector<8x128xf32>
    %166 = arith.addf %163, %165 : vector<8x128xf32>
    %167 = arith.addf %1, %166 : vector<8x128xf32>
    %c0_61 = arith.constant 0 : index
    %c0_62 = arith.constant 0 : index
    %168 = vector.load %arg10[%c0_61, %c0_62] : memref<1x128xf32, #tpu.memory_space<vmem>>, vector<1x128xf32>
    %c0_63 = arith.constant 0 : index
    %c0_64 = arith.constant 0 : index
    %169 = vector.load %arg11[%c0_63, %c0_64] : memref<1x128xf32, #tpu.memory_space<vmem>>, vector<1x128xf32>
    %cst_65 = arith.constant dense<0.000000e+00> : vector<8xf32>
    %170 = vector.multi_reduction <add>, %167, %cst_65 [1] : vector<8x128xf32> to vector<8xf32>
    %171 = vector.shape_cast %170 : vector<8xf32> to vector<8x1xf32>
    %cst_66 = arith.constant 1.280000e+02 : f32
    %172 = vector.broadcast %cst_66 : f32 to vector<8x1xf32>
    %173 = arith.divf %171, %172 : vector<8x1xf32>
    %174 = vector.broadcast %173 : vector<8x1xf32> to vector<8x128xf32>
    %175 = arith.subf %167, %174 : vector<8x128xf32>
    %176 = arith.mulf %175, %175 : vector<8x128xf32>
    %cst_67 = arith.constant dense<0.000000e+00> : vector<8xf32>
    %177 = vector.multi_reduction <add>, %176, %cst_67 [1] : vector<8x128xf32> to vector<8xf32>
    %178 = vector.shape_cast %177 : vector<8xf32> to vector<8x1xf32>
    %cst_68 = arith.constant 1.280000e+02 : f32
    %179 = vector.broadcast %cst_68 : f32 to vector<8x1xf32>
    %180 = arith.divf %178, %179 : vector<8x1xf32>
    %cst_69 = arith.constant 9.99999974E-6 : f32
    %181 = vector.broadcast %cst_69 : f32 to vector<8x1xf32>
    %182 = arith.addf %180, %181 : vector<8x1xf32>
    %183 = math.rsqrt %182 : vector<8x1xf32>
    %184 = vector.broadcast %183 : vector<8x1xf32> to vector<8x128xf32>
    %185 = arith.mulf %175, %184 : vector<8x128xf32>
    %186 = vector.broadcast %168 : vector<1x128xf32> to vector<8x128xf32>
    %187 = arith.mulf %185, %186 : vector<8x128xf32>
    %188 = vector.broadcast %169 : vector<1x128xf32> to vector<8x128xf32>
    %189 = arith.addf %187, %188 : vector<8x128xf32>
    %c0_70 = arith.constant 0 : index
    %c0_71 = arith.constant 0 : index
    %190 = vector.load %arg12[%c0_70, %c0_71] : memref<128x512xf32, #tpu.memory_space<vmem>>, vector<128x512xf32>
    %cst_72 = arith.constant dense<0.000000e+00> : vector<8x512xf32>
    %191 = tpu.matmul %189, %190, %cst_72 {dimension_numbers = #tpu.dot_dimension_numbers<[1], [0], [0], [1], [0, 0, 1, 1], [], []>} : vector<8x128xf32>, vector<128x512xf32>, vector<8x512xf32> -> vector<8x512xf32>
    %c0_73 = arith.constant 0 : index
    %c0_74 = arith.constant 0 : index
    %192 = vector.load %arg13[%c0_73, %c0_74] : memref<1x512xf32, #tpu.memory_space<vmem>>, vector<1x512xf32>
    %193 = vector.broadcast %192 : vector<1x512xf32> to vector<8x512xf32>
    %194 = arith.addf %191, %193 : vector<8x512xf32>
    %cst_75 = arith.constant 0.000000e+00 : f32
    %195 = vector.broadcast %cst_75 : f32 to vector<8x512xf32>
    %196 = arith.maximumf %194, %195 : vector<8x512xf32>
    %c0_76 = arith.constant 0 : index
    %c0_77 = arith.constant 0 : index
    %197 = vector.load %arg14[%c0_76, %c0_77] : memref<512x128xf32, #tpu.memory_space<vmem>>, vector<512x128xf32>
    %cst_78 = arith.constant dense<0.000000e+00> : vector<8x128xf32>
    %198 = tpu.matmul %196, %197, %cst_78 {dimension_numbers = #tpu.dot_dimension_numbers<[1], [0], [0], [1], [0, 0, 1, 1], [], []>} : vector<8x512xf32>, vector<512x128xf32>, vector<8x128xf32> -> vector<8x128xf32>
    %c0_79 = arith.constant 0 : index
    %c0_80 = arith.constant 0 : index
    %199 = vector.load %arg15[%c0_79, %c0_80] : memref<1x128xf32, #tpu.memory_space<vmem>>, vector<1x128xf32>
    %200 = vector.broadcast %199 : vector<1x128xf32> to vector<8x128xf32>
    %201 = arith.addf %198, %200 : vector<8x128xf32>
    %202 = arith.addf %189, %201 : vector<8x128xf32>
    %c0_81 = arith.constant 0 : index
    %c0_82 = arith.constant 0 : index
    %203 = vector.load %arg16[%c0_81, %c0_82] : memref<1x128xf32, #tpu.memory_space<vmem>>, vector<1x128xf32>
    %c0_83 = arith.constant 0 : index
    %c0_84 = arith.constant 0 : index
    %204 = vector.load %arg17[%c0_83, %c0_84] : memref<1x128xf32, #tpu.memory_space<vmem>>, vector<1x128xf32>
    %cst_85 = arith.constant dense<0.000000e+00> : vector<8xf32>
    %205 = vector.multi_reduction <add>, %202, %cst_85 [1] : vector<8x128xf32> to vector<8xf32>
    %206 = vector.shape_cast %205 : vector<8xf32> to vector<8x1xf32>
    %cst_86 = arith.constant 1.280000e+02 : f32
    %207 = vector.broadcast %cst_86 : f32 to vector<8x1xf32>
    %208 = arith.divf %206, %207 : vector<8x1xf32>
    %209 = vector.broadcast %208 : vector<8x1xf32> to vector<8x128xf32>
    %210 = arith.subf %202, %209 : vector<8x128xf32>
    %211 = arith.mulf %210, %210 : vector<8x128xf32>
    %cst_87 = arith.constant dense<0.000000e+00> : vector<8xf32>
    %212 = vector.multi_reduction <add>, %211, %cst_87 [1] : vector<8x128xf32> to vector<8xf32>
    %213 = vector.shape_cast %212 : vector<8xf32> to vector<8x1xf32>
    %cst_88 = arith.constant 1.280000e+02 : f32
    %214 = vector.broadcast %cst_88 : f32 to vector<8x1xf32>
    %215 = arith.divf %213, %214 : vector<8x1xf32>
    %cst_89 = arith.constant 9.99999974E-6 : f32
    %216 = vector.broadcast %cst_89 : f32 to vector<8x1xf32>
    %217 = arith.addf %215, %216 : vector<8x1xf32>
    %218 = math.rsqrt %217 : vector<8x1xf32>
    %219 = vector.broadcast %218 : vector<8x1xf32> to vector<8x128xf32>
    %220 = arith.mulf %210, %219 : vector<8x128xf32>
    %221 = vector.broadcast %203 : vector<1x128xf32> to vector<8x128xf32>
    %222 = arith.mulf %220, %221 : vector<8x128xf32>
    %223 = vector.broadcast %204 : vector<1x128xf32> to vector<8x128xf32>
    %224 = arith.addf %222, %223 : vector<8x128xf32>
    %c0_90 = arith.constant 0 : index
    %c0_91 = arith.constant 0 : index
    %c0_92 = arith.constant 0 : index
    %225 = vector.load %arg18[%c0_90, %c0_91, %c0_92] : memref<1x8x128xf32, #tpu.memory_space<vmem>>, vector<1x8x128xf32>
    %226 = vector.shape_cast %225 : vector<1x8x128xf32> to vector<8x128xf32>
    %227 = vector.shape_cast %224 : vector<8x128xf32> to vector<1x8x128xf32>
    tpu.vector_store %arg18[%c0_90, %c0_91, %c0_92], %227 {strides = array<i32>} : memref<1x8x128xf32, #tpu.memory_space<vmem>>, vector<1x8x128xf32>,
    return
  }
  func.func @transform_0(%arg0: i32) -> (i32, i32, i32) {
    %c0_i32 = arith.constant 0 : i32
    %c0_i32_0 = arith.constant 0 : i32
    %c0_i32_1 = arith.constant 0 : i32
    return %arg0, %c0_i32, %c0_i32_0 : i32, i32, i32
  }
  func.func @transform_1(%arg0: i32) -> (i32, i32) {
    %c0_i32 = arith.constant 0 : i32
    %c0_i32_0 = arith.constant 0 : i32
    %c0_i32_1 = arith.constant 0 : i32
    return %c0_i32, %c0_i32_0 : i32, i32
  }
  func.func @transform_2(%arg0: i32) -> (i32, i32) {
    %c0_i32 = arith.constant 0 : i32
    %c0_i32_0 = arith.constant 0 : i32
    %c0_i32_1 = arith.constant 0 : i32
    return %c0_i32, %c0_i32_0 : i32, i32
  }
  func.func @transform_3(%arg0: i32) -> (i32, i32) {
    %c0_i32 = arith.constant 0 : i32
    %c0_i32_0 = arith.constant 0 : i32
    %c0_i32_1 = arith.constant 0 : i32
    return %c0_i32, %c0_i32_0 : i32, i32
  }
  func.func @transform_4(%arg0: i32) -> (i32, i32) {
    %c0_i32 = arith.constant 0 : i32
    %c0_i32_0 = arith.constant 0 : i32
    %c0_i32_1 = arith.constant 0 : i32
    return %c0_i32, %c0_i32_0 : i32, i32
  }
  func.func @transform_5(%arg0: i32) -> (i32, i32) {
    %c0_i32 = arith.constant 0 : i32
    %c0_i32_0 = arith.constant 0 : i32
    %c0_i32_1 = arith.constant 0 : i32
    return %c0_i32, %c0_i32_0 : i32, i32
  }
  func.func @transform_6(%arg0: i32) -> (i32, i32) {
    %c0_i32 = arith.constant 0 : i32
    %c0_i32_0 = arith.constant 0 : i32
    %c0_i32_1 = arith.constant 0 : i32
    return %c0_i32, %c0_i32_0 : i32, i32
  }
  func.func @transform_7(%arg0: i32) -> (i32, i32) {
    %c0_i32 = arith.constant 0 : i32
    %c0_i32_0 = arith.constant 0 : i32
    %c0_i32_1 = arith.constant 0 : i32
    return %c0_i32, %c0_i32_0 : i32, i32
  }
  func.func @transform_8(%arg0: i32) -> (i32, i32) {
    %c0_i32 = arith.constant 0 : i32
    %c0_i32_0 = arith.constant 0 : i32
    %c0_i32_1 = arith.constant 0 : i32
    return %c0_i32, %c0_i32_0 : i32, i32
  }
  func.func @transform_9(%arg0: i32) -> (i32, i32) {
    %c0_i32 = arith.constant 0 : i32
    %c0_i32_0 = arith.constant 0 : i32
    %c0_i32_1 = arith.constant 0 : i32
    return %c0_i32, %c0_i32_0 : i32, i32
  }
  func.func @transform_10(%arg0: i32) -> (i32, i32) {
    %c0_i32 = arith.constant 0 : i32
    %c0_i32_0 = arith.constant 0 : i32
    %c0_i32_1 = arith.constant 0 : i32
    return %c0_i32, %c0_i32_0 : i32, i32
  }
  func.func @transform_11(%arg0: i32) -> (i32, i32) {
    %c0_i32 = arith.constant 0 : i32
    %c0_i32_0 = arith.constant 0 : i32
    %c0_i32_1 = arith.constant 0 : i32
    return %c0_i32, %c0_i32_0 : i32, i32
  }
  func.func @transform_12(%arg0: i32) -> (i32, i32) {
    %c0_i32 = arith.constant 0 : i32
    %c0_i32_0 = arith.constant 0 : i32
    %c0_i32_1 = arith.constant 0 : i32
    return %c0_i32, %c0_i32_0 : i32, i32
  }
  func.func @transform_13(%arg0: i32) -> (i32, i32) {
    %c0_i32 = arith.constant 0 : i32
    %c0_i32_0 = arith.constant 0 : i32
    %c0_i32_1 = arith.constant 0 : i32
    return %c0_i32, %c0_i32_0 : i32, i32
  }
  func.func @transform_14(%arg0: i32) -> (i32, i32) {
    %c0_i32 = arith.constant 0 : i32
    %c0_i32_0 = arith.constant 0 : i32
    %c0_i32_1 = arith.constant 0 : i32
    return %c0_i32, %c0_i32_0 : i32, i32
  }
  func.func @transform_15(%arg0: i32) -> (i32, i32) {
    %c0_i32 = arith.constant 0 : i32
    %c0_i32_0 = arith.constant 0 : i32
    %c0_i32_1 = arith.constant 0 : i32
    return %c0_i32, %c0_i32_0 : i32, i32
  }
  func.func @transform_16(%arg0: i32) -> (i32, i32) {
    %c0_i32 = arith.constant 0 : i32
    %c0_i32_0 = arith.constant 0 : i32
    %c0_i32_1 = arith.constant 0 : i32
    return %c0_i32, %c0_i32_0 : i32, i32
  }
  func.func @transform_17(%arg0: i32) -> (i32, i32, i32) {
    %c0_i32 = arith.constant 0 : i32
    %c0_i32_0 = arith.constant 0 : i32
    %c0_i32_1 = arith.constant 0 : i32
    return %arg0, %c0_i32, %c0_i32_0 : i32, i32, i32
  }
}

module attributes {stable_mosaic.version = 11 : i64} {
  func.func @_pool_classifier_kernel(%arg0: memref<2x8x128xf32, #tpu.memory_space<vmem>>, %arg1: memref<128x64xf32, #tpu.memory_space<vmem>>, %arg2: memref<1x64xf32, #tpu.memory_space<vmem>>, %arg3: memref<64x10xf32, #tpu.memory_space<vmem>>, %arg4: memref<1x10xf32, #tpu.memory_space<vmem>>, %arg5: memref<2x10xf32, #tpu.memory_space<vmem>>) attributes {dimension_semantics = [], scalar_prefetch = 0 : i64, scratch_operands = 0 : i64, tpu.core_type = #tpu.core_type<tc>} {
    %c0 = arith.constant 0 : index
    %c0_0 = arith.constant 0 : index
    %c0_1 = arith.constant 0 : index
    %0 = vector.load %arg0[%c0, %c0_0, %c0_1] : memref<2x8x128xf32, #tpu.memory_space<vmem>>, vector<2x8x128xf32>
    %cst = arith.constant dense<0.000000e+00> : vector<2x128xf32>
    %1 = vector.multi_reduction <add>, %0, %cst [1] : vector<2x8x128xf32> to vector<2x128xf32>
    %cst_2 = arith.constant 8.000000e+00 : f32
    %2 = vector.broadcast %cst_2 : f32 to vector<2x128xf32>
    %3 = arith.divf %1, %2 : vector<2x128xf32>
    %c0_3 = arith.constant 0 : index
    %c0_4 = arith.constant 0 : index
    %4 = vector.load %arg1[%c0_3, %c0_4] : memref<128x64xf32, #tpu.memory_space<vmem>>, vector<128x64xf32>
    %cst_5 = arith.constant dense<0.000000e+00> : vector<2x64xf32>
    %5 = tpu.matmul %3, %4, %cst_5 {dimension_numbers = #tpu.dot_dimension_numbers<[1], [0], [0], [1], [0, 0, 1, 1], [], []>} : vector<2x128xf32>, vector<128x64xf32>, vector<2x64xf32> -> vector<2x64xf32>
    %c0_6 = arith.constant 0 : index
    %c0_7 = arith.constant 0 : index
    %6 = vector.load %arg2[%c0_6, %c0_7] : memref<1x64xf32, #tpu.memory_space<vmem>>, vector<1x64xf32>
    %7 = vector.broadcast %6 : vector<1x64xf32> to vector<2x64xf32>
    %8 = arith.addf %5, %7 : vector<2x64xf32>
    %cst_8 = arith.constant 0.000000e+00 : f32
    %9 = vector.broadcast %cst_8 : f32 to vector<2x64xf32>
    %10 = arith.maximumf %8, %9 : vector<2x64xf32>
    %c0_9 = arith.constant 0 : index
    %c0_10 = arith.constant 0 : index
    %11 = vector.load %arg3[%c0_9, %c0_10] : memref<64x10xf32, #tpu.memory_space<vmem>>, vector<64x10xf32>
    %cst_11 = arith.constant dense<0.000000e+00> : vector<2x10xf32>
    %12 = tpu.matmul %10, %11, %cst_11 {dimension_numbers = #tpu.dot_dimension_numbers<[1], [0], [0], [1], [0, 0, 1, 1], [], []>} : vector<2x64xf32>, vector<64x10xf32>, vector<2x10xf32> -> vector<2x10xf32>
    %c0_12 = arith.constant 0 : index
    %c0_13 = arith.constant 0 : index
    %13 = vector.load %arg4[%c0_12, %c0_13] : memref<1x10xf32, #tpu.memory_space<vmem>>, vector<1x10xf32>
    %14 = vector.broadcast %13 : vector<1x10xf32> to vector<2x10xf32>
    %15 = arith.addf %12, %14 : vector<2x10xf32>
    %c0_14 = arith.constant 0 : index
    %c0_15 = arith.constant 0 : index
    %16 = vector.load %arg5[%c0_14, %c0_15] : memref<2x10xf32, #tpu.memory_space<vmem>>, vector<2x10xf32>
    tpu.vector_store %arg5[%c0_14, %c0_15], %15 {strides = array<i32>} : memref<2x10xf32, #tpu.memory_space<vmem>>, vector<2x10xf32>,
    return
  }
}

</mosaic_0001>

<bundles_post_ra>
// kernel: keypoint_transformer_forward.6
= control target key start
LH: loop header
LB: loop body
LE: loop exit
PB: predicated region body
PF: predicated region fallthrough
CT: control target
= control target key end

     0   :  { %9 = vsyncpa [#allocation3], 0  ;;  %s912_s0 = inlined_call_operand.vmem [shape: f32[2,8,170], index: 0, kind: input, shape index: {}]   ;;  %s913_s1 = inlined_call_operand.hbm [shape: f32[170,128], index: 1, kind: input, shape index: {}]   ;;  %s914_s2 = inlined_call_operand.hbm [shape: f32[1,128], index: 2, kind: input, shape index: {}]   ;;  %s915_s3 = inlined_call_operand.hbm [shape: f32[5000,128], index: 3, kind: input, shape index: {}]   ;;  %s916_s4 = inlined_call_operand.vmem [shape: f32[2,8,128], index: 4, kind: output, shape index: {}]  }
   0x1   :  { %10 = vsyncpa [#allocation5], 0  ;;  %s764_s15 = smov 0   ;;  %s766_s16 = smov 0  }
   0x2   :  { %s768_s17 = smov 0  }
   0x3 LB: > { %s732_s18 = smov [#allocation4]   ;;  %s503_s20 = sadd.s32 4294967295, %s730_s17   ;;  %s730_s17 = sphi %s768_s17, %s16_s17   ;;  %s726_s16 = sphi %s766_s16, %s929_s16   ;;  %s722_s15 = sphi %s764_s15, %s928_s15  }
   0x4   : > { %s183_s19 = sshll.u32 %s732_s18, 4  ;;  %p505_p0 = scmp.ge.s32.totalorder %s730_s17, 1  ;;  %s184_s19 = int_to_ptr.vmem [resolvable:$true] %s183_s19 }
   0x5   : > { %p157_p1 = scmp.lt.s32.totalorder %s730_s17, 3  ;;  %p782_p2 = scmp.eq.s32.totalorder %s503_s20, 0 }
   0x6   : > { %s28_s23 = sadd.s32 1, %s726_s16  ;;  %s733_s26 = smov [#allocation2]  }
   0x7   : > { %s920_s21 = scalar_select %p782_p2, 1, 0 }
   0x8   : > { %p786_p3 = pnand %p505_p0, %p157_p1  ;;  %p799_p6 = scmp.ge.s32.totalorder %s28_s23, 2 }
   0x9   : > { %s169_s27 = sshll.u32 %s733_s26, 4  ;;  %s616_s30 = scalar_lea.hbm %s914_s2, 16  ;;  %s803_s27 = int_to_ptr.vmem [resolvable:$true] %s169_s27 }
   0xa   : > { %s921_s22 = scalar_select %p786_p3, 1, 0 }
   0xb   : > { %p569_p4 = pneg %p786_p3  ;;  %p617_p7 = scmp.ne.s32.totalorder %s914_s2, %s616_s30 }
   0xc   : > { %s923_s25 = scalar_select %p799_p6, 1, 0 }
   0xd   : > { %p795_p5 = pnand %p782_p2, %p569_p4  ;;  %p623_p11 = scmp.lt.u32.totalorder %s616_s30, %s914_s2 }
   0xf   : > { %p813_p8 = pneg %p795_p5 }
  0x11   : > { %p619_p9 = pnand %p813_p8, %p617_p7 }
  0x13   : > { %p620_p10 = pneg %p619_p9 }
  0x15   : > { %p625_p12 = pnand %p623_p11, %p620_p10 }
  0x17   : > { %628 = shalt.err (!%p625_p12)
}
  0x18   : > { %s629_s10 = scalar_lea.vmem %s184_s19, 16  ;;  %s636_s11 = scalar_lea.vmem %s184_s19, 32 }
  0x19   : > { %p630_p13 = scmp.ne.s32.totalorder %s184_s19, %s629_s10  ;;  %p637_p4 = scmp.lt.s32.totalorder %s184_s19, %s184_s19 }
  0x1a   : > { %p638_p2 = scmp.lt.s32.totalorder %s636_s11, %s629_s10 }
  0x1b   : > { %p632_p0 = pnand %p630_p13, %p813_p8 }
  0x1c   : > { %p639_p3 = por %p638_p2, %p637_p4 }
  0x1d   : > { %p633_p1 = pneg %p632_p0 }
  0x1f   : > { %p640_p6 = pnand %p639_p3, %p633_p1 }
  0x21   : > { %643 = shalt.err (!%p640_p6)
}
  0x22   : > { %575 = dma.hbm_to_vmem [thread:$0]  (!%p795_p5), %s914_s2, 16, %s184_s19, [#allocation5]  }
  0x23   : > { %p925_p7 = scmp.ne.s32.totalorder %s923_s25, 0  ;;  %s644_s20 = scalar_lea.hbm %s913_s1, 2816 }
  0x24   : > { %p645_p2 = scmp.ne.s32.totalorder %s913_s1, %s644_s20  ;;  %p651_p9 = scmp.lt.u32.totalorder %s644_s20, %s913_s1 }
  0x25   : > { %s931_s23 = smov (%p925_p7, %s28_s23), 0 }
  0x26   : > { %p647_p3 = pnand %p645_p2, %p813_p8 }
  0x28   : > { %p648_p6 = pneg %p647_p3 }
  0x2a   : > { %p653_p10 = pnand %p651_p9, %p648_p6 }
  0x2c   : > { %656 = shalt.err (!%p653_p10)
}
  0x2d   : > { %s657_s19 = scalar_lea.vmem %s803_s27, 2816  ;;  %p665_p0 = scmp.lt.s32.totalorder %s803_s27, %s803_s27 }
  0x2e   : > { %p658_p11 = scmp.ne.s32.totalorder %s803_s27, %s657_s19  ;;  %p666_p1 = scmp.lt.s32.totalorder %s657_s19, %s657_s19 }
  0x30   : > { %p660_p12 = pnand %p658_p11, %p813_p8  ;;  %p667_p4 = por %p666_p1, %p665_p0 }
  0x32   : > { %p661_p13 = pneg %p660_p12 }
  0x34   : > { %p668_p7 = pnand %p667_p4, %p661_p13 }
  0x36   : > { %671 = shalt.err (!%p668_p7)
}
  0x37   : > { %s734_s25 = smov 128   ;;  %s735_s5 = smov 8  }
  0x38   : > { %572 = dma.hbm_to_vmem [thread:$0]  (!%p795_p5), %s913_s1, 2816, %s803_s27, [#allocation3], %s734_s25, %s734_s25, %s735_s5  }
  0x39   : > { %s736_s9 = smov [#allocation6]   ;;  %s672_s13 = scalar_lea.hbm %s915_s3, 128 }
  0x3a   : > { %s196_s10 = sshll.u32 %s736_s9, 4  ;;  %p673_p2 = scmp.ne.s32.totalorder %s915_s3, %s672_s13  ;;  %s197_s10 = int_to_ptr.vmem [resolvable:$true] %s196_s10 }
  0x3b   : > { %s677_s28 = scalar_lea.hbm %s915_s3, 80000  ;;  %p679_p10 = scmp.lt.u32.totalorder %s672_s13, %s915_s3 }
  0x3c   : > { %p675_p3 = pnand %p673_p2, %p813_p8  ;;  %p678_p9 = scmp.lt.u32.totalorder %s677_s28, %s672_s13 }
  0x3e   : > { %p676_p6 = pneg %p675_p3  ;;  %p680_p11 = por %p679_p10, %p678_p9 }
  0x40   : > { %p681_p12 = pnand %p680_p11, %p676_p6 }
  0x42   : > { %684 = shalt.err (!%p681_p12)
}
  0x43   : > { %s685_s30 = scalar_lea.vmem %s197_s10, 128  ;;  %p693_p4 = scmp.lt.s32.totalorder %s197_s10, %s197_s10 }
  0x44   : > { %p686_p13 = scmp.ne.s32.totalorder %s197_s10, %s685_s30  ;;  %p694_p7 = scmp.lt.s32.totalorder %s685_s30, %s685_s30 }
  0x46   : > { %p688_p0 = pnand %p686_p13, %p813_p8  ;;  %p695_p2 = por %p694_p7, %p693_p4 }
  0x48   : > { %p689_p1 = pneg %p688_p0 }
  0x4a   : > { %p696_p3 = pnand %p695_p2, %p689_p1 }
  0x4c   : > { %699 = shalt.err (!%p696_p3)
}
  0x4d   : > { %578 = dma.hbm_to_vmem [thread:$0]  (!%p795_p5), %s915_s3, 128, %s197_s10, [#allocation5]  }
  0x4e   : > { %p926_p6 = scmp.ne.s32.totalorder %s921_s22, 0 }
  0x4f   : > { %p927_p9 = scmp.ne.s32.totalorder (!%p926_p6), %s920_s21, 0 }
  0x50   : > { %221 = sbr.rel (%p926_p6) target bundleno = 353 (0x161), region = 36 }
  0x57   : > { %713 = dma.done.wait (%p927_p9), [#allocation3], 2816  }
  0x58   : > { %715 = vsyncadd (%p927_p9), [#allocation3], 4294964480 }
  0x59   : > { %717 = dma.done.wait (%p927_p9), [#allocation5], 144  }
  0x5a   : > { %719 = vsyncadd (%p927_p9), [#allocation5], 4294967152  ;;  %p261_p8 = scmp.lt.s32.totalorder %s722_s15, 1  ;;  %v737_v0 = vmov 0.0|0.0   ;;  %v279_v1 = vld [vmem:[#allocation2] sm:$0xff]  ;;  %v280_v2 = vld [vmem:[#allocation2 + $0x8] sm:$0xff] }
  0x5b   : > { %523 = vmatprep.subr.bf16.mxu0 %v737_v0  ;;  %v281_v3 = vld [vmem:[#allocation2 + $0x10] sm:$0xff]  ;;  %v524_v4 = vpack.c.bf16 %v280_v2, %v279_v1  ;;  %v282_v5 = vld [vmem:[#allocation2 + $0x18] sm:$0xff]  ;;  %v283_v7 = vld [vmem:[#allocation2 + $0x20] sm:$0xff]  ;;  %vm308_vm0 = vcmask 343040   ;;  %vm312_vm1 = vcmask 1041408   ;;  %vm738_vm2 = vmmov 1  }
  0x5c   : > { %s933_s15 = smov (!%p261_p8, %s722_s15), 1  ;;  %v527_v6 = vpack.c.bf16 %v282_v5, %v281_v3  ;;  %v284_v8 = vld [vmem:[#allocation2 + $0x28] sm:$0xff]  ;;  %v285_v11 = vld [vmem:[#allocation2 + $0x30] sm:$0xff]  ;;  %v286_v12 = vld [vmem:[#allocation2 + $0x38] sm:$0xff] }
  0x5d   : > { %s522_s22 = sshll.u32 %s933_s15, 4  ;;  %525 = vmatpush1.bf16.msra.mxu0 %v524_v4  ;;  %v530_v9 = vpack.c.bf16 %v284_v8, %v283_v7  ;;  %v533_v13 = vpack.c.bf16 %v286_v12, %v285_v11  ;;  %v287_v14 = vld [vmem:[#allocation2 + $0x40] sm:$0xff]  ;;  %v288_v15 = vld [vmem:[#allocation2 + $0x48] sm:$0xff]  ;;  %v289_v17 = vld [vmem:[#allocation2 + $0x50] sm:$0xff]  ;;  %s516_s5 = sshll.u32 %s933_s15, 3 }
  0x5e   : > { %526 = vmatprep.subr.bf16.mxu0 %v737_v0  ;;  %s895_s7 = scalar_lea.vmem %s912_s0, %s522_s22  ;;  %v536_v16 = vpack.c.bf16 %v288_v15, %v287_v14  ;;  %v290_v18 = vld [vmem:[#allocation2 + $0x58] sm:$0xff]  ;;  %v291_v20 = vld [vmem:[#allocation2 + $0x60] sm:$0xff]  ;;  %v292_v21 = vld [vmem:[#allocation2 + $0x68] sm:$0xff]  ;;  %s276_s9 = scalar_lea.vmem %s916_s4, %s516_s5 }
  0x5f   : > { %v278_v10 = vld [vmem:[%s895_s7 + $0x8] sm:$0xff]  ;;  %v539_v19 = vpack.c.bf16 %v290_v18, %v289_v17  ;;  %v542_v22 = vpack.c.bf16 %v292_v21, %v291_v20  ;;  %v293_v23 = vld [vmem:[#allocation2 + $0x70] sm:$0xff]  ;;  %v294_v24 = vld [vmem:[#allocation2 + $0x78] sm:$0xff] }
  0x60   : > { %519 = vmatprep.mubr.msk.f32.mxu0 %vm308_vm0, %v278_v10  ;;  %v545_v25 = vpack.c.bf16 %v294_v24, %v293_v23  ;;  %v295_v26 = vld [vmem:[#allocation2 + $0x80] sm:$0xff]  ;;  %v296_v27 = vld [vmem:[#allocation2 + $0x88] sm:$0xff]  ;;  %v297_v29 = vld [vmem:[#allocation2 + $0x90] sm:$0xff] }
  0x61   : > { %528 = vmatpush1.bf16.msra.mxu0 %v527_v6  ;;  %v548_v28 = vpack.c.bf16 %v296_v27, %v295_v26  ;;  %v298_v30 = vld [vmem:[#allocation2 + $0x98] sm:$0xff]  ;;  %v299_v32 = vld [vmem:[#allocation2 + $0xa0] sm:$0xff]  ;;  %v300_v33 = vld [vmem:[#allocation2 + $0xa8] sm:$0x3] }
  0x62   : > { %529 = vmatprep.subr.bf16.mxu0 %v737_v0  ;;  %v551_v31 = vpack.c.bf16 %v298_v30, %v297_v29  ;;  %v554_v34 = vpack.c.bf16 %v300_v33, %v299_v32  ;;  %vm555_vm3 = vmpackc.low %vm312_vm1, %vm738_vm2  ;;  %v277_v35 = vld [vmem:[%s895_s7] sm:$0xff]  ;;  %v517_v36 = vld [vmem:[#allocation4] ss:$0 sm:$0xff] }
  0x63   : > { %v386_v38 = vld [vmem:[#allocation6] sm:$0xff] }
  0x65   : > { %531 = vmatpush1.bf16.msra.mxu0 %v530_v9 }
  0x66   : > { %532 = vmatprep.subr.bf16.mxu0 %v737_v0 }
  0x69   : > { %534 = vmatpush1.bf16.msra.mxu0 %v533_v13 }
  0x6a   : > { %535 = vmatprep.subr.bf16.mxu0 %v737_v0 }
  0x6d   : > { %537 = vmatpush1.bf16.msra.mxu0 %v536_v16 }
  0x6e   : > { %538 = vmatprep.subr.bf16.mxu0 %v737_v0 }
  0x71   : > { %540 = vmatpush1.bf16.msra.mxu0 %v539_v19 }
  0x72   : > { %541 = vmatprep.subr.bf16.mxu0 %v737_v0 }
  0x75   : > { %543 = vmatpush1.bf16.msra.mxu0 %v542_v22 }
  0x76   : > { %544 = vmatprep.subr.bf16.mxu0 %v737_v0 }
  0x79   : > { %546 = vmatpush1.bf16.msra.mxu0 %v545_v25 }
  0x7a   : > { %547 = vmatprep.subr.bf16.mxu0 %v737_v0 }
  0x7d   : > { %549 = vmatpush1.bf16.msra.mxu0 %v548_v28 }
  0x7e   : > { %550 = vmatprep.subr.bf16.mxu0 %v737_v0 }
  0x81   : > { %552 = vmatpush1.bf16.msra.mxu0 %v551_v31 }
  0x82   : > { %553 = vmatprep.subr.bf16.mxu0 %v737_v0 }
  0x85   : > { %556 = vmatpush1.bf16.msk.msra.mxu0 %vm555_vm3, %v554_v34 }
  0x88   : > { %381 = vmatmul.mubr.f32.vlgmr.msra.gmra.mrb[0].mxu0 %v277_v35 }
 0x15b   : > { %v382_v37 = vpop.f32.mrb[0].mxu0 }
 0x15c   : > { %v383_v39 = vadd.f32 %v517_v36, %v382_v37  ;;  %v384_v40 = vpop.f32.mrb[1].mxu0 }
 0x15e   : > { %v387_v41 = vadd.f32 %v386_v38, %v383_v39 }
 0x160   : > { %388 = vst [vmem:[%s276_s9] sm:$0xff] %v387_v41 }
 0x161 PF: > { %s16_s17 = sadd.s32 1, %s730_s17   ;;  %s928_s15 = smov %s726_s16 }
 0x162   : > { %p13_p5 = scmp.ge.s32.totalorder %s16_s17, 4   ;;  %s929_s16 = smov %s931_s23 }
 0x164   :  { %15 = sbr.rel (!%p13_p5) target bundleno = 3 (0x3), region = 80 }
 0x16b   :  { %414 = vsyncpa [#allocation3], 1 }
 0x16c   :  { %416 = vsyncpa [#allocation3 + $0x1], 1 }
 0x16d   :  { %417 = vsyncpa [#allocation5], 1 }

// kernel: keypoint_transformer_forward.11
= control target key start
LH: loop header
LB: loop body
LE: loop exit
PB: predicated region body
PF: predicated region fallthrough
CT: control target
= control target key end

     0   :  { %v389_v3 = vmov 0.0|0.0   ;;  %vm390_vm0 = vmmov 0   ;;  %v391_v6 = vmov 0.0   ;;  %s531_s0 = inlined_call_operand.vmem [shape: f32[2,8,128], index: 0, kind: input, shape index: {}]   ;;  %s532_s1 = inlined_call_operand.vmem [shape: f32[128,64], index: 1, kind: input, shape index: {}]   ;;  %s533_s2 = inlined_call_operand.vmem [shape: f32[1,64], index: 2, kind: input, shape index: {}]   ;;  %s534_s3 = inlined_call_operand.vmem [shape: f32[64,10], index: 3, kind: input, shape index: {}]   ;;  %s535_s4 = inlined_call_operand.vmem [shape: f32[1,10], index: 4, kind: input, shape index: {}]   ;;  %s536_s5 = inlined_call_operand.hbm [shape: f32[2,10], index: 5, kind: output, shape index: {}]  }
   0x1   :  { %v38_v0 = vld [vmem:[%s532_s1] sm:$0xff]  ;;  %v39_v1 = vld [vmem:[%s532_s1 + $0x8] sm:$0xff]  ;;  %v40_v2 = vld [vmem:[%s532_s1 + $0x10] sm:$0xff]  ;;  %325 = vmatprep.subr.bf16.mxu0 %v389_v3  ;;  %303 = vmatprep.mubr.msk.f32.mxu0 %vm390_vm0, %v391_v6 }
   0x2   :  { %v326_v4 = vpack.c.bf16 %v39_v1, %v38_v0  ;;  %v41_v5 = vld [vmem:[%s532_s1 + $0x18] sm:$0xff]  ;;  %349 = vmatprep.subr.bf16.mxu1 %v389_v3  ;;  %322 = vmatprep.mubr.msk.f32.mxu1 %vm390_vm0, %v391_v6  ;;  %v42_v8 = vld [vmem:[%s532_s1 + $0x20] sm:$0xff]  ;;  %v43_v9 = vld [vmem:[%s532_s1 + $0x28] sm:$0xff] }
   0x3   :  { %v329_v7 = vpack.c.bf16 %v41_v5, %v40_v2  ;;  %v21_v10 = vld [vmem:[%s531_s0] sm:$0xff]  ;;  %v22_v11 = vld [vmem:[%s531_s0 + $0x8] sm:$0xff]  ;;  %v139_v16 = vld [vmem:[%s534_s3 + $0x10] sm:$0xff]  ;;  %v332_v17 = vpack.c.bf16 %v43_v9, %v42_v8 }
   0x4   :  { %327 = vmatpush3.bf16.msra.mxu0 %v326_v4  ;;  %v23_v12 = vrot.slane %v21_v10, 4  ;;  %v29_v13 = vrot.slane %v22_v11, 4  ;;  %v137_v14 = vld [vmem:[%s534_s3] sm:$0xff]  ;;  %v138_v15 = vld [vmem:[%s534_s3 + $0x8] sm:$0xff]  ;;  %v140_v19 = vld [vmem:[%s534_s3 + $0x18] sm:$0xff] }
   0x5   :  { %328 = vmatprep.subr.bf16.mxu0 %v389_v3  ;;  %v350_v18 = vpack.c.bf16 %v138_v15, %v137_v14  ;;  %v44_v20 = vld [vmem:[%s532_s1 + $0x30] sm:$0xff]  ;;  %v45_v21 = vld [vmem:[%s532_s1 + $0x38] sm:$0xff] }
   0x6   :  { %v24_v22 = vadd.f32 %v23_v12, %v21_v10  ;;  %v30_v23 = vadd.f32 %v29_v13, %v22_v11 }
   0x8   :  { %330 = vmatpush3.bf16.msra.mxu0 %v329_v7 }
   0x9   :  { %331 = vmatprep.subr.bf16.mxu0 %v389_v3 }
   0xa   :  { %10 = vsyncpa [#allocation3], 0  ;;  %351 = vmatpush3.bf16.msra.mxu1 %v350_v18  ;;  %v353_v24 = vpack.c.bf16 %v140_v19, %v139_v16  ;;  %v141_v25 = vld [vmem:[%s534_s3 + $0x20] sm:$0xff]  ;;  %v142_v26 = vld [vmem:[%s534_s3 + $0x28] sm:$0xff]  ;;  %v335_v27 = vpack.c.bf16 %v45_v21, %v44_v20  ;;  %v25_v28 = vrot.slane %v24_v22, 2  ;;  %v31_v29 = vrot.slane %v30_v23, 2 }
   0xb   :  { %352 = vmatprep.subr.bf16.mxu1 %v389_v3  ;;  %v46_v30 = vld [vmem:[%s532_s1 + $0x40] sm:$0xff]  ;;  %v47_v31 = vld [vmem:[%s532_s1 + $0x48] sm:$0xff]  ;;  %v356_v32 = vpack.c.bf16 %v142_v26, %v141_v25  ;;  %v48_v36 = vld [vmem:[%s532_s1 + $0x50] sm:$0xff]  ;;  %vm63_vm1 = vcmask 1041409   ;;  %vm152_vm2 = vcmask 523264   ;;  %s392_s21 = smov [#allocation2]  }
   0xc   :  { %333 = vmatpush3.bf16.msra.mxu0 %v332_v17  ;;  %v338_v33 = vpack.c.bf16 %v47_v31, %v46_v30  ;;  %v26_v34 = vadd.f32 %v25_v28, %v24_v22  ;;  %v32_v35 = vadd.f32 %v31_v29, %v30_v23  ;;  %v49_v37 = vld [vmem:[%s532_s1 + $0x58] sm:$0xff]  ;;  %v50_v41 = vld [vmem:[%s532_s1 + $0x60] sm:$0xff]  ;;  %v51_v42 = vld [vmem:[%s532_s1 + $0x68] sm:$0xff]  ;;  %s234_s22 = sshll.u32 %s392_s21, 4  ;;  %vm226_vm3 = vcmask 74752   ;;  %s235_s22 = int_to_ptr.vmem [resolvable:$true] %s234_s22 }
   0xd   :  { %334 = vmatprep.subr.bf16.mxu0 %v389_v3  ;;  %v341_v38 = vpack.c.bf16 %v49_v37, %v48_v36  ;;  %v344_v43 = vpack.c.bf16 %v51_v42, %v50_v41  ;;  %v52_v46 = vld [vmem:[%s532_s1 + $0x70] sm:$0xff]  ;;  %v53_v47 = vld [vmem:[%s532_s1 + $0x78] sm:$0xff]  ;;  %v242_v55 = vld [vmem:[%s533_s2] ss:$0 sm:$0xff]  ;;  %p370_p1 = scmp.lt.s32.totalorder %s235_s22, %s235_s22 }
   0xe   :  { %354 = vmatpush3.bf16.msra.mxu1 %v353_v24  ;;  %v27_v39 = vrot.slane %v26_v34, 1  ;;  %v33_v40 = vrot.slane %v32_v35, 1  ;;  %v347_v48 = vpack.c.bf16 %v53_v47, %v52_v46  ;;  %v143_v52 = vld [vmem:[%s534_s3 + $0x30] sm:$0xff]  ;;  %v144_v53 = vld [vmem:[%s534_s3 + $0x38] sm:$0xff]  ;;  %v243_v60 = vld [vmem:[%s535_s4] ss:$0 sm:$0xff] }
   0xf   :  { %355 = vmatprep.subr.bf16.mxu1 %v389_v3  ;;  %v359_v54 = vpack.c.bf16 %v144_v53, %v143_v52  ;;  %s365_s3 = scalar_lea.vmem %s235_s22, 32 }
  0x10   :  { %336 = vmatpush3.bf16.msra.mxu0 %v335_v27  ;;  %v28_v44 = vadd.f32 %v27_v39, %v26_v34  ;;  %v34_v45 = vadd.f32 %v33_v40, %v32_v35  ;;  %p366_p0 = scmp.ne.s32.totalorder %s235_s22, %s365_s3  ;;  %p371_p2 = scmp.lt.s32.totalorder %s365_s3, %s365_s3 }
  0x11   :  { %337 = vmatprep.subr.bf16.mxu0 %v389_v3 }
  0x12   :  { %357 = vmatpush3.bf16.msra.mxu1 %v356_v32  ;;  %v36_v49 = vmul.f32 0.125, %v28_v44  ;;  %v37_v50 = vmul.f32 0.125, %v34_v45  ;;  %p372_p3 = por %p371_p2, %p370_p1 }
  0x13   :  { %358 = vmatprep.subr.bf16.mxu1 %v389_v3 }
  0x14   :  { %339 = vmatpush3.bf16.msra.mxu0 %v338_v33  ;;  %v64_v51 = vsel %vm63_vm1, %v37_v50, %v36_v49  ;;  %p373_p4 = pnand %p372_p3, %p366_p0 }
  0x15   :  { %340 = vmatprep.subr.bf16.mxu0 %v389_v3 }
  0x16   :  { %360 = vmatpush3.bf16.msra.mxu1 %v359_v54 }
  0x18   :  { %342 = vmatpush3.bf16.msra.mxu0 %v341_v38 }
  0x19   :  { %343 = vmatprep.subr.bf16.mxu0 %v389_v3 }
  0x1c   :  { %345 = vmatpush3.bf16.msra.mxu0 %v344_v43 }
  0x1d   :  { %346 = vmatprep.subr.bf16.mxu0 %v389_v3 }
  0x20   :  { %348 = vmatpush3.bf16.msra.mxu0 %v347_v48 }
  0x23   :  { %304 = vmatmul.mubr.f32.vlgmr.msra.gmra.mrb[0].mxu0 %v64_v51 }
  0xf6   :  { %v132_v56 = vpop.f32.mrb[0].mxu0 }
  0xf7   :  { %v133_v57 = vadd.f32 %v242_v55, %v132_v56  ;;  %v305_v58 = vpop.f32.mrb[1].mxu0 }
  0xf9   :  { %v136_v59 = vmax.f32 %v133_v57, 0.0 }
  0xfb   :  { %323 = vmatmul.mubr.msk.f32.vlgmr.msra.gmra.mrb[0].mxu1 %vm152_vm2, %v136_v59 }
 0x1ce   :  { %v222_v61 = vpop.f32.mrb[0].mxu1 }
 0x1cf   :  { %v223_v62 = vadd.f32 %v243_v60, %v222_v61  ;;  %v324_v63 = vpop.f32.mrb[1].mxu1 }
 0x1d1   :  { %227 = vst.msk [vmem:[#allocation2] sm:$0x3] %vm226_vm3, %v223_v62 }
 0x1d2   :  { %376 = shalt.err (!%p373_p4)
}
 0x1d3   :  { %s377_s24 = scalar_lea.hbm %s536_s5, 32 }
 0x1d4   :  { %p378_p5 = scmp.ne.s32.totalorder %s536_s5, %s377_s24  ;;  %p381_p6 = scmp.lt.u32.totalorder %s377_s24, %s536_s5 }
 0x1d6   :  { %p383_p7 = pnand %p381_p6, %p378_p5 }
 0x1d8   :  { %386 = shalt.err (!%p383_p7)
}
 0x1d9   :  { %237 = dma.vmem_to_hbm [thread:$0]  %s235_s22, 32, %s536_s5, [#allocation3]  }
 0x1da   :  { %387 = dma.done.wait [#allocation3], 32  }
 0x1db   :  { %388 = vsyncadd [#allocation3], 4294967264 }
 0x1dc   :  { %241 = vsyncpa [#allocation3], 1 }

// kernel: keypoint_transformer_forward.7
= control target key start
LH: loop header
LB: loop body
LE: loop exit
PB: predicated region body
PF: predicated region fallthrough
CT: control target
= control target key end

     0   :  { %s4613_s0 = inlined_call_operand.vmem [shape: f32[2,8,128], index: 0, kind: input, shape index: {}, may-alias: {0,17}]   ;;  %s4614_s1 = inlined_call_operand.vmem [shape: f32[128,128], index: 1, kind: input, shape index: {}]   ;;  %s4615_s2 = inlined_call_operand.vmem [shape: f32[1,128], index: 2, kind: input, shape index: {}]   ;;  %s4616_s3 = inlined_call_operand.vmem [shape: f32[128,128], index: 3, kind: input, shape index: {}]   ;;  %s4617_s4 = inlined_call_operand.vmem [shape: f32[1,128], index: 4, kind: input, shape index: {}]   ;;  %s4618_s5 = inlined_call_operand.vmem [shape: f32[128,128], index: 5, kind: input, shape index: {}]   ;;  %s4619_s6 = inlined_call_operand.vmem [shape: f32[1,128], index: 6, kind: input, shape index: {}]   ;;  %s4620_s7 = inlined_call_operand.vmem [shape: f32[128,128], index: 7, kind: input, shape index: {}]   ;;  %s4621_s8 = inlined_call_operand.vmem [shape: f32[1,128], index: 8, kind: input, shape index: {}]   ;;  %s4622_s9 = inlined_call_operand.vmem [shape: f32[1,128], index: 9, kind: input, shape index: {}]   ;;  %s4623_s10 = inlined_call_operand.vmem [shape: f32[1,128], index: 10, kind: input, shape index: {}]   ;;  %s4624_s11 = inlined_call_operand.vmem [shape: f32[128,512], index: 11, kind: input, shape index: {}]   ;;  %s4625_s12 = inlined_call_operand.vmem [shape: f32[1,512], index: 12, kind: input, shape index: {}]   ;;  %s4626_s13 = inlined_call_operand.vmem [shape: f32[512,128], index: 13, kind: input, shape index: {}]   ;;  %s4627_s14 = inlined_call_operand.vmem [shape: f32[1,128], index: 14, kind: input, shape index: {}]   ;;  %s4628_s15 = inlined_call_operand.vmem [shape: f32[1,128], index: 15, kind: input, shape index: {}]   ;;  %s4629_s16 = inlined_call_operand.hbm [shape: f32[1,128], index: 16, kind: input, shape index: {}]   ;;  %s4630_s17 = inlined_call_operand.vmem [shape: f32[2,8,128], index: 17, kind: output, shape index: {}, may-alias: {0,17}]  }
   0x1   :  { %4635 = sst [smem:[#allocation5_spill]] %s4613_s0 }
   0x2   :  { %4636 = sst [smem:[#allocation6_spill]] %s4614_s1 }
   0x3   :  { %22 = vsyncpa [#allocation3], 0  ;;  %s3727_s24 = smov 0  }
   0x4 LB: > { %s3733_s25 = sadd.s32 4294967295, %s3624_s24   ;;  %p2865_p0 = scmp.ge.s32.totalorder %s3624_s24, 1  ;;  %s3624_s24 = sphi %s3727_s24, %s28_s24  }
   0x5   : > { %p421_p1 = scmp.lt.s32.totalorder %s3624_s24, 3  ;;  %p4632_p3 = scmp.eq.s32.totalorder %s3733_s25, 0 }
   0x6   : > { %s3626_s27 = smov [#allocation2]   ;;  %s3586_s18 = scalar_lea.hbm %s4629_s16, 16 }
   0x7   : > { %p3737_p2 = pnand %p2865_p0, %p421_p1  ;;  %s479_s28 = sshll.u32 %s3626_s27, 4  ;;  %s480_s28 = int_to_ptr.vmem [resolvable:$true] %s479_s28 }
   0x8   : > { %p3587_p6 = scmp.ne.s32.totalorder %s4629_s16, %s3586_s18  ;;  %p3593_p10 = scmp.lt.u32.totalorder %s3586_s18, %s4629_s16 }
   0x9   : > { %s4637_s26 = scalar_select %p3737_p2, 1, 0 }
   0xa   : > { %p3525_p4 = pneg %p3737_p2 }
   0xc   : > { %p3746_p5 = pnand %p4632_p3, %p3525_p4 }
   0xe   : > { %p3588_p7 = pneg %p3746_p5 }
  0x10   : > { %p3589_p8 = pnand %p3588_p7, %p3587_p6 }
  0x12   : > { %p3590_p9 = pneg %p3589_p8 }
  0x14   : > { %p3595_p11 = pnand %p3593_p10, %p3590_p9 }
  0x16   : > { %3598 = shalt.err (!%p3595_p11)
}
  0x17   : > { %s3599_s22 = scalar_lea.vmem %s480_s28, 16  ;;  %s3606_s23 = scalar_lea.vmem %s480_s28, 32 }
  0x18   : > { %p3600_p12 = scmp.ne.s32.totalorder %s480_s28, %s3599_s22  ;;  %p3607_p1 = scmp.lt.s32.totalorder %s480_s28, %s480_s28 }
  0x19   : > { %p3608_p4 = scmp.lt.s32.totalorder %s3606_s23, %s3599_s22 }
  0x1a   : > { %p3602_p13 = pnand %p3600_p12, %p3588_p7 }
  0x1b   : > { %p3609_p3 = por %p3608_p4, %p3607_p1 }
  0x1c   : > { %p3603_p0 = pneg %p3602_p13 }
  0x1e   : > { %p3610_p2 = pnand %p3609_p3, %p3603_p0 }
  0x20   : > { %3613 = shalt.err (!%p3610_p2)
}
  0x21   : > { %3528 = dma.hbm_to_vmem [thread:$0]  (!%p3746_p5), %s4629_s16, 16, %s480_s28, [#allocation3]  }
  0x22   : > { %p4639_p6 = scmp.ne.s32.totalorder %s4637_s26, 0 }
  0x23   : > { %p4640_p8 = scmp.eq.s32.totalorder (!%p4639_p6), %s3733_s25, 0 }
  0x24   : > { %499 = sbr.rel (%p4639_p6) target bundleno = 6156 (0x180c), region = 88 }
  0x2b   : > { %3619 = dma.done.wait (%p4640_p8), [#allocation3], 16   ;;  %p4641_p7 = pmov %p4640_p8 }
  0x2c   : > { %v3627_v0 = vmov 0.0|0.0   ;;  %vm3628_vm0 = vmmov 0   ;;  %v3629_v1 = vmov 0.0   ;;  %v651_v2 = vld [vmem:[%s4616_s3] sm:$0xff]  ;;  %v652_v3 = vld [vmem:[%s4616_s3 + $0x8] sm:$0xff]  ;;  %s4642_s1 = sld [smem:[#allocation6_spill]] }
  0x2d   : > { %3621 = vsyncadd (%p4641_p7), [#allocation3], 4294967280  ;;  %3321 = vmatprep.subr.bf16.mxu1 %v3627_v0  ;;  %3297 = vmatprep.subr.bf16.mxu0 %v3627_v0  ;;  %v3322_v5 = vpack.c.bf16 %v652_v3, %v651_v2  ;;  %v653_v7 = vld [vmem:[%s4616_s3 + $0x10] sm:$0xff]  ;;  %v654_v8 = vld [vmem:[%s4616_s3 + $0x18] sm:$0xff]  ;;  %p549_p2 = scmp.lt.s32.totalorder %s3733_s25, 1  ;;  %s4643_s21 = sld [smem:[#allocation5_spill]] }
  0x2e   : > { %3144 = vmatprep.mubr.msk.f32.mxu1 %vm3628_vm0, %v3629_v1  ;;  %3109 = vmatprep.mubr.msk.f32.mxu0 %vm3628_vm0, %v3629_v1  ;;  %v3325_v12 = vpack.c.bf16 %v654_v8, %v653_v7  ;;  %v655_v14 = vld [vmem:[%s4616_s3 + $0x20] sm:$0xff]  ;;  %v656_v15 = vld [vmem:[%s4616_s3 + $0x28] sm:$0xff]  ;;  %v657_v20 = vld [vmem:[%s4616_s3 + $0x30] sm:$0xff]  ;;  %vm837_vm1 = vcmask 130048   ;;  %s3630_s28 = smov 112   ;;  %vm915_vm2 = vcmask 64512  }
  0x2f   : > { %3323 = vmatpush3.bf16.msra.mxu1 %v3322_v5  ;;  %v3328_v18 = vpack.c.bf16 %v656_v15, %v655_v14  ;;  %v658_v21 = vld [vmem:[%s4616_s3 + $0x38] sm:$0xff]  ;;  %v659_v26 = vld [vmem:[%s4616_s3 + $0x40] sm:$0xff]  ;;  %v660_v27 = vld [vmem:[%s4616_s3 + $0x48] sm:$0xff]  ;;  %s4646_s25 = smov (!%p549_p2, %s3733_s25), 1  ;;  %s3633_s23 = smov 64   ;;  %vm2192_vm3 = vcmask 261120  }
  0x30   : > { %3324 = vmatprep.subr.bf16.mxu1 %v3627_v0  ;;  %v3331_v24 = vpack.c.bf16 %v658_v21, %v657_v20  ;;  %v3334_v30 = vpack.c.bf16 %v660_v27, %v659_v26  ;;  %v661_v32 = vld [vmem:[%s4616_s3 + $0x50] sm:$0xff]  ;;  %v662_v33 = vld [vmem:[%s4616_s3 + $0x58] sm:$0xff]  ;;  %v663_v38 = vld [vmem:[%s4616_s3 + $0x60] sm:$0xff]  ;;  %s4634_s18 = sshll.u32 %s4646_s25, 3  ;;  %s3634_s27 = smov 48   ;;  %vm2194_vm4 = vcmask 392192  }
  0x31   : > { %v3337_v36 = vpack.c.bf16 %v662_v33, %v661_v32  ;;  %v664_v39 = vld [vmem:[%s4616_s3 + $0x68] sm:$0xff]  ;;  %v665_v44 = vld [vmem:[%s4616_s3 + $0x70] sm:$0xff]  ;;  %v666_v45 = vld [vmem:[%s4616_s3 + $0x78] sm:$0xff]  ;;  %s3635_s0 = smov 32   ;;  %s3636_s26 = smov 16   ;;  %vm2196_vm5 = vcmask 523264  }
  0x32   : > { %v558_v4 = vld [vmem:[%s4642_s1] sm:$0xff]  ;;  %v559_v6 = vld [vmem:[%s4642_s1 + $0x8] sm:$0xff]  ;;  %v560_v10 = vld [vmem:[%s4642_s1 + $0x10] sm:$0xff]  ;;  %v3340_v42 = vpack.c.bf16 %v664_v39, %v663_v38  ;;  %v3343_v48 = vpack.c.bf16 %v666_v45, %v665_v44  ;;  %vm2198_vm6 = vcmask 654336   ;;  %vm2200_vm7 = vcmask 785408  }
  0x33   : > { %v3298_v9 = vpack.c.bf16 %v559_v6, %v558_v4  ;;  %v561_v11 = vld [vmem:[%s4642_s1 + $0x18] sm:$0xff]  ;;  %v562_v16 = vld [vmem:[%s4642_s1 + $0x20] sm:$0xff]  ;;  %v563_v17 = vld [vmem:[%s4642_s1 + $0x28] sm:$0xff]  ;;  %3326 = vmatpush3.bf16.msra.mxu1 %v3325_v12  ;;  %s552_s22 = scalar_lea.vmem %s4643_s21, %s4634_s18  ;;  %s3631_s21 = smov 96   ;;  %vm2202_vm8 = vcmask 916480  }
  0x34   : > { %v3301_v13 = vpack.c.bf16 %v561_v11, %v560_v10  ;;  %3327 = vmatprep.subr.bf16.mxu1 %v3627_v0  ;;  %v3304_v19 = vpack.c.bf16 %v563_v17, %v562_v16  ;;  %v564_v22 = vld [vmem:[%s4642_s1 + $0x30] sm:$0xff]  ;;  %v565_v23 = vld [vmem:[%s4642_s1 + $0x38] sm:$0xff]  ;;  %v566_v28 = vld [vmem:[%s4642_s1 + $0x40] sm:$0xff] }
  0x35   : > { %3299 = vmatpush3.bf16.msra.mxu0 %v3298_v9  ;;  %v3307_v25 = vpack.c.bf16 %v565_v23, %v564_v22  ;;  %v567_v29 = vld [vmem:[%s4642_s1 + $0x48] sm:$0xff]  ;;  %v568_v34 = vld [vmem:[%s4642_s1 + $0x50] sm:$0xff]  ;;  %v569_v35 = vld [vmem:[%s4642_s1 + $0x58] sm:$0xff] }
  0x36   : > { %3300 = vmatprep.subr.bf16.mxu0 %v3627_v0  ;;  %v3310_v31 = vpack.c.bf16 %v567_v29, %v566_v28  ;;  %v3313_v37 = vpack.c.bf16 %v569_v35, %v568_v34  ;;  %v570_v40 = vld [vmem:[%s4642_s1 + $0x60] sm:$0xff]  ;;  %v571_v41 = vld [vmem:[%s4642_s1 + $0x68] sm:$0xff]  ;;  %v572_v46 = vld [vmem:[%s4642_s1 + $0x70] sm:$0xff] }
  0x37   : > { %3329 = vmatpush3.bf16.msra.mxu1 %v3328_v18  ;;  %v3316_v43 = vpack.c.bf16 %v571_v41, %v570_v40  ;;  %v573_v47 = vld [vmem:[%s4642_s1 + $0x78] sm:$0xff]  ;;  %v3898_v50 = vld [vmem:[%s552_s22] sm:$0xff]  ;;  %v745_v60 = vld [vmem:[%s4618_s5 + $0x8] sm:$0xff]  ;;  %s3632_s22 = smov 80  }
  0x38   : > { %3330 = vmatprep.subr.bf16.mxu1 %v3627_v0  ;;  %v3319_v49 = vpack.c.bf16 %v573_v47, %v572_v46  ;;  %v2873_v51 = vld [vmem:[%s4617_s4] ss:$0 sm:$0xff]  ;;  %v746_v61 = vld [vmem:[%s4618_s5 + $0x10] sm:$0xff]  ;;  %v747_v63 = vld [vmem:[%s4618_s5 + $0x18] sm:$0xff] }
  0x39   : > { %3302 = vmatpush3.bf16.msra.mxu0 %v3301_v13  ;;  %v2872_v52 = vld [vmem:[%s4615_s2] ss:$0 sm:$0xff]  ;;  %v3349_v2 = vpack.c.bf16 %v747_v63, %v746_v61  ;;  %v749_v4 = vld [vmem:[%s4618_s5 + $0x28] sm:$0xff]  ;;  %v750_v6 = vld [vmem:[%s4618_s5 + $0x30] sm:$0xff] }
  0x3a   : > { %3303 = vmatprep.subr.bf16.mxu0 %v3627_v0  ;;  %v744_v59 = vld [vmem:[%s4618_s5] sm:$0xff]  ;;  %v751_v7 = vld [vmem:[%s4618_s5 + $0x38] sm:$0xff]  ;;  %v753_v10 = vld [vmem:[%s4618_s5 + $0x48] sm:$0xff] }
  0x3b   : > { %3332 = vmatpush3.bf16.msra.mxu1 %v3331_v24  ;;  %v3346_v62 = vpack.c.bf16 %v745_v60, %v744_v59  ;;  %v748_v3 = vld [vmem:[%s4618_s5 + $0x20] sm:$0xff]  ;;  %v3355_v8 = vpack.c.bf16 %v751_v7, %v750_v6  ;;  %v754_v12 = vld [vmem:[%s4618_s5 + $0x50] sm:$0xff]  ;;  %v755_v13 = vld [vmem:[%s4618_s5 + $0x58] sm:$0xff] }
  0x3c   : > { %3333 = vmatprep.subr.bf16.mxu1 %v3627_v0  ;;  %v3352_v5 = vpack.c.bf16 %v749_v4, %v748_v3  ;;  %v752_v9 = vld [vmem:[%s4618_s5 + $0x40] sm:$0xff]  ;;  %v3361_v14 = vpack.c.bf16 %v755_v13, %v754_v12  ;;  %v757_v16 = vld [vmem:[%s4618_s5 + $0x68] sm:$0xff]  ;;  %v758_v18 = vld [vmem:[%s4618_s5 + $0x70] sm:$0xff] }
  0x3d   : > { %3305 = vmatpush3.bf16.msra.mxu0 %v3304_v19  ;;  %v3358_v11 = vpack.c.bf16 %v753_v10, %v752_v9  ;;  %v756_v15 = vld [vmem:[%s4618_s5 + $0x60] sm:$0xff]  ;;  %v759_v19 = vld [vmem:[%s4618_s5 + $0x78] sm:$0xff] }
  0x3e   : > { %3306 = vmatprep.subr.bf16.mxu0 %v3627_v0  ;;  %v3364_v17 = vpack.c.bf16 %v757_v16, %v756_v15  ;;  %v3367_v20 = vpack.c.bf16 %v759_v19, %v758_v18 }
  0x3f   : > { %3335 = vmatpush3.bf16.msra.mxu1 %v3334_v30  ;;  %v2874_v30 = vld [vmem:[%s4619_s6] ss:$0 sm:$0xff] }
  0x40   : > { %3336 = vmatprep.subr.bf16.mxu1 %v3627_v0 }
  0x41   : > { %3308 = vmatpush3.bf16.msra.mxu0 %v3307_v25 }
  0x42   : > { %3309 = vmatprep.subr.bf16.mxu0 %v3627_v0 }
  0x43   : > { %3338 = vmatpush3.bf16.msra.mxu1 %v3337_v36 }
  0x44   : > { %3339 = vmatprep.subr.bf16.mxu1 %v3627_v0 }
  0x45   : > { %3311 = vmatpush3.bf16.msra.mxu0 %v3310_v31 }
  0x46   : > { %3312 = vmatprep.subr.bf16.mxu0 %v3627_v0 }
  0x47   : > { %3341 = vmatpush3.bf16.msra.mxu1 %v3340_v42 }
  0x48   : > { %3342 = vmatprep.subr.bf16.mxu1 %v3627_v0 }
  0x49   : > { %3314 = vmatpush3.bf16.msra.mxu0 %v3313_v37 }
  0x4a   : > { %3315 = vmatprep.subr.bf16.mxu0 %v3627_v0 }
  0x4b   : > { %3344 = vmatpush3.bf16.msra.mxu1 %v3343_v48 }
  0x4c   : > { %3182 = vmatprep.subr.mxu1 %v3629_v1 }
  0x4d   : > { %3317 = vmatpush3.bf16.msra.mxu0 %v3316_v43 }
  0x4e   : > { %3318 = vmatprep.subr.bf16.mxu0 %v3627_v0  ;;  %3145 = vmatmul.mubr.f32.vlgmr.msra.gmra.mrb[0].mxu1 %v3898_v50 }
  0x4f   : > { %3184 = vmatprep.mubr.msk.f32.mxu1 %vm3628_vm0, %v3629_v1 }
  0x51   : > { %3320 = vmatpush3.bf16.msra.mxu0 %v3319_v49 }
  0x52   : > { %3345 = vmatprep.subr.bf16.mxu0 %v3627_v0 }
  0x54   : > { %3110 = vmatmul.mubr.f32.vlgmr.msra.gmra.mrb[0].mxu0 %v3898_v50 }
  0x55   : > { %3179 = vmatprep.mubr.msk.f32.mxu0 %vm3628_vm0, %v3629_v1  ;;  %3347 = vmatpush3.bf16.msra.mxu0 %v3346_v62 }
  0x56   : > { %3348 = vmatprep.subr.bf16.mxu0 %v3627_v0 }
  0x59   : > { %3350 = vmatpush3.bf16.msra.mxu0 %v3349_v2 }
  0x5a   : > { %3351 = vmatprep.subr.bf16.mxu0 %v3627_v0 }
  0x5d   : > { %3353 = vmatpush3.bf16.msra.mxu0 %v3352_v5 }
  0x5e   : > { %3354 = vmatprep.subr.bf16.mxu0 %v3627_v0 }
  0x61   : > { %3356 = vmatpush3.bf16.msra.mxu0 %v3355_v8 }
  0x62   : > { %3357 = vmatprep.subr.bf16.mxu0 %v3627_v0 }
  0x65   : > { %3359 = vmatpush3.bf16.msra.mxu0 %v3358_v11 }
  0x66   : > { %3360 = vmatprep.subr.bf16.mxu0 %v3627_v0 }
  0x69   : > { %3362 = vmatpush3.bf16.msra.mxu0 %v3361_v14 }
  0x6a   : > { %3363 = vmatprep.subr.bf16.mxu0 %v3627_v0 }
  0x6d   : > { %3365 = vmatpush3.bf16.msra.mxu0 %v3364_v17 }
  0x6e   : > { %3366 = vmatprep.subr.bf16.mxu0 %v3627_v0 }
  0x71   : > { %3368 = vmatpush3.bf16.msra.mxu0 %v3367_v20 }
  0x72   : > { %3369 = vmatprep.subr.bf16.mxu0 %v3627_v0 }
  0x74   : > { %3180 = vmatmul.mubr.f32.vlgmr.msra.gmra.mrb[2].mxu0 %v3898_v50 }
  0x75   : > { %3294 = vmatprep.mubr.msk.f32.mxu0 %vm3628_vm0, %v3629_v1 }
 0x121   : > { %v740_v53 = vpop.f32.mrb[0].mxu1 }
 0x122   : > { %v3914_v54 = vadd.f32 %v2873_v51, %v740_v53  ;;  %v3146_v55 = vpop.f32.mrb[1].mxu1 }
 0x124   : > { %1002 = vrot.lane.b32.xlu1 %v3914_v54, %s3630_s28  ;;  %3183 = vmatpush3.xpose.msk.msra.mxu1 %vm837_vm1, %v3914_v54 }
 0x125   : > { %3187 = vmatprep.subr.mxu1 %v3629_v1 }
 0x127   : > { %v647_v56 = vpop.f32.mrb[0].mxu0 }
 0x128   : > { %v3916_v57 = vadd.f32 %v2872_v52, %v647_v56  ;;  %v3111_v58 = vpop.f32.mrb[1].mxu0 }
 0x12a   : > { %3185 = vmatmul.mubr.msk.f32.vlgmr.msra.gmra.mrb[2].mxu1 %vm837_vm1, %v3916_v57  ;;  %1000 = vrot.lane.b32.xlu1 %v3916_v57, %s3630_s28 }
 0x12b   : > { %3189 = vmatprep.mubr.msk.f32.mxu1 %vm3628_vm0, %v3629_v1 }
 0x147   : > { %v833_v31 = vpop.f32.mrb[2].mxu0 }
 0x148   : > { %v3993_v32 = vadd.f32 %v2874_v30, %v833_v31  ;;  %v3181_v33 = vpop.f32.mrb[3].mxu0 }
 0x14a   : > { %3188 = vmatpush3.msra.mxu1 %v3993_v32 }
 0x14b   : > { %3192 = vmatprep.subr.mxu1 %v3629_v1 }
 0x196   : > { %v1003_v36 = vpop.permute.xlu1 %1002 }
 0x19c   : > { %v1001_v38 = vpop.permute.xlu1 %1000 }
 0x1fd   : > { %v910_v21 = vpop.f32.mrb[2].mxu1 }
 0x1fe   : > { %v914_v22 = vmul.f32 0.25, %v910_v21  ;;  %v3186_v23 = vpop.f32.mrb[3].mxu1 }
 0x200   : > { %v916_v24 = vsel %vm915_vm2, %v914_v22, -inf }
 0x201   : > { %917 = vmax.xlane.f32.xlu0 %v916_v24 }
 0x28e   : > { %v918_v25 = vpop.xlane.xlu0 %917 }
 0x28f   : > { %v919_v26 = vsub.f32 %v914_v22, %v918_v25 }
 0x291   : > { %v920_v27 = vmul.f32 1.442695, %v919_v26 }
 0x293   : > { %3550 = vpow2.f32 %v920_v27 }
 0x29d   : > { %v3551_v28 = vpop.eup %3550 }
 0x29e   : > { %v922_v29 = vsel %vm915_vm2, %v3551_v28, 0.0 }
 0x29f   : > { %923 = vadd.xlane.f32.xlu0 %v922_v29 }
 0x32c   : > { %v924_v34 = vpop.xlane.xlu0 %923 }
 0x32d   : > { %3552 = vrcp.f32 %v924_v34 }
 0x337   : > { %v3553_v35 = vpop.eup %3552 }
 0x338   : > { %v926_v37 = vmul.f32 %v3553_v35, %v3551_v28 }
 0x33a   : > { %3190 = vmatmul.mubr.msk.f32.vlgmr.msra.gmra.mrb[4].mxu1 %vm915_vm2, %v926_v37 }
 0x33b   : > { %3193 = vmatpush3.xpose.msk.msra.mxu1 %vm837_vm1, %v1003_v36  ;;  %3194 = vmatprep.mubr.msk.f32.mxu1 %vm3628_vm0, %v3629_v1 }
 0x33c   : > { %3197 = vmatprep.subr.mxu1 %v3629_v1 }
 0x33e   : > { %3195 = vmatmul.mubr.msk.f32.vlgmr.msra.gmra.mrb[6].mxu1 %vm837_vm1, %v1001_v38 }
 0x33f   : > { %3199 = vmatprep.mubr.msk.f32.mxu1 %vm3628_vm0, %v3629_v1 }
 0x40d   : > { %v4005_v39 = vpop.f32.mrb[4].mxu1 }
 0x40e   : > { %v3191_v40 = vpop.f32.mrb[5].mxu1 }
 0x411   : > { %v1074_v41 = vpop.f32.mrb[6].mxu1 }
 0x412   : > { %v1078_v42 = vmul.f32 0.25, %v1074_v41  ;;  %v3196_v43 = vpop.f32.mrb[7].mxu1 }
 0x414   : > { %v1079_v44 = vsel %vm915_vm2, %v1078_v42, -inf }
 0x415   : > { %1080 = vmax.xlane.f32.xlu0 %v1079_v44 }
 0x42b   : > { %1091 = vrot.lane.b32.xlu0 %v3993_v32, %s3630_s28 }
 0x42f   : > { %1169 = vrot.lane.b32.xlu0 %v3914_v54, %s3631_s21 }
 0x433   : > { %1167 = vrot.lane.b32.xlu0 %v3916_v57, %s3631_s21 }
 0x4a2   : > { %v1081_v45 = vpop.xlane.xlu0 %1080 }
 0x4a3   : > { %v1082_v46 = vsub.f32 %v1078_v42, %v1081_v45 }
 0x4a5   : > { %v1083_v47 = vmul.f32 1.442695, %v1082_v46 }
 0x4a6   : > { %v1092_v48 = vpop.permute.xlu0 %1091 }
 0x4a7   : > { %3554 = vpow2.f32 %v1083_v47  ;;  %3198 = vmatpush3.msra.mxu1 %v1092_v48 }
 0x4a8   : > { %3202 = vmatprep.subr.mxu1 %v3629_v1 }
 0x4aa   : > { %v1170_v55 = vpop.permute.xlu0 %1169 }
 0x4ae   : > { %v1168_v58 = vpop.permute.xlu0 %1167 }
 0x4b1   : > { %v3555_v49 = vpop.eup %3554 }
 0x4b2   : > { %v1085_v51 = vsel %vm915_vm2, %v3555_v49, 0.0 }
 0x4b3   : > { %1086 = vadd.xlane.f32.xlu1 %v1085_v51 }
 0x4c4   : > { %1257 = vrot.lane.b32.xlu1 %v3993_v32, %s3631_s21 }
 0x4c8   : > { %1335 = vrot.lane.b32.xlu1 %v3914_v54, %s3632_s22 }
 0x540   : > { %v1087_v52 = vpop.xlane.xlu1 %1086 }
 0x541   : > { %3556 = vrcp.f32 %v1087_v52 }
 0x544   : > { %v1258_v59 = vpop.permute.xlu1 %1257 }
 0x548   : > { %v1336_v9 = vpop.permute.xlu1 %1335 }
 0x54b   : > { %v3557_v53 = vpop.eup %3556 }
 0x54c   : > { %v1089_v56 = vmul.f32 %v3557_v53, %v3555_v49 }
 0x54e   : > { %3200 = vmatmul.mubr.msk.f32.vlgmr.msra.gmra.mrb[8].mxu1 %vm915_vm2, %v1089_v56 }
 0x54f   : > { %3203 = vmatpush3.xpose.msk.msra.mxu1 %vm837_vm1, %v1170_v55  ;;  %3204 = vmatprep.mubr.msk.f32.mxu1 %vm3628_vm0, %v3629_v1 }
 0x550   : > { %3207 = vmatprep.subr.mxu1 %v3629_v1 }
 0x552   : > { %3205 = vmatmul.mubr.msk.f32.vlgmr.msra.gmra.mrb[10].mxu1 %vm837_vm1, %v1168_v58 }
 0x553   : > { %3208 = vmatpush3.msra.mxu1 %v1258_v59  ;;  %3209 = vmatprep.mubr.msk.f32.mxu1 %vm3628_vm0, %v3629_v1 }
 0x554   : > { %3212 = vmatprep.subr.mxu1 %v3629_v1 }
 0x621   : > { %v4029_v60 = vpop.f32.mrb[8].mxu1 }
 0x622   : > { %v3201_v61 = vpop.f32.mrb[9].mxu1 }
 0x625   : > { %v1241_v62 = vpop.f32.mrb[10].mxu1 }
 0x626   : > { %v1245_v63 = vmul.f32 0.25, %v1241_v62  ;;  %v3206_v2 = vpop.f32.mrb[11].mxu1 }
 0x628   : > { %v1246_v3 = vsel %vm915_vm2, %v1245_v63, -inf }
 0x629   : > { %1247 = vmax.xlane.f32.xlu0 %v1246_v3 }
 0x6b6   : > { %v1248_v4 = vpop.xlane.xlu0 %1247 }
 0x6b7   : > { %v1249_v5 = vsub.f32 %v1245_v63, %v1248_v4 }
 0x6b9   : > { %v1250_v6 = vmul.f32 1.442695, %v1249_v5 }
 0x6bb   : > { %3558 = vpow2.f32 %v1250_v6 }
 0x6c5   : > { %v3559_v7 = vpop.eup %3558 }
 0x6c6   : > { %v1252_v8 = vsel %vm915_vm2, %v3559_v7, 0.0 }
 0x6c7   : > { %1253 = vadd.xlane.f32.xlu1 %v1252_v8 }
 0x6d8   : > { %1333 = vrot.lane.b32.xlu1 %v3916_v57, %s3632_s22 }
 0x754   : > { %v1254_v10 = vpop.xlane.xlu1 %1253 }
 0x755   : > { %3560 = vrcp.f32 %v1254_v10 }
 0x758   : > { %v1334_v13 = vpop.permute.xlu1 %1333 }
 0x75f   : > { %v3561_v11 = vpop.eup %3560 }
 0x760   : > { %v1256_v12 = vmul.f32 %v3561_v11, %v3559_v7 }
 0x762   : > { %3210 = vmatmul.mubr.msk.f32.vlgmr.msra.gmra.mrb[12].mxu1 %vm915_vm2, %v1256_v12 }
 0x763   : > { %3213 = vmatpush3.xpose.msk.msra.mxu1 %vm837_vm1, %v1336_v9  ;;  %3214 = vmatprep.mubr.msk.f32.mxu1 %vm3628_vm0, %v3629_v1 }
 0x764   : > { %3217 = vmatprep.subr.mxu1 %v3629_v1 }
 0x766   : > { %3215 = vmatmul.mubr.msk.f32.vlgmr.msra.gmra.mrb[14].mxu1 %vm837_vm1, %v1334_v13 }
 0x767   : > { %3219 = vmatprep.mubr.msk.f32.mxu1 %vm3628_vm0, %v3629_v1 }
 0x835   : > { %v4043_v14 = vpop.f32.mrb[12].mxu1 }
 0x836   : > { %v3211_v15 = vpop.f32.mrb[13].mxu1 }
 0x839   : > { %v1407_v16 = vpop.f32.mrb[14].mxu1 }
 0x83a   : > { %v1411_v17 = vmul.f32 0.25, %v1407_v16  ;;  %v3216_v18 = vpop.f32.mrb[15].mxu1 }
 0x83c   : > { %v1412_v19 = vsel %vm915_vm2, %v1411_v17, -inf }
 0x83d   : > { %1413 = vmax.xlane.f32.xlu0 %v1412_v19 }
 0x853   : > { %1423 = vrot.lane.b32.xlu0 %v3993_v32, %s3632_s22 }
 0x857   : > { %1501 = vrot.lane.b32.xlu0 %v3914_v54, %s3633_s23 }
 0x85b   : > { %1499 = vrot.lane.b32.xlu0 %v3916_v57, %s3633_s23 }
 0x8ca   : > { %v1414_v20 = vpop.xlane.xlu0 %1413 }
 0x8cb   : > { %v1415_v21 = vsub.f32 %v1411_v17, %v1414_v20 }
 0x8cd   : > { %v1416_v22 = vmul.f32 1.442695, %v1415_v21 }
 0x8ce   : > { %v1424_v23 = vpop.permute.xlu0 %1423 }
 0x8cf   : > { %3562 = vpow2.f32 %v1416_v22  ;;  %3218 = vmatpush3.msra.mxu1 %v1424_v23 }
 0x8d0   : > { %3222 = vmatprep.subr.mxu1 %v3629_v1 }
 0x8d2   : > { %v1502_v28 = vpop.permute.xlu0 %1501 }
 0x8d6   : > { %v1500_v30 = vpop.permute.xlu0 %1499 }
 0x8d9   : > { %v3563_v24 = vpop.eup %3562 }
 0x8da   : > { %v1418_v25 = vsel %vm915_vm2, %v3563_v24, 0.0 }
 0x8db   : > { %1419 = vadd.xlane.f32.xlu1 %v1418_v25 }
 0x8ec   : > { %1589 = vrot.lane.b32.xlu1 %v3993_v32, %s3633_s23 }
 0x8f0   : > { %1667 = vrot.lane.b32.xlu1 %v3914_v54, %s3634_s27 }
 0x968   : > { %v1420_v26 = vpop.xlane.xlu1 %1419 }
 0x969   : > { %3564 = vrcp.f32 %v1420_v26 }
 0x96c   : > { %v1590_v31 = vpop.permute.xlu1 %1589 }
 0x970   : > { %v1668_v45 = vpop.permute.xlu1 %1667 }
 0x973   : > { %v3565_v27 = vpop.eup %3564 }
 0x974   : > { %v1422_v29 = vmul.f32 %v3565_v27, %v3563_v24 }
 0x976   : > { %3220 = vmatmul.mubr.msk.f32.vlgmr.msra.gmra.mrb[16].mxu1 %vm915_vm2, %v1422_v29 }
 0x977   : > { %3223 = vmatpush3.xpose.msk.msra.mxu1 %vm837_vm1, %v1502_v28  ;;  %3224 = vmatprep.mubr.msk.f32.mxu1 %vm3628_vm0, %v3629_v1 }
 0x978   : > { %3227 = vmatprep.subr.mxu1 %v3629_v1 }
 0x97a   : > { %3225 = vmatmul.mubr.msk.f32.vlgmr.msra.gmra.mrb[18].mxu1 %vm837_vm1, %v1500_v30 }
 0x97b   : > { %3228 = vmatpush3.msra.mxu1 %v1590_v31  ;;  %3229 = vmatprep.mubr.msk.f32.mxu1 %vm3628_vm0, %v3629_v1 }
 0x97c   : > { %3232 = vmatprep.subr.mxu1 %v3629_v1 }
 0xa49   : > { %v4067_v33 = vpop.f32.mrb[16].mxu1 }
 0xa4a   : > { %v3221_v34 = vpop.f32.mrb[17].mxu1 }
 0xa4d   : > { %v1573_v35 = vpop.f32.mrb[18].mxu1 }
 0xa4e   : > { %v1577_v36 = vmul.f32 0.25, %v1573_v35  ;;  %v3226_v37 = vpop.f32.mrb[19].mxu1 }
 0xa50   : > { %v1578_v38 = vsel %vm915_vm2, %v1577_v36, -inf }
 0xa51   : > { %1579 = vmax.xlane.f32.xlu0 %v1578_v38  ;;  %v2204_v38 = vld [vmem:[%s4620_s7] sm:$0xff] }
 0xade   : > { %v1580_v40 = vpop.xlane.xlu0 %1579 }
 0xadf   : > { %v1581_v41 = vsub.f32 %v1577_v36, %v1580_v40  ;;  %v2205_v40 = vld [vmem:[%s4620_s7 + $0x8] sm:$0xff] }
 0xae1   : > { %v1582_v42 = vmul.f32 1.442695, %v1581_v41  ;;  %v2206_v41 = vld [vmem:[%s4620_s7 + $0x10] sm:$0xff] }
 0xae3   : > { %3566 = vpow2.f32 %v1582_v42  ;;  %v3370_v42 = vpack.c.bf16 %v2205_v40, %v2204_v38  ;;  %v2338_v38 = vld [vmem:[%s4624_s11 + $0x60] sm:$0xff]  ;;  %v2336_v40 = vld [vmem:[%s4624_s11 + $0x50] sm:$0xff] }
 0xae5   : > { %3371 = vmatpush3.bf16.msra.mxu0 %v3370_v42  ;;  %v2340_v42 = vld [vmem:[%s4624_s11 + $0x70] sm:$0xff] }
 0xae6   : > { %3372 = vmatprep.subr.bf16.mxu0 %v3627_v0 }
 0xaed   : > { %v3567_v43 = vpop.eup %3566 }
 0xaee   : > { %v1584_v44 = vsel %vm915_vm2, %v3567_v43, 0.0 }
 0xaef   : > { %1585 = vadd.xlane.f32.xlu1 %v1584_v44 }
 0xb00   : > { %1665 = vrot.lane.b32.xlu1 %v3916_v57, %s3634_s27 }
 0xb7c   : > { %v1586_v46 = vpop.xlane.xlu1 %1585 }
 0xb7d   : > { %3568 = vrcp.f32 %v1586_v46  ;;  %v2209_v46 = vld [vmem:[%s4620_s7 + $0x28] sm:$0xff] }
 0xb80   : > { %v1666_v49 = vpop.permute.xlu1 %1665 }
 0xb87   : > { %v3569_v47 = vpop.eup %3568 }
 0xb88   : > { %v1588_v48 = vmul.f32 %v3569_v47, %v3567_v43  ;;  %v2207_v43 = vld [vmem:[%s4620_s7 + $0x18] sm:$0xff] }
 0xb89   : > { %v3373_v44 = vpack.c.bf16 %v2207_v43, %v2206_v41  ;;  %v2343_v43 = vld [vmem:[%s4624_s11 + $0x88] sm:$0xff] }
 0xb8a   : > { %3230 = vmatmul.mubr.msk.f32.vlgmr.msra.gmra.mrb[20].mxu1 %vm915_vm2, %v1588_v48  ;;  %v2210_v48 = vld [vmem:[%s4620_s7 + $0x30] sm:$0xff] }
 0xb8b   : > { %3233 = vmatpush3.xpose.msk.msra.mxu1 %vm837_vm1, %v1668_v45  ;;  %3234 = vmatprep.mubr.msk.f32.mxu1 %vm3628_vm0, %v3629_v1  ;;  %v2208_v45 = vld [vmem:[%s4620_s7 + $0x20] sm:$0xff] }
 0xb8c   : > { %3237 = vmatprep.subr.mxu1 %v3629_v1  ;;  %3374 = vmatpush3.bf16.msra.mxu0 %v3373_v44  ;;  %v3376_v47 = vpack.c.bf16 %v2209_v46, %v2208_v45  ;;  %v2347_v44 = vld [vmem:[%s4624_s11 + $0xa8] sm:$0xff]  ;;  %v3431_v45 = vpack.c.bf16 %v2340_v42, %v2336_v40  ;;  %v2376_v40 = vld [vmem:[%s4624_s11 + $0x190] sm:$0xff] }
 0xb8d   : > { %3375 = vmatprep.subr.bf16.mxu0 %v3627_v0  ;;  %v3401_v46 = vpack.c.bf16 %v2347_v44, %v2343_v43  ;;  %v2383_v43 = vld [vmem:[%s4624_s11 + $0x1c8] sm:$0xff] }
 0xb8e   : > { %3235 = vmatmul.mubr.msk.f32.vlgmr.msra.gmra.mrb[22].mxu1 %vm837_vm1, %v1666_v49  ;;  %v2211_v49 = vld [vmem:[%s4620_s7 + $0x38] sm:$0xff]  ;;  %v2387_v44 = vld [vmem:[%s4624_s11 + $0x1e8] sm:$0xff] }
 0xb8f   : > { %3239 = vmatprep.mubr.msk.f32.mxu1 %vm3628_vm0, %v3629_v1 }
 0xb90   : > { %3377 = vmatpush3.bf16.msra.mxu0 %v3376_v47  ;;  %v2345_v47 = vld [vmem:[%s4624_s11 + $0x98] sm:$0xff] }
 0xb91   : > { %3378 = vmatprep.subr.bf16.mxu0 %v3627_v0 }
 0xc5d   : > { %v4081_v51 = vpop.f32.mrb[20].mxu1 }
 0xc5e   : > { %v3231_v52 = vpop.f32.mrb[21].mxu1 }
 0xc5f   : > { %v2212_v52 = vld [vmem:[%s4620_s7 + $0x40] sm:$0xff] }
 0xc61   : > { %v1739_v53 = vpop.f32.mrb[22].mxu1 }
 0xc62   : > { %v1743_v55 = vmul.f32 0.25, %v1739_v53  ;;  %v3236_v56 = vpop.f32.mrb[23].mxu1  ;;  %v2213_v53 = vld [vmem:[%s4620_s7 + $0x48] sm:$0xff] }
 0xc63   : > { %v2214_v56 = vld [vmem:[%s4620_s7 + $0x50] sm:$0xff] }
 0xc64   : > { %v1744_v58 = vsel %vm915_vm2, %v1743_v55, -inf }
 0xc65   : > { %1745 = vmax.xlane.f32.xlu0 %v1744_v58  ;;  %v2215_v58 = vld [vmem:[%s4620_s7 + $0x58] sm:$0xff] }
 0xc7b   : > { %1755 = vrot.lane.b32.xlu0 %v3993_v32, %s3634_s27 }
 0xc7f   : > { %1833 = vrot.lane.b32.xlu0 %v3914_v54, %s3635_s0 }
 0xc83   : > { %1831 = vrot.lane.b32.xlu0 %v3916_v57, %s3635_s0 }
 0xcf2   : > { %v1746_v59 = vpop.xlane.xlu0 %1745 }
 0xcf3   : > { %v1747_v61 = vsub.f32 %v1743_v55, %v1746_v59  ;;  %v3382_v55 = vpack.c.bf16 %v2213_v53, %v2212_v52  ;;  %v3385_v59 = vpack.c.bf16 %v2215_v58, %v2214_v56  ;;  %v2346_v52 = vld [vmem:[%s4624_s11 + $0xa0] sm:$0xff]  ;;  %v2344_v53 = vld [vmem:[%s4624_s11 + $0x90] sm:$0xff] }
 0xcf5   : > { %v1748_v62 = vmul.f32 1.442695, %v1747_v61  ;;  %v2216_v61 = vld [vmem:[%s4620_s7 + $0x60] sm:$0xff] }
 0xcf6   : > { %v1756_v63 = vpop.permute.xlu0 %1755 }
 0xcf7   : > { %3570 = vpow2.f32 %v1748_v62  ;;  %3238 = vmatpush3.msra.mxu1 %v1756_v63  ;;  %v2217_v62 = vld [vmem:[%s4620_s7 + $0x68] sm:$0xff] }
 0xcf8   : > { %3242 = vmatprep.subr.mxu1 %v3629_v1  ;;  %v3388_v63 = vpack.c.bf16 %v2217_v62, %v2216_v61 }
 0xcfa   : > { %v1834_v6 = vpop.permute.xlu0 %1833 }
 0xcfe   : > { %v1832_v8 = vpop.permute.xlu0 %1831 }
 0xd01   : > { %v3571_v2 = vpop.eup %3570 }
 0xd02   : > { %v1750_v3 = vsel %vm915_vm2, %v3571_v2, 0.0 }
 0xd03   : > { %1751 = vadd.xlane.f32.xlu1 %v1750_v3  ;;  %v2219_v3 = vld [vmem:[%s4620_s7 + $0x78] sm:$0xff] }
 0xd14   : > { %1921 = vrot.lane.b32.xlu1 %v3993_v32, %s3635_s0 }
 0xd18   : > { %1999 = vrot.lane.b32.xlu1 %v3914_v54, %s3636_s26 }
 0xd90   : > { %v1752_v4 = vpop.xlane.xlu1 %1751 }
 0xd91   : > { %3572 = vrcp.f32 %v1752_v4 }
 0xd94   : > { %v1922_v9 = vpop.permute.xlu1 %1921 }
 0xd98   : > { %v2000_v21 = vpop.permute.xlu1 %1999 }
 0xd9b   : > { %v3573_v5 = vpop.eup %3572 }
 0xd9c   : > { %v1754_v7 = vmul.f32 %v3573_v5, %v3571_v2  ;;  %v2218_v2 = vld [vmem:[%s4620_s7 + $0x70] sm:$0xff] }
 0xd9d   : > { %v3391_v4 = vpack.c.bf16 %v2219_v3, %v2218_v2  ;;  %v2351_v2 = vld [vmem:[%s4624_s11 + $0xc8] sm:$0xff] }
 0xd9e   : > { %3240 = vmatmul.mubr.msk.f32.vlgmr.msra.gmra.mrb[24].mxu1 %vm915_vm2, %v1754_v7  ;;  %v2355_v3 = vld [vmem:[%s4624_s11 + $0xe8] sm:$0xff] }
 0xd9f   : > { %3243 = vmatpush3.xpose.msk.msra.mxu1 %vm837_vm1, %v1834_v6  ;;  %3244 = vmatprep.mubr.msk.f32.mxu1 %vm3628_vm0, %v3629_v1 }
 0xda0   : > { %3247 = vmatprep.subr.mxu1 %v3629_v1 }
 0xda2   : > { %3245 = vmatmul.mubr.msk.f32.vlgmr.msra.gmra.mrb[26].mxu1 %vm837_vm1, %v1832_v8 }
 0xda3   : > { %3248 = vmatpush3.msra.mxu1 %v1922_v9  ;;  %3249 = vmatprep.mubr.msk.f32.mxu1 %vm3628_vm0, %v3629_v1 }
 0xda4   : > { %3252 = vmatprep.subr.mxu1 %v3629_v1 }
 0xe71   : > { %v1827_v54 = vpop.f32.mrb[24].mxu1 }
 0xe72   : > { %v3241_v10 = vpop.f32.mrb[25].mxu1 }
 0xe75   : > { %v1905_v11 = vpop.f32.mrb[26].mxu1 }
 0xe76   : > { %v1909_v12 = vmul.f32 0.25, %v1905_v11  ;;  %v3246_v13 = vpop.f32.mrb[27].mxu1 }
 0xe78   : > { %v1910_v15 = vsel %vm915_vm2, %v1909_v12, -inf }
 0xe79   : > { %1911 = vmax.xlane.f32.xlu0 %v1910_v15 }
 0xf06   : > { %v1912_v16 = vpop.xlane.xlu0 %1911 }
 0xf07   : > { %v1913_v17 = vsub.f32 %v1909_v12, %v1912_v16 }
 0xf09   : > { %v1914_v18 = vmul.f32 1.442695, %v1913_v17 }
 0xf0b   : > { %3574 = vpow2.f32 %v1914_v18 }
 0xf15   : > { %v3575_v19 = vpop.eup %3574 }
 0xf16   : > { %v1916_v20 = vsel %vm915_vm2, %v3575_v19, 0.0 }
 0xf17   : > { %1917 = vadd.xlane.f32.xlu1 %v1916_v20 }
 0xf28   : > { %1997 = vrot.lane.b32.xlu1 %v3916_v57, %s3636_s26 }
 0xfa4   : > { %v1918_v22 = vpop.xlane.xlu1 %1917 }
 0xfa5   : > { %3576 = vrcp.f32 %v1918_v22 }
 0xfa8   : > { %v1998_v25 = vpop.permute.xlu1 %1997 }
 0xfaf   : > { %v3577_v23 = vpop.eup %3576 }
 0xfb0   : > { %v1920_v24 = vmul.f32 %v3577_v23, %v3575_v19 }
 0xfb2   : > { %3250 = vmatmul.mubr.msk.f32.vlgmr.msra.gmra.mrb[28].mxu1 %vm915_vm2, %v1920_v24  ;;  %v2327_v24 = vld [vmem:[%s4624_s11 + $0x8] sm:$0xff] }
 0xfb3   : > { %3253 = vmatpush3.xpose.msk.msra.mxu1 %vm837_vm1, %v2000_v21  ;;  %3254 = vmatprep.mubr.msk.f32.mxu1 %vm3628_vm0, %v3629_v1 }
 0xfb4   : > { %3257 = vmatprep.subr.mxu1 %v3629_v1 }
 0xfb6   : > { %3255 = vmatmul.mubr.msk.f32.vlgmr.msra.gmra.mrb[30].mxu1 %vm837_vm1, %v1998_v25  ;;  %v2331_v25 = vld [vmem:[%s4624_s11 + $0x28] sm:$0xff] }
 0xfb7   : > { %3259 = vmatprep.mubr.msk.f32.mxu1 %vm3628_vm0, %v3629_v1 }
0x1085   : > { %v1993_v57 = vpop.f32.mrb[28].mxu1 }
0x1086   : > { %v3251_v26 = vpop.f32.mrb[29].mxu1 }
0x1087   : > { %v2333_v26 = vld [vmem:[%s4624_s11 + $0x38] sm:$0xff] }
0x1089   : > { %v2071_v27 = vpop.f32.mrb[30].mxu1 }
0x108a   : > { %v2075_v28 = vmul.f32 0.25, %v2071_v27  ;;  %v3256_v29 = vpop.f32.mrb[31].mxu1  ;;  %v2330_v27 = vld [vmem:[%s4624_s11 + $0x20] sm:$0xff] }
0x108c   : > { %v2076_v30 = vsel %vm915_vm2, %v2075_v28, -inf }
0x108d   : > { %2077 = vmax.xlane.f32.xlu0 %v2076_v30  ;;  %v2328_v30 = vld [vmem:[%s4624_s11 + $0x10] sm:$0xff] }
0x10a3   : > { %2087 = vrot.lane.b32.xlu0 %v3993_v32, %s3636_s26 }
0x10a7   : > { %2164 = vrot.lane.b32.xlu0 %v4029_v60, %s3636_s26 }
0x10ab   : > { %2168 = vrot.lane.b32.xlu0 %v4043_v14, %s3635_s0 }
0x10af   : > { %2172 = vrot.lane.b32.xlu0 %v4067_v33, %s3634_s27 }
0x10b3   : > { %2180 = vrot.lane.b32.xlu0 %v1827_v54, %s3632_s22 }
0x10b7   : > { %2184 = vrot.lane.b32.xlu0 %v1993_v57, %s3631_s21  ;;  %v3393_v57 = vpack.c.bf16 %v2331_v25, %v2327_v24  ;;  %v2371_v25 = vld [vmem:[%s4624_s11 + $0x168] sm:$0xff] }
0x111a   : > { %v2078_v31 = vpop.xlane.xlu0 %2077 }
0x111b   : > { %v2079_v34 = vsub.f32 %v2075_v28, %v2078_v31  ;;  %v2332_v31 = vld [vmem:[%s4624_s11 + $0x30] sm:$0xff] }
0x111d   : > { %v2080_v35 = vmul.f32 1.442695, %v2079_v34  ;;  %v2335_v34 = vld [vmem:[%s4624_s11 + $0x48] sm:$0xff] }
0x111e   : > { %v2088_v36 = vpop.permute.xlu0 %2087 }
0x111f   : > { %3578 = vpow2.f32 %v2080_v35  ;;  %3258 = vmatpush3.msra.mxu1 %v2088_v36  ;;  %v3427_v35 = vpack.c.bf16 %v2332_v31, %v2328_v30  ;;  %v2339_v36 = vld [vmem:[%s4624_s11 + $0x68] sm:$0xff]  ;;  %v2372_v31 = vld [vmem:[%s4624_s11 + $0x170] sm:$0xff] }
0x1120   : > { %3394 = vmatprep.subr.bf16.mxu1 %v3393_v57  ;;  %v2373_v57 = vld [vmem:[%s4624_s11 + $0x178] sm:$0xff] }
0x1122   : > { %v2165_v7 = vpop.permute.xlu0 %2164 }
0x1123   : > { %v2191_v10 = vsel %vm837_vm1, %v4005_v39, %v2165_v7  ;;  %v2899_v39 = vld [vmem:[%s4621_s8] ss:$0 sm:$0xff] }
0x1124   : > { %v2350_v7 = vld [vmem:[%s4624_s11 + $0xc0] sm:$0xff] }
0x1126   : > { %v2169_v8 = vpop.permute.xlu0 %2168 }
0x1127   : > { %v2193_v12 = vsel %vm2192_vm3, %v2191_v10, %v2169_v8  ;;  %v2354_v8 = vld [vmem:[%s4624_s11 + $0xe0] sm:$0xff]  ;;  %v2352_v10 = vld [vmem:[%s4624_s11 + $0xd0] sm:$0xff] }
0x1129   : > { %v3579_v32 = vpop.eup %3578 }
0x112a   : > { %v2082_v37 = vsel %vm915_vm2, %v3579_v32, 0.0  ;;  %v2173_v9 = vpop.permute.xlu0 %2172 }
0x112b   : > { %2083 = vadd.xlane.f32.xlu1 %v2082_v37  ;;  %v2195_v13 = vsel %vm2194_vm4, %v2193_v12, %v2173_v9  ;;  %v2341_v37 = vld [vmem:[%s4624_s11 + $0x78] sm:$0xff] }
0x112e   : > { %v2181_v54 = vpop.permute.xlu0 %2180 }
0x1132   : > { %v2185_v15 = vpop.permute.xlu0 %2184 }
0x113c   : > { %2176 = vrot.lane.b32.xlu1 %v4081_v51, %s3633_s23  ;;  %v3379_v51 = vpack.c.bf16 %v2211_v49, %v2210_v48  ;;  %v2349_v48 = vld [vmem:[%s4624_s11 + $0xb8] sm:$0xff]  ;;  %v2342_v49 = vld [vmem:[%s4624_s11 + $0x80] sm:$0xff]  ;;  %s4644_s23 = sshll.u32 %s4646_s25, 3 }
0x113d   : > { %v3403_v56 = vpack.c.bf16 %v2346_v52, %v2342_v49  ;;  %v2382_v49 = vld [vmem:[%s4624_s11 + $0x1c0] sm:$0xff]  ;;  %s556_s26 = scalar_lea.vmem %s4630_s17, %s4644_s23 }
0x113e   : > { %3380 = vmatpush3.bf16.msra.mxu0 %v3379_v51  ;;  %v3433_v51 = vpack.c.bf16 %v2349_v48, %v2345_v47  ;;  %v3421_v47 = vpack.c.bf16 %v2387_v44, %v2383_v43  ;;  %v2389_v48 = vld [vmem:[%s4624_s11 + $0x1f8] sm:$0xff] }
0x113f   : > { %3381 = vmatprep.subr.bf16.mxu0 %v3627_v0 }
0x1142   : > { %3383 = vmatpush3.bf16.msra.mxu0 %v3382_v55  ;;  %v2348_v55 = vld [vmem:[%s4624_s11 + $0xb0] sm:$0xff] }
0x1143   : > { %3384 = vmatprep.subr.bf16.mxu0 %v3627_v0  ;;  %v3435_v58 = vpack.c.bf16 %v2348_v55, %v2344_v53  ;;  %v2384_v53 = vld [vmem:[%s4624_s11 + $0x1d0] sm:$0xff] }
0x1144   : > { %v2388_v55 = vld [vmem:[%s4624_s11 + $0x1f0] sm:$0xff] }
0x1146   : > { %3386 = vmatpush3.bf16.msra.mxu0 %v3385_v59 }
0x1147   : > { %3387 = vmatprep.subr.bf16.mxu0 %v3627_v0 }
0x114a   : > { %3389 = vmatpush3.bf16.msra.mxu0 %v3388_v63 }
0x114b   : > { %3390 = vmatprep.subr.bf16.mxu0 %v3627_v0 }
0x114e   : > { %3392 = vmatpush3.bf16.msra.mxu0 %v3391_v4  ;;  %v2353_v4 = vld [vmem:[%s4624_s11 + $0xd8] sm:$0xff] }
0x11b8   : > { %v2084_v60 = vpop.xlane.xlu1 %2083 }
0x11b9   : > { %3580 = vrcp.f32 %v2084_v60  ;;  %v3397_v60 = vpack.c.bf16 %v2339_v36, %v2335_v34  ;;  %v2375_v34 = vld [vmem:[%s4624_s11 + $0x188] sm:$0xff] }
0x11bc   : > { %v2177_v11 = vpop.permute.xlu1 %2176 }
0x11bd   : > { %v2197_v0 = vsel %vm2196_vm5, %v2195_v13, %v2177_v11  ;;  %v2356_v11 = vld [vmem:[%s4624_s11 + $0xf0] sm:$0xff]  ;;  %v2359_v13 = vld [vmem:[%s4624_s11 + $0x108] sm:$0xff] }
0x11be   : > { %v2199_v16 = vsel %vm2198_vm6, %v2197_v0, %v2181_v54  ;;  %v3407_v54 = vpack.c.bf16 %v2354_v8, %v2350_v7  ;;  %v3439_v12 = vpack.c.bf16 %v2356_v11, %v2352_v10  ;;  %v2363_v0 = vld [vmem:[%s4624_s11 + $0x128] sm:$0xff]  ;;  %v2900_v8 = vld [vmem:[%s4622_s9] ss:$0 sm:$0xff] }
0x11bf   : > { %v2201_v17 = vsel %vm2200_vm7, %v2199_v16, %v2185_v15  ;;  %v2361_v15 = vld [vmem:[%s4624_s11 + $0x118] sm:$0xff]  ;;  %v3409_v16 = vpack.c.bf16 %v2363_v0, %v2359_v13  ;;  %v2558_v10 = vld [vmem:[%s4626_s13] sm:$0xff]  ;;  %v2559_v11 = vld [vmem:[%s4626_s13 + $0x8] sm:$0xff] }
0x11c0   : > { %v2590_v13 = vld [vmem:[%s4626_s13 + $0x100] sm:$0xff]  ;;  %v2591_v0 = vld [vmem:[%s4626_s13 + $0x108] sm:$0xff] }
0x11c3   : > { %v3581_v14 = vpop.eup %3580 }
0x11c4   : > { %v2086_v33 = vmul.f32 %v3581_v14, %v3579_v32  ;;  %v2337_v32 = vld [vmem:[%s4624_s11 + $0x58] sm:$0xff] }
0x11c5   : > { %v3429_v14 = vpack.c.bf16 %v2341_v37, %v2337_v32  ;;  %v2377_v37 = vld [vmem:[%s4624_s11 + $0x198] sm:$0xff] }
0x11c6   : > { %3260 = vmatmul.mubr.msk.f32.vlgmr.msra.gmra.mrb[32].mxu1 %vm915_vm2, %v2086_v33  ;;  %v2334_v33 = vld [vmem:[%s4624_s11 + $0x40] sm:$0xff] }
0x11c7   : > { %2476 = vmatprep.mubr.f32.mxu1 %v3629_v1  ;;  %v3399_v41 = vpack.c.bf16 %v2338_v38, %v2334_v33  ;;  %v2378_v38 = vld [vmem:[%s4624_s11 + $0x1a0] sm:$0xff] }
0x1299   : > { %v2159_v5 = vpop.f32.mrb[32].mxu1 }
0x129a   : > { %2188 = vrot.lane.b32.xlu0 %v2159_v5, %s3630_s28  ;;  %v3261_v6 = vpop.f32.mrb[33].mxu1  ;;  %v3405_v5 = vpack.c.bf16 %v2355_v3, %v2351_v2  ;;  %v2607_v3 = vld [vmem:[%s4626_s13 + $0x188] sm:$0xff] }
0x129b   : > { %v2357_v6 = vld [vmem:[%s4624_s11 + $0xf8] sm:$0xff] }
0x129c   : > { %v3437_v9 = vpack.c.bf16 %v2357_v6, %v2353_v4 }
0x130c   : > { %v2189_v18 = vpop.permute.xlu0 %2188 }
0x130d   : > { %v2203_v19 = vsel %vm2202_vm8, %v2201_v17, %v2189_v18  ;;  %v2365_v17 = vld [vmem:[%s4624_s11 + $0x138] sm:$0xff]  ;;  %v2358_v18 = vld [vmem:[%s4624_s11 + $0x100] sm:$0xff] }
0x130e   : > { %3295 = vmatmul.mubr.f32.vlgmr.msra.gmra.mrb[4].mxu0 %v2203_v19  ;;  %v2362_v19 = vld [vmem:[%s4624_s11 + $0x120] sm:$0xff] }
0x130f   : > { %2547 = vmatprep.mubr.f32.mxu0 %v3629_v1  ;;  %v2329_v1 = vld [vmem:[%s4624_s11 + $0x18] sm:$0xff] }
0x1310   : > { %v3425_v28 = vpack.c.bf16 %v2333_v26, %v2329_v1  ;;  %v2369_v1 = vld [vmem:[%s4624_s11 + $0x158] sm:$0xff] }
0x1312   : > { %3426 = vmatprep.subr.bf16.mxu0 %v3425_v28  ;;  %v2370_v28 = vld [vmem:[%s4624_s11 + $0x160] sm:$0xff] }
0x1313   : > { %3428 = vmatpush1.bf16.msra.mxu0 %v3427_v35  ;;  %v2379_v35 = vld [vmem:[%s4624_s11 + $0x1a8] sm:$0xff] }
0x1314   : > { %3430 = vmatprep.subr.bf16.mxu0 %v3429_v14  ;;  %v3417_v32 = vpack.c.bf16 %v2379_v35, %v2375_v34  ;;  %v2374_v14 = vld [vmem:[%s4624_s11 + $0x180] sm:$0xff] }
0x1315   : > { %v3419_v42 = vpack.c.bf16 %v2378_v38, %v2374_v14  ;;  %v2612_v14 = vld [vmem:[%s4626_s13 + $0x1b0] sm:$0xff] }
0x1317   : > { %3432 = vmatpush1.bf16.msra.mxu0 %v3431_v45  ;;  %v2385_v45 = vld [vmem:[%s4624_s11 + $0x1d8] sm:$0xff] }
0x1318   : > { %3434 = vmatprep.subr.bf16.mxu0 %v3433_v51  ;;  %v2386_v51 = vld [vmem:[%s4624_s11 + $0x1e0] sm:$0xff]  ;;  %v3453_v52 = vpack.c.bf16 %v2389_v48, %v2385_v45  ;;  %v2596_v45 = vld [vmem:[%s4626_s13 + $0x130] sm:$0xff]  ;;  %v2583_v48 = vld [vmem:[%s4626_s13 + $0xc8] sm:$0xff] }
0x131b   : > { %3436 = vmatpush1.bf16.msra.mxu0 %v3435_v58  ;;  %v3455_v58 = vpack.c.bf16 %v2388_v55, %v2384_v53  ;;  %v2566_v55 = vld [vmem:[%s4626_s13 + $0x40] sm:$0xff] }
0x131c   : > { %3438 = vmatprep.subr.bf16.mxu0 %v3437_v9 }
0x131f   : > { %3440 = vmatpush1.bf16.msra.mxu0 %v3439_v12 }
0x13e1   : > { %v2293_v20 = vpop.f32.mrb[4].mxu0 }
0x13e2   : > { %v2294_v21 = vadd.f32 %v2899_v39, %v2293_v20  ;;  %v3296_v22 = vpop.f32.mrb[5].mxu0  ;;  %v3441_v39 = vpack.c.bf16 %v2365_v17, %v2361_v15  ;;  %v3411_v20 = vpack.c.bf16 %v2362_v19, %v2358_v18  ;;  %v2576_v15 = vld [vmem:[%s4626_s13 + $0x90] sm:$0xff]  ;;  %v2609_v17 = vld [vmem:[%s4626_s13 + $0x198] sm:$0xff]  ;;  %v3459_v19 = vpack.c.bf16 %v2559_v11, %v2558_v10 }
0x13e3   : > { %v2364_v22 = vld [vmem:[%s4624_s11 + $0x130] sm:$0xff] }
0x13e4   : > { %v2297_v23 = vadd.f32 %v2294_v21, %v3898_v50  ;;  %v2326_v50 = vld [vmem:[%s4624_s11] sm:$0xff]  ;;  %v2360_v21 = vld [vmem:[%s4624_s11 + $0x110] sm:$0xff]  ;;  %3442 = vmatprep.subr.bf16.mxu0 %v3441_v39  ;;  %v3491_v39 = vpack.c.bf16 %v2591_v0, %v2590_v13  ;;  %v2587_v0 = vld [vmem:[%s4626_s13 + $0xe8] sm:$0xff] }
0x13e5   : > { %v3395_v29 = vpack.c.bf16 %v2330_v27, %v2326_v50  ;;  %v3443_v24 = vpack.c.bf16 %v2364_v22, %v2360_v21  ;;  %v3445_v50 = vpack.c.bf16 %v2373_v57, %v2369_v1  ;;  %v2366_v27 = vld [vmem:[%s4624_s11 + $0x140] sm:$0xff]  ;;  %v2561_v21 = vld [vmem:[%s4626_s13 + $0x18] sm:$0xff]  ;;  %v2600_v11 = vld [vmem:[%s4626_s13 + $0x150] sm:$0xff] }
0x13e6   : > { %2300 = vadd.xlane.f32.xlu0 %v2297_v23  ;;  %v3415_v30 = vpack.c.bf16 %v2370_v28, %v2366_v27  ;;  %v2593_v1 = vld [vmem:[%s4626_s13 + $0x118] sm:$0xff]  ;;  %v2578_v57 = vld [vmem:[%s4626_s13 + $0xa0] sm:$0xff]  ;;  %v2611_v27 = vld [vmem:[%s4626_s13 + $0x1a8] sm:$0xff] }
0x13e7   : > { %3396 = vmatpush1.bf16.msra.mxu1 %v3395_v29  ;;  %v2368_v29 = vld [vmem:[%s4624_s11 + $0x150] sm:$0xff]  ;;  %3444 = vmatpush1.bf16.msra.mxu0 %v3443_v24  ;;  %v2586_v13 = vld [vmem:[%s4626_s13 + $0xe0] sm:$0xff] }
0x13e8   : > { %3398 = vmatprep.subr.bf16.mxu1 %v3397_v60  ;;  %3446 = vmatprep.subr.bf16.mxu0 %v3445_v50  ;;  %v3447_v36 = vpack.c.bf16 %v2372_v31, %v2368_v29  ;;  %v2381_v60 = vld [vmem:[%s4624_s11 + $0x1b8] sm:$0xff]  ;;  %v2610_v50 = vld [vmem:[%s4626_s13 + $0x1a0] sm:$0xff]  ;;  %v2563_v31 = vld [vmem:[%s4626_s13 + $0x28] sm:$0xff] }
0x13e9   : > { %v3449_v33 = vpack.c.bf16 %v2381_v60, %v2377_v37  ;;  %v3497_v35 = vpack.c.bf16 %v2611_v27, %v2610_v50  ;;  %v2580_v37 = vld [vmem:[%s4626_s13 + $0xb0] sm:$0xff]  ;;  %v2581_v60 = vld [vmem:[%s4626_s13 + $0xb8] sm:$0xff] }
0x13ea   : > { %v3469_v43 = vpack.c.bf16 %v2581_v60, %v2580_v37  ;;  %v2621_v27 = vld [vmem:[%s4626_s13 + $0x1f8] sm:$0xff] }
0x13eb   : > { %3400 = vmatpush1.bf16.msra.mxu1 %v3399_v41  ;;  %v2380_v41 = vld [vmem:[%s4624_s11 + $0x1b0] sm:$0xff]  ;;  %3448 = vmatpush1.bf16.msra.mxu0 %v3447_v36  ;;  %v2594_v36 = vld [vmem:[%s4626_s13 + $0x120] sm:$0xff] }
0x13ec   : > { %3402 = vmatprep.subr.bf16.mxu1 %v3401_v46  ;;  %v3451_v46 = vpack.c.bf16 %v2380_v41, %v2376_v40  ;;  %3450 = vmatprep.subr.bf16.mxu0 %v3449_v33  ;;  %v2613_v33 = vld [vmem:[%s4626_s13 + $0x1b8] sm:$0xff]  ;;  %v2564_v41 = vld [vmem:[%s4626_s13 + $0x30] sm:$0xff] }
0x13ed   : > { %v3501_v44 = vpack.c.bf16 %v2613_v33, %v2612_v14  ;;  %v2390_v33 = vld [vmem:[%s4625_s12] sm:$0xf] }
0x13ef   : > { %3404 = vmatpush1.bf16.msra.mxu1 %v3403_v56  ;;  %v3423_v56 = vpack.c.bf16 %v2386_v51, %v2382_v49  ;;  %3452 = vmatpush1.bf16.msra.mxu0 %v3451_v46  ;;  %v2597_v46 = vld [vmem:[%s4626_s13 + $0x138] sm:$0xff]  ;;  %v2614_v49 = vld [vmem:[%s4626_s13 + $0x1c0] sm:$0xff]  ;;  %v2615_v51 = vld [vmem:[%s4626_s13 + $0x1c8] sm:$0xff] }
0x13f0   : > { %3406 = vmatprep.subr.bf16.mxu1 %v3405_v5  ;;  %3454 = vmatprep.subr.bf16.mxu0 %v3453_v52  ;;  %v3503_v53 = vpack.c.bf16 %v2597_v46, %v2596_v45 }
0x13f3   : > { %3408 = vmatpush1.bf16.msra.mxu1 %v3407_v54  ;;  %3456 = vmatpush1.bf16.msra.mxu0 %v3455_v58  ;;  %v2901_v54 = vld [vmem:[%s4623_s10] ss:$0 sm:$0xff] }
0x13f4   : > { %3410 = vmatprep.subr.bf16.mxu1 %v3409_v16  ;;  %v2577_v16 = vld [vmem:[%s4626_s13 + $0x98] sm:$0xff] }
0x13f7   : > { %3412 = vmatpush1.bf16.msra.mxu1 %v3411_v20  ;;  %v2560_v20 = vld [vmem:[%s4626_s13 + $0x10] sm:$0xff] }
0x13f8   : > { %v3463_v28 = vpack.c.bf16 %v2561_v21, %v2560_v20  ;;  %v2571_v20 = vld [vmem:[%s4626_s13 + $0x68] sm:$0xff]  ;;  %v2602_v21 = vld [vmem:[%s4626_s13 + $0x160] sm:$0xff] }
0x1473   : > { %v2301_v59 = vpop.xlane.xlu0 %2300 }
0x1474   : > { %v2303_v61 = vmul.f32 0.0078125, %v2301_v59  ;;  %v2574_v59 = vld [vmem:[%s4626_s13 + $0x80] sm:$0xff] }
0x1476   : > { %v4268_v62 = vsub.f32 %v2297_v23, %v2303_v61  ;;  %v2367_v23 = vld [vmem:[%s4624_s11 + $0x148] sm:$0xff] }
0x1477   : > { %v3413_v26 = vpack.c.bf16 %v2371_v25, %v2367_v23  ;;  %v2575_v61 = vld [vmem:[%s4626_s13 + $0x88] sm:$0xff]  ;;  %v3461_v23 = vpack.c.bf16 %v2577_v16, %v2576_v15  ;;  %v2592_v25 = vld [vmem:[%s4626_s13 + $0x110] sm:$0xff]  ;;  %v2618_v15 = vld [vmem:[%s4626_s13 + $0x1e0] sm:$0xff] }
0x1478   : > { %v2305_v63 = vmul.f32 %v4268_v62, %v4268_v62  ;;  %v3457_v2 = vpack.c.bf16 %v2575_v61, %v2574_v59  ;;  %v3495_v29 = vpack.c.bf16 %v2593_v1, %v2592_v25  ;;  %v3505_v59 = vpack.c.bf16 %v2615_v51, %v2614_v49  ;;  %v2598_v61 = vld [vmem:[%s4626_s13 + $0x140] sm:$0xff]  ;;  %v2619_v16 = vld [vmem:[%s4626_s13 + $0x1e8] sm:$0xff]  ;;  %v2588_v1 = vld [vmem:[%s4626_s13 + $0xf0] sm:$0xff] }
0x1479   : > { %3414 = vmatprep.subr.bf16.mxu1 %v3413_v26  ;;  %v2579_v26 = vld [vmem:[%s4626_s13 + $0xa8] sm:$0xff] }
0x147a   : > { %2306 = vadd.xlane.f32.xlu1 %v2305_v63  ;;  %3416 = vmatpush1.bf16.msra.mxu1 %v3415_v30  ;;  %v2606_v63 = vld [vmem:[%s4626_s13 + $0x180] sm:$0xff]  ;;  %v3465_v34 = vpack.c.bf16 %v2579_v26, %v2578_v57  ;;  %v2589_v57 = vld [vmem:[%s4626_s13 + $0xf8] sm:$0xff]  ;;  %v2620_v26 = vld [vmem:[%s4626_s13 + $0x1f0] sm:$0xff] }
0x147b   : > { %3418 = vmatprep.subr.bf16.mxu1 %v3417_v32  ;;  %v3489_v4 = vpack.c.bf16 %v2607_v3, %v2606_v63  ;;  %v2562_v30 = vld [vmem:[%s4626_s13 + $0x20] sm:$0xff]  ;;  %v2595_v32 = vld [vmem:[%s4626_s13 + $0x128] sm:$0xff]  ;;  %v2585_v3 = vld [vmem:[%s4626_s13 + $0xd8] sm:$0xff]  ;;  %v3485_v50 = vpack.c.bf16 %v2589_v57, %v2588_v1 }
0x147c   : > { %v3467_v38 = vpack.c.bf16 %v2563_v31, %v2562_v30  ;;  %v3499_v40 = vpack.c.bf16 %v2595_v32, %v2594_v36  ;;  %v2599_v63 = vld [vmem:[%s4626_s13 + $0x148] sm:$0xff]  ;;  %v3517_v30 = vpack.c.bf16 %v2621_v27, %v2620_v26  ;;  %v2392_v32 = vlaneseq }
0x147d   : > { %3490 = vmatprep.subr.bf16.mxu0 %v3489_v4  ;;  %v2616_v4 = vld [vmem:[%s4626_s13 + $0x1d0] sm:$0xff] }
0x147e   : > { %3420 = vmatpush1.bf16.msra.mxu1 %v3419_v42  ;;  %v2565_v42 = vld [vmem:[%s4626_s13 + $0x38] sm:$0xff]  ;;  %v2393_v37 = vshrl.u32 %v2392_v32, 7 }
0x147f   : > { %3422 = vmatprep.subr.bf16.mxu1 %v3421_v47  ;;  %v2582_v47 = vld [vmem:[%s4626_s13 + $0xc0] sm:$0xff]  ;;  %v3471_v52 = vpack.c.bf16 %v2565_v42, %v2564_v41 }
0x1480   : > { %v3473_v58 = vpack.c.bf16 %v2583_v48, %v2582_v47  ;;  %v2394_v60 = vsub.s32 0, %v2393_v37  ;;  %v2402_v14 = vsub.s32 2, %v2393_v37 }
0x1482   : > { %3424 = vmatpush1.bf16.msra.mxu1 %v3423_v56  ;;  %v2567_v56 = vld [vmem:[%s4626_s13 + $0x48] sm:$0xff]  ;;  %v2395_v41 = vrot.slane %v2390_v33, %v2394_v60  ;;  %v2403_v42 = vrot.slane %v2390_v33, %v2402_v14 }
0x1483   : > { %3458 = vmatprep.subr.bf16.mxu1 %v3457_v2  ;;  %v2584_v2 = vld [vmem:[%s4626_s13 + $0xd0] sm:$0xff] }
0x1507   : > { %v2307_v5 = vpop.xlane.xlu1 %2306 }
0x1508   : > { %v2308_v6 = vmul.f32 0.0078125, %v2307_v5  ;;  %v2617_v5 = vld [vmem:[%s4626_s13 + $0x1d8] sm:$0xff] }
0x1509   : > { %v3509_v10 = vpack.c.bf16 %v2617_v5, %v2616_v4 }
0x150a   : > { %v2309_v7 = vadd.f32 1e-05, %v2308_v6  ;;  %v3475_v6 = vpack.c.bf16 %v2567_v56, %v2566_v55 }
0x150c   : > { %3582 = vrsqrt.f32 %v2309_v7  ;;  %v3507_v7 = vpack.c.bf16 %v2599_v63, %v2598_v61 }
0x1516   : > { %v3583_v9 = vpop.eup %3582 }
0x1517   : > { %v2311_v12 = vmul.f32 %v3583_v9, %v4268_v62  ;;  %v2608_v62 = vld [vmem:[%s4626_s13 + $0x190] sm:$0xff]  ;;  %v2569_v9 = vld [vmem:[%s4626_s13 + $0x58] sm:$0xff] }
0x1518   : > { %v3493_v24 = vpack.c.bf16 %v2609_v17, %v2608_v62 }
0x1519   : > { %v2318_v18 = vmul.f32 %v2900_v8, %v2311_v12  ;;  %v2568_v8 = vld [vmem:[%s4626_s13 + $0x50] sm:$0xff]  ;;  %v2601_v12 = vld [vmem:[%s4626_s13 + $0x158] sm:$0xff] }
0x151a   : > { %v3479_v62 = vpack.c.bf16 %v2569_v9, %v2568_v8  ;;  %v3511_v17 = vpack.c.bf16 %v2601_v12, %v2600_v11 }
0x151b   : > { %v4441_v22 = vadd.f32 %v2901_v54, %v2318_v18  ;;  %v3477_v54 = vpack.c.bf16 %v2585_v3, %v2584_v2  ;;  %v3481_v18 = vpack.c.bf16 %v2587_v0, %v2586_v13  ;;  %v2902_v2 = vld [vmem:[%s4627_s14] ss:$0 sm:$0xff] }
0x151d   : > { %2477 = vmatmul.mubr.f32.vlgmr.msra.gmra.mrb[34].mxu1 %v4441_v22  ;;  %2548 = vmatmul.mubr.f32.vlgmr.msra.gmra.mrb[6].mxu0 %v4441_v22 }
0x151e   : > { %3460 = vmatpush3.bf16.msra.mxu1 %v3459_v19  ;;  %3492 = vmatpush3.bf16.msra.mxu0 %v3491_v39  ;;  %v3513_v19 = vpack.c.bf16 %v2619_v16, %v2618_v15  ;;  %v2570_v39 = vld [vmem:[%s4626_s13 + $0x60] sm:$0xff] }
0x151f   : > { %3462 = vmatprep.subr.bf16.mxu1 %v3461_v23  ;;  %3494 = vmatprep.subr.bf16.mxu0 %v3493_v24  ;;  %v3483_v23 = vpack.c.bf16 %v2571_v20, %v2570_v39  ;;  %v2603_v24 = vld [vmem:[%s4626_s13 + $0x168] sm:$0xff] }
0x1520   : > { %v3515_v25 = vpack.c.bf16 %v2603_v24, %v2602_v21 }
0x1522   : > { %3464 = vmatpush3.bf16.msra.mxu1 %v3463_v28  ;;  %3496 = vmatpush3.bf16.msra.mxu0 %v3495_v29  ;;  %v2572_v28 = vld [vmem:[%s4626_s13 + $0x70] sm:$0xff]  ;;  %v2573_v29 = vld [vmem:[%s4626_s13 + $0x78] sm:$0xff] }
0x1523   : > { %3466 = vmatprep.subr.bf16.mxu1 %v3465_v34  ;;  %3498 = vmatprep.subr.bf16.mxu0 %v3497_v35  ;;  %v3487_v31 = vpack.c.bf16 %v2573_v29, %v2572_v28  ;;  %v2604_v34 = vld [vmem:[%s4626_s13 + $0x170] sm:$0xff]  ;;  %v2605_v35 = vld [vmem:[%s4626_s13 + $0x178] sm:$0xff] }
0x1524   : > { %v3519_v36 = vpack.c.bf16 %v2605_v35, %v2604_v34 }
0x1526   : > { %3468 = vmatpush3.bf16.msra.mxu1 %v3467_v38  ;;  %3500 = vmatpush3.bf16.msra.mxu0 %v3499_v40  ;;  %v2398_v38 = vsub.s32 1, %v2393_v37  ;;  %v2406_v40 = vsub.s32 3, %v2393_v37 }
0x1527   : > { %3470 = vmatprep.subr.bf16.mxu1 %v3469_v43  ;;  %3502 = vmatprep.subr.bf16.mxu0 %v3501_v44 }
0x1528   : > { %v2399_v43 = vrot.slane %v2390_v33, %v2398_v38  ;;  %v2407_v44 = vrot.slane %v2390_v33, %v2406_v40 }
0x152a   : > { %3472 = vmatpush3.bf16.msra.mxu1 %v3471_v52  ;;  %3504 = vmatpush3.bf16.msra.mxu0 %v3503_v53 }
0x152b   : > { %3474 = vmatprep.subr.bf16.mxu1 %v3473_v58  ;;  %3506 = vmatprep.subr.bf16.mxu0 %v3505_v59 }
0x152e   : > { %3476 = vmatpush3.bf16.msra.mxu1 %v3475_v6  ;;  %3508 = vmatpush3.bf16.msra.mxu0 %v3507_v7 }
0x152f   : > { %3478 = vmatprep.subr.bf16.mxu1 %v3477_v54  ;;  %3510 = vmatprep.subr.bf16.mxu0 %v3509_v10 }
0x1532   : > { %3480 = vmatpush3.bf16.msra.mxu1 %v3479_v62  ;;  %3512 = vmatpush3.bf16.msra.mxu0 %v3511_v17  ;;  %v2903_v62 = vld [vmem:[%s4628_s15] ss:$0 sm:$0xff] }
0x1533   : > { %3482 = vmatprep.subr.bf16.mxu1 %v3481_v18  ;;  %3514 = vmatprep.subr.bf16.mxu0 %v3513_v19  ;;  %v2904_v18 = vld [vmem:[#allocation2] ss:$0 sm:$0xff] }
0x1536   : > { %3484 = vmatpush3.bf16.msra.mxu1 %v3483_v23  ;;  %3516 = vmatpush3.bf16.msra.mxu0 %v3515_v25 }
0x1537   : > { %3486 = vmatprep.subr.bf16.mxu1 %v3485_v50  ;;  %3518 = vmatprep.subr.bf16.mxu0 %v3517_v30 }
0x153a   : > { %3488 = vmatpush3.bf16.msra.mxu1 %v3487_v31  ;;  %3520 = vmatpush3.bf16.msra.mxu0 %v3519_v36 }
0x15f0   : > { %v2478_v45 = vpop.f32.mrb[34].mxu1  ;;  %v2549_v46 = vpop.f32.mrb[6].mxu0 }
0x15f1   : > { %v2479_v47 = vadd.f32 %v2478_v45, %v2395_v41  ;;  %v2550_v48 = vadd.f32 %v2549_v46, %v2403_v42  ;;  %v2480_v49 = vpop.f32.mrb[35].mxu1  ;;  %v2551_v51 = vpop.f32.mrb[7].mxu0 }
0x15f2   : > { %v2481_v52 = vadd.f32 %v2480_v49, %v2399_v43  ;;  %v2552_v53 = vadd.f32 %v2551_v51, %v2407_v44 }
0x15f3   : > { %v2554_v58 = vmax.f32 %v2479_v47, 0.0  ;;  %v2556_v59 = vmax.f32 %v2550_v48, 0.0 }
0x15f4   : > { %v2555_v55 = vmax.f32 %v2481_v52, 0.0  ;;  %v2557_v56 = vmax.f32 %v2552_v53, 0.0 }
0x15f6   : > { %2693 = vmatprep.mubr.f32.mxu1 %v2555_v55  ;;  %2763 = vmatprep.mubr.f32.mxu0 %v2557_v56 }
0x15f7   : > { %2694 = vmatmul.mubr.f32.vlgmr.msra.gmra.mrb[36].mxu1 %v2554_v58  ;;  %2764 = vmatmul.mubr.f32.vlgmr.msra.gmra.mrb[8].mxu0 %v2556_v59 }
0x16ca   : > { %v3039_v61 = vpop.f32.mrb[36].mxu1  ;;  %v3074_v63 = vpop.f32.mrb[8].mxu0 }
0x16cb   : > { %v3040_v3 = vpop.f32.mrb[37].mxu1  ;;  %v3075_v4 = vpop.f32.mrb[9].mxu0 }
0x16cc   : > { %v3041_v5 = vadd.f32 %v3040_v3, %v3039_v61  ;;  %v3076_v6 = vadd.f32 %v3075_v4, %v3074_v63 }
0x16ce   : > { %v2696_v7 = vadd.f32 %v3041_v5, %v2902_v2 }
0x16d0   : > { %v2766_v8 = vadd.f32 %v3076_v6, %v2696_v7 }
0x16d2   : > { %v2769_v9 = vadd.f32 %v2766_v8, %v4441_v22 }
0x16d4   : > { %2772 = vadd.xlane.f32.xlu0 %v2769_v9 }
0x1761   : > { %v2773_v54 = vpop.xlane.xlu0 %2772 }
0x1762   : > { %v2774_v10 = vmul.f32 0.0078125, %v2773_v54 }
0x1764   : > { %v2775_v11 = vsub.f32 %v2769_v9, %v2774_v10 }
0x1766   : > { %v2776_v12 = vmul.f32 %v2775_v11, %v2775_v11 }
0x1768   : > { %2777 = vadd.xlane.f32.xlu0 %v2776_v12 }
0x17f5   : > { %v2778_v13 = vpop.xlane.xlu0 %2777 }
0x17f6   : > { %v2779_v0 = vmul.f32 0.0078125, %v2778_v13 }
0x17f8   : > { %v2780_v15 = vadd.f32 1e-05, %v2779_v0 }
0x17fa   : > { %3584 = vrsqrt.f32 %v2780_v15 }
0x1804   : > { %v3585_v16 = vpop.eup %3584 }
0x1805   : > { %v2782_v17 = vmul.f32 %v3585_v16, %v2775_v11 }
0x1807   : > { %v2789_v19 = vmul.f32 %v2903_v62, %v2782_v17 }
0x1809   : > { %v2796_v22 = vadd.f32 %v2904_v18, %v2789_v19 }
0x180b   : > { %2797 = vst [vmem:[%s556_s26] sm:$0xff] %v2796_v22 }
0x180c PF: > { %s28_s24 = sadd.s32 1, %s3624_s24  }
0x180d   : > { %p25_p3 = scmp.ge.s32.totalorder %s28_s24, 4  }
0x180f   :  { %27 = sbr.rel (!%p25_p3) target bundleno = 4 (0x4), region = 123 }
0x1816   :  { %2817 = vsyncpa [#allocation3], 1 }
0x1817   :  { %2819 = vsyncpa [#allocation3 + $0x1], 1 }

// kernel: keypoint_transformer_forward.8
= control target key start
LH: loop header
LB: loop body
LE: loop exit
PB: predicated region body
PF: predicated region fallthrough
CT: control target
= control target key end

     0   :  { %s5309_s0 = inlined_call_operand.vmem [shape: f32[2,8,128], index: 0, kind: input, shape index: {}, may-alias: {0,17}]   ;;  %s5310_s1 = inlined_call_operand.vmem [shape: f32[128,128], index: 1, kind: input, shape index: {}]   ;;  %s5311_s2 = inlined_call_operand.hbm [shape: f32[1,128], index: 2, kind: input, shape index: {}]   ;;  %s5312_s3 = inlined_call_operand.vmem [shape: f32[128,128], index: 3, kind: input, shape index: {}]   ;;  %s5313_s4 = inlined_call_operand.hbm [shape: f32[1,128], index: 4, kind: input, shape index: {}]   ;;  %s5314_s5 = inlined_call_operand.vmem [shape: f32[128,128], index: 5, kind: input, shape index: {}]   ;;  %s5315_s6 = inlined_call_operand.hbm [shape: f32[1,128], index: 6, kind: input, shape index: {}]   ;;  %s5316_s7 = inlined_call_operand.vmem [shape: f32[128,128], index: 7, kind: input, shape index: {}]   ;;  %s5317_s8 = inlined_call_operand.hbm [shape: f32[1,128], index: 8, kind: input, shape index: {}]   ;;  %s5318_s9 = inlined_call_operand.hbm [shape: f32[1,128], index: 9, kind: input, shape index: {}]   ;;  %s5319_s10 = inlined_call_operand.hbm [shape: f32[1,128], index: 10, kind: input, shape index: {}]   ;;  %s5320_s11 = inlined_call_operand.vmem [shape: f32[128,512], index: 11, kind: input, shape index: {}]   ;;  %s5321_s12 = inlined_call_operand.vmem [shape: f32[1,512], index: 12, kind: input, shape index: {}]   ;;  %s5322_s13 = inlined_call_operand.vmem [shape: f32[512,128], index: 13, kind: input, shape index: {}]   ;;  %s5323_s14 = inlined_call_operand.hbm [shape: f32[1,128], index: 14, kind: input, shape index: {}]   ;;  %s5324_s15 = inlined_call_operand.hbm [shape: f32[1,128], index: 15, kind: input, shape index: {}]   ;;  %s5325_s16 = inlined_call_operand.hbm [shape: f32[1,128], index: 16, kind: input, shape index: {}]   ;;  %s5326_s17 = inlined_call_operand.vmem [shape: f32[2,8,128], index: 17, kind: output, shape index: {}, may-alias: {0,17}]  }
   0x1   :  { %5331 = sst [smem:[#allocation22_spill]] %s5309_s0 }
   0x2   :  { %5332 = sst [smem:[#allocation23_spill]] %s5310_s1 }
   0x3   :  { %5333 = sst [smem:[#allocation24_spill]] %s5321_s12 }
   0x4   :  { %5334 = sst [smem:[#allocation25_spill]] %s5326_s17 }
   0x5   :  { %22 = vsyncpa [#allocation3], 0 }
   0x6   :  { %23 = vsyncpa [#allocation5], 0 }
   0x7   :  { %24 = vsyncpa [#allocation8], 0 }
   0x8   :  { %25 = vsyncpa [#allocation11], 0 }
   0x9   :  { %26 = vsyncpa [#allocation14], 0  ;;  %s4247_s24 = smov 0  }
   0xa LB: > { %5335 = sst [smem:[#allocation21_spill]] %s4136_s24  ;;  %s4138_s25 = smov [#allocation4]   ;;  %s4136_s24 = sphi %s4247_s24, %s32_s24  }
   0xb   : > { %s455_s26 = sshll.u32 %s4138_s25, 4  ;;  %s4253_s27 = sadd.s32 4294967295, %s4136_s24   ;;  %s4258_s26 = int_to_ptr.vmem [resolvable:$true] %s455_s26 }
   0xc   : > { %p3041_p0 = scmp.ge.s32.totalorder %s4136_s24, 1  ;;  %p425_p1 = scmp.lt.s32.totalorder %s4136_s24, 3 }
   0xd   : > { %p5329_p2 = scmp.eq.s32.totalorder %s4253_s27, 0  ;;  %s4139_s29 = smov [#allocation7]  }
   0xe   : > { %p4260_p3 = pnand %p3041_p0, %p425_p1  ;;  %s483_s0 = sshll.u32 %s4139_s29, 4  ;;  %s4266_s0 = int_to_ptr.vmem [resolvable:$true] %s483_s0 }
   0xf   : > { %s4140_s30 = smov [#allocation10]   ;;  %s4141_s1 = smov [#allocation13]  }
  0x10   : > { %s5336_s28 = scalar_select %p4260_p3, 1, 0 }
  0x11   : > { %p3749_p4 = pneg %p4260_p3  ;;  %s505_s18 = sshll.u32 %s4140_s30, 4  ;;  %s4274_s18 = int_to_ptr.vmem [resolvable:$true] %s505_s18 }
  0x12   : > { %s536_s20 = sshll.u32 %s4141_s1, 4  ;;  %s3858_s23 = scalar_lea.hbm %s5313_s4, 16  ;;  %s4276_s20 = int_to_ptr.vmem [resolvable:$true] %s536_s20 }
  0x13   : > { %p4270_p5 = pnand %p5329_p2, %p3749_p4  ;;  %p3859_p6 = scmp.ne.s32.totalorder %s5313_s4, %s3858_s23 }
  0x14   : > { %p3865_p10 = scmp.lt.u32.totalorder %s3858_s23, %s5313_s4 }
  0x15   : > { %p4286_p7 = pneg %p4270_p5 }
  0x17   : > { %p3861_p8 = pnand %p4286_p7, %p3859_p6 }
  0x19   : > { %p3862_p9 = pneg %p3861_p8 }
  0x1b   : > { %p3867_p11 = pnand %p3865_p10, %p3862_p9 }
  0x1d   : > { %3870 = shalt.err (!%p3867_p11)
}
  0x1e   : > { %s3871_s21 = scalar_lea.vmem %s4258_s26, 16  ;;  %s3878_s22 = scalar_lea.vmem %s4258_s26, 32 }
  0x1f   : > { %p3872_p12 = scmp.ne.s32.totalorder %s4258_s26, %s3871_s21  ;;  %p3879_p1 = scmp.lt.s32.totalorder %s4258_s26, %s4258_s26 }
  0x20   : > { %p3880_p4 = scmp.lt.s32.totalorder %s3878_s22, %s3871_s21 }
  0x21   : > { %p3874_p13 = pnand %p3872_p12, %p4286_p7 }
  0x22   : > { %p3881_p6 = por %p3880_p4, %p3879_p1 }
  0x23   : > { %p3875_p0 = pneg %p3874_p13 }
  0x25   : > { %p3882_p8 = pnand %p3881_p6, %p3875_p0 }
  0x27   : > { %3885 = shalt.err (!%p3882_p8)
}
  0x28   : > { %3755 = dma.hbm_to_vmem [thread:$0]  (!%p4270_p5), %s5313_s4, 16, %s4258_s26, [#allocation5]  }
  0x29   : > { %s3886_s1 = scalar_lea.hbm %s5317_s8, 16 }
  0x2a   : > { %p3887_p9 = scmp.ne.s32.totalorder %s5317_s8, %s3886_s1  ;;  %p3893_p12 = scmp.lt.u32.totalorder %s3886_s1, %s5317_s8 }
  0x2c   : > { %p3889_p10 = pnand %p3887_p9, %p4286_p7 }
  0x2e   : > { %p3890_p11 = pneg %p3889_p10 }
  0x30   : > { %p3895_p13 = pnand %p3893_p12, %p3890_p11 }
  0x32   : > { %3898 = shalt.err (!%p3895_p13)
}
  0x33   : > { %s3899_s26 = scalar_lea.vmem %s4266_s0, 16  ;;  %s3906_s12 = scalar_lea.vmem %s4266_s0, 32 }
  0x34   : > { %p3900_p0 = scmp.ne.s32.totalorder %s4266_s0, %s3899_s26  ;;  %p3907_p6 = scmp.lt.s32.totalorder %s4266_s0, %s4266_s0 }
  0x35   : > { %p3908_p8 = scmp.lt.s32.totalorder %s3906_s12, %s3899_s26 }
  0x36   : > { %p3902_p1 = pnand %p3900_p0, %p4286_p7 }
  0x37   : > { %p3909_p9 = por %p3908_p8, %p3907_p6 }
  0x38   : > { %p3903_p4 = pneg %p3902_p1 }
  0x3a   : > { %p3910_p10 = pnand %p3909_p9, %p3903_p4 }
  0x3c   : > { %3913 = shalt.err (!%p3910_p10)
}
  0x3d   : > { %3761 = dma.hbm_to_vmem [thread:$0]  (!%p4270_p5), %s5317_s8, 16, %s4266_s0, [#allocation8]  }
  0x3e   : > { %s3914_s29 = scalar_lea.hbm %s5319_s10, 16 }
  0x3f   : > { %p3915_p11 = scmp.ne.s32.totalorder %s5319_s10, %s3914_s29  ;;  %p3921_p0 = scmp.lt.u32.totalorder %s3914_s29, %s5319_s10 }
  0x41   : > { %p3917_p12 = pnand %p3915_p11, %p4286_p7 }
  0x43   : > { %p3918_p13 = pneg %p3917_p12 }
  0x45   : > { %p3923_p1 = pnand %p3921_p0, %p3918_p13 }
  0x47   : > { %3926 = shalt.err (!%p3923_p1)
}
  0x48   : > { %s3927_s0 = scalar_lea.vmem %s4274_s18, 16  ;;  %s3934_s12 = scalar_lea.vmem %s4274_s18, 32 }
  0x49   : > { %p3928_p4 = scmp.ne.s32.totalorder %s4274_s18, %s3927_s0  ;;  %p3935_p9 = scmp.lt.s32.totalorder %s4274_s18, %s4274_s18 }
  0x4a   : > { %p3936_p10 = scmp.lt.s32.totalorder %s3934_s12, %s3927_s0 }
  0x4b   : > { %p3930_p6 = pnand %p3928_p4, %p4286_p7 }
  0x4c   : > { %p3937_p11 = por %p3936_p10, %p3935_p9 }
  0x4d   : > { %p3931_p8 = pneg %p3930_p6 }
  0x4f   : > { %p3938_p12 = pnand %p3937_p11, %p3931_p8 }
  0x51   : > { %3941 = shalt.err (!%p3938_p12)
}
  0x52   : > { %3767 = dma.hbm_to_vmem [thread:$0]  (!%p4270_p5), %s5319_s10, 16, %s4274_s18, [#allocation11]  }
  0x53   : > { %s3942_s29 = scalar_lea.hbm %s5324_s15, 16 }
  0x54   : > { %p3943_p13 = scmp.ne.s32.totalorder %s5324_s15, %s3942_s29  ;;  %p3949_p4 = scmp.lt.u32.totalorder %s3942_s29, %s5324_s15 }
  0x56   : > { %p3945_p0 = pnand %p3943_p13, %p4286_p7 }
  0x58   : > { %p3946_p1 = pneg %p3945_p0 }
  0x5a   : > { %p3951_p6 = pnand %p3949_p4, %p3946_p1 }
  0x5c   : > { %3954 = shalt.err (!%p3951_p6)
}
  0x5d   : > { %s3955_s18 = scalar_lea.vmem %s4276_s20, 16  ;;  %s3962_s0 = scalar_lea.vmem %s4276_s20, 32 }
  0x5e   : > { %p3956_p8 = scmp.ne.s32.totalorder %s4276_s20, %s3955_s18  ;;  %p3963_p11 = scmp.lt.s32.totalorder %s4276_s20, %s4276_s20 }
  0x5f   : > { %p3964_p12 = scmp.lt.s32.totalorder %s3962_s0, %s3955_s18 }
  0x60   : > { %p3958_p9 = pnand %p3956_p8, %p4286_p7 }
  0x61   : > { %p3965_p13 = por %p3964_p12, %p3963_p11 }
  0x62   : > { %p3959_p10 = pneg %p3958_p9 }
  0x64   : > { %p3966_p0 = pnand %p3965_p13, %p3959_p10 }
  0x66   : > { %3969 = shalt.err (!%p3966_p0)
}
  0x67   : > { %3773 = dma.hbm_to_vmem [thread:$0]  (!%p4270_p5), %s5324_s15, 16, %s4276_s20, [#allocation14]  }
  0x68   : > { %s4142_s24 = smov [#allocation2]   ;;  %s4143_s25 = smov [#allocation6]  }
  0x69   : > { %s441_s23 = sshll.u32 %s4142_s24, 4  ;;  %s469_s29 = sshll.u32 %s4143_s25, 4  ;;  %s442_s23 = int_to_ptr.vmem [resolvable:$true] %s441_s23  ;;  %s470_s29 = int_to_ptr.vmem [resolvable:$true] %s469_s29 }
  0x6a   : > { %s3970_s22 = scalar_lea.hbm %s5311_s2, 16 }
  0x6b   : > { %p3971_p1 = scmp.ne.s32.totalorder %s5311_s2, %s3970_s22  ;;  %p3977_p8 = scmp.lt.u32.totalorder %s3970_s22, %s5311_s2 }
  0x6d   : > { %p3973_p4 = pnand %p3971_p1, %p4286_p7 }
  0x6f   : > { %p3974_p6 = pneg %p3973_p4 }
  0x71   : > { %p3979_p9 = pnand %p3977_p8, %p3974_p6 }
  0x73   : > { %3982 = shalt.err (!%p3979_p9)
}
  0x74   : > { %s3983_s20 = scalar_lea.vmem %s442_s23, 16  ;;  %s3990_s17 = scalar_lea.vmem %s442_s23, 32 }
  0x75   : > { %p3984_p10 = scmp.ne.s32.totalorder %s442_s23, %s3983_s20  ;;  %p3991_p13 = scmp.lt.s32.totalorder %s442_s23, %s442_s23 }
  0x76   : > { %p3992_p0 = scmp.lt.s32.totalorder %s3990_s17, %s3983_s20 }
  0x77   : > { %p3986_p11 = pnand %p3984_p10, %p4286_p7 }
  0x78   : > { %p3993_p2 = por %p3992_p0, %p3991_p13 }
  0x79   : > { %p3987_p12 = pneg %p3986_p11 }
  0x7b   : > { %p3994_p3 = pnand %p3993_p2, %p3987_p12 }
  0x7d   : > { %3997 = shalt.err (!%p3994_p3)
}
  0x7e   : > { %3752 = dma.hbm_to_vmem [thread:$0]  (!%p4270_p5), %s5311_s2, 16, %s442_s23, [#allocation3]  }
  0x7f   : > { %s3998_s22 = scalar_lea.hbm %s5315_s6, 16 }
  0x80   : > { %p3999_p1 = scmp.ne.s32.totalorder %s5315_s6, %s3998_s22  ;;  %p4005_p3 = scmp.lt.u32.totalorder %s3998_s22, %s5315_s6 }
  0x82   : > { %p4001_p4 = pnand %p3999_p1, %p4286_p7 }
  0x84   : > { %p4002_p2 = pneg %p4001_p4 }
  0x86   : > { %p4007_p6 = pnand %p4005_p3, %p4002_p2 }
  0x88   : > { %4010 = shalt.err (!%p4007_p6)
}
  0x89   : > { %s4011_s20 = scalar_lea.vmem %s470_s29, 16  ;;  %s4018_s23 = scalar_lea.vmem %s470_s29, 32 }
  0x8a   : > { %p4012_p8 = scmp.ne.s32.totalorder %s470_s29, %s4011_s20  ;;  %p4019_p11 = scmp.lt.s32.totalorder %s470_s29, %s470_s29 }
  0x8b   : > { %p4020_p12 = scmp.lt.s32.totalorder %s4018_s23, %s4011_s20 }
  0x8c   : > { %p4014_p9 = pnand %p4012_p8, %p4286_p7 }
  0x8d   : > { %p4021_p13 = por %p4020_p12, %p4019_p11 }
  0x8e   : > { %p4015_p10 = pneg %p4014_p9 }
  0x90   : > { %p4022_p0 = pnand %p4021_p13, %p4015_p10 }
  0x92   : > { %4025 = shalt.err (!%p4022_p0)
}
  0x93   : > { %3758 = dma.hbm_to_vmem [thread:$0]  (!%p4270_p5), %s5315_s6, 16, %s470_s29, [#allocation5]  }
  0x94   : > { %s4144_s25 = smov [#allocation9]   ;;  %s4145_s21 = smov [#allocation12]  }
  0x95   : > { %s494_s1 = sshll.u32 %s4144_s25, 4  ;;  %s525_s22 = sshll.u32 %s4145_s21, 4  ;;  %s495_s1 = int_to_ptr.vmem [resolvable:$true] %s494_s1  ;;  %s526_s22 = int_to_ptr.vmem [resolvable:$true] %s525_s22 }
  0x96   : > { %s4026_s0 = scalar_lea.hbm %s5318_s9, 16 }
  0x97   : > { %p4027_p1 = scmp.ne.s32.totalorder %s5318_s9, %s4026_s0  ;;  %p4033_p3 = scmp.lt.u32.totalorder %s4026_s0, %s5318_s9 }
  0x99   : > { %p4029_p4 = pnand %p4027_p1, %p4286_p7 }
  0x9b   : > { %p4030_p2 = pneg %p4029_p4 }
  0x9d   : > { %p4035_p6 = pnand %p4033_p3, %p4030_p2 }
  0x9f   : > { %4038 = shalt.err (!%p4035_p6)
}
  0xa0   : > { %s4039_s29 = scalar_lea.vmem %s495_s1, 16  ;;  %s4046_s24 = scalar_lea.vmem %s495_s1, 32 }
  0xa1   : > { %p4040_p8 = scmp.ne.s32.totalorder %s495_s1, %s4039_s29  ;;  %p4047_p11 = scmp.lt.s32.totalorder %s495_s1, %s495_s1 }
  0xa2   : > { %p4048_p12 = scmp.lt.s32.totalorder %s4046_s24, %s4039_s29 }
  0xa3   : > { %p4042_p9 = pnand %p4040_p8, %p4286_p7 }
  0xa4   : > { %p4049_p13 = por %p4048_p12, %p4047_p11 }
  0xa5   : > { %p4043_p10 = pneg %p4042_p9 }
  0xa7   : > { %p4050_p0 = pnand %p4049_p13, %p4043_p10 }
  0xa9   : > { %4053 = shalt.err (!%p4050_p0)
}
  0xaa   : > { %3764 = dma.hbm_to_vmem [thread:$0]  (!%p4270_p5), %s5318_s9, 16, %s495_s1, [#allocation8]  }
  0xab   : > { %s4054_s0 = scalar_lea.hbm %s5323_s14, 16 }
  0xac   : > { %p4055_p1 = scmp.ne.s32.totalorder %s5323_s14, %s4054_s0  ;;  %p4061_p3 = scmp.lt.u32.totalorder %s4054_s0, %s5323_s14 }
  0xae   : > { %p4057_p4 = pnand %p4055_p1, %p4286_p7 }
  0xb0   : > { %p4058_p2 = pneg %p4057_p4 }
  0xb2   : > { %p4063_p6 = pnand %p4061_p3, %p4058_p2 }
  0xb4   : > { %4066 = shalt.err (!%p4063_p6)
}
  0xb5   : > { %s4067_s29 = scalar_lea.vmem %s526_s22, 16  ;;  %s4074_s1 = scalar_lea.vmem %s526_s22, 32 }
  0xb6   : > { %p4068_p8 = scmp.ne.s32.totalorder %s526_s22, %s4067_s29  ;;  %p4075_p11 = scmp.lt.s32.totalorder %s526_s22, %s526_s22 }
  0xb7   : > { %p4076_p12 = scmp.lt.s32.totalorder %s4074_s1, %s4067_s29 }
  0xb8   : > { %p4070_p9 = pnand %p4068_p8, %p4286_p7 }
  0xb9   : > { %p4077_p13 = por %p4076_p12, %p4075_p11 }
  0xba   : > { %p4071_p10 = pneg %p4070_p9 }
  0xbc   : > { %p4078_p0 = pnand %p4077_p13, %p4071_p10 }
  0xbe   : > { %4081 = shalt.err (!%p4078_p0)
}
  0xbf   : > { %3770 = dma.hbm_to_vmem [thread:$0]  (!%p4270_p5), %s5323_s14, 16, %s526_s22, [#allocation11]  }
  0xc0   : > { %s4146_s21 = smov [#allocation15]   ;;  %s4082_s12 = scalar_lea.hbm %s5325_s16, 16 }
  0xc1   : > { %s547_s26 = sshll.u32 %s4146_s21, 4  ;;  %p4083_p1 = scmp.ne.s32.totalorder %s5325_s16, %s4082_s12  ;;  %s548_s26 = int_to_ptr.vmem [resolvable:$true] %s547_s26 }
  0xc2   : > { %p4089_p3 = scmp.lt.u32.totalorder %s4082_s12, %s5325_s16 }
  0xc3   : > { %p4085_p4 = pnand %p4083_p1, %p4286_p7 }
  0xc5   : > { %p4086_p2 = pneg %p4085_p4 }
  0xc7   : > { %p4091_p6 = pnand %p4089_p3, %p4086_p2 }
  0xc9   : > { %4094 = shalt.err (!%p4091_p6)
}
  0xca   : > { %s4095_s22 = scalar_lea.vmem %s548_s26, 16  ;;  %s4102_s1 = scalar_lea.vmem %s548_s26, 32 }
  0xcb   : > { %p4096_p8 = scmp.ne.s32.totalorder %s548_s26, %s4095_s22  ;;  %p4103_p11 = scmp.lt.s32.totalorder %s548_s26, %s548_s26 }
  0xcc   : > { %p4104_p12 = scmp.lt.s32.totalorder %s4102_s1, %s4095_s22 }
  0xcd   : > { %p4098_p9 = pnand %p4096_p8, %p4286_p7 }
  0xce   : > { %p4105_p13 = por %p4104_p12, %p4103_p11 }
  0xcf   : > { %p4099_p10 = pneg %p4098_p9 }
  0xd1   : > { %p4106_p0 = pnand %p4105_p13, %p4099_p10 }
  0xd3   : > { %4109 = shalt.err (!%p4106_p0)
}
  0xd4   : > { %3776 = dma.hbm_to_vmem [thread:$0]  (!%p4270_p5), %s5325_s16, 16, %s548_s26, [#allocation14]  }
  0xd5   : > { %p5339_p1 = scmp.ne.s32.totalorder %s5336_s28, 0 }
  0xd6   : > { %p5340_p4 = scmp.eq.s32.totalorder (!%p5339_p1), %s4253_s27, 0 }
  0xd7   : > { %567 = sbr.rel (%p5339_p1) target bundleno = 6347 (0x18cb), region = 88 }
  0xde   : > { %4115 = dma.done.wait (%p5340_p4), [#allocation3], 16   ;;  %p5341_p7 = pmov %p5340_p4 }
  0xdf   : > { %p5342_p2 = pmov %p5340_p4 }
  0xe0   : > { %4117 = vsyncadd (%p5341_p7), [#allocation3], 4294967280 }
  0xe1   : > { %4119 = dma.done.wait (%p5342_p2), [#allocation5], 32   ;;  %p5343_p3 = pmov %p5342_p2 }
  0xe2   : > { %p5344_p6 = pmov %p5342_p2 }
  0xe3   : > { %4121 = vsyncadd (%p5343_p3), [#allocation5], 4294967264 }
  0xe4   : > { %4123 = dma.done.wait (%p5344_p6), [#allocation8], 32   ;;  %p5345_p5 = pmov %p5342_p2 }
  0xe5   : > { %p5346_p8 = pmov %p5342_p2 }
  0xe6   : > { %4125 = vsyncadd (%p5345_p5), [#allocation8], 4294967264 }
  0xe7   : > { %4127 = dma.done.wait (%p5346_p8), [#allocation11], 32   ;;  %p5347_p9 = pmov %p5342_p2 }
  0xe8   : > { %p5348_p10 = pmov %p5342_p2 }
  0xe9   : > { %4129 = vsyncadd (%p5347_p9), [#allocation11], 4294967264 }
  0xea   : > { %4131 = dma.done.wait (%p5348_p10), [#allocation14], 32   ;;  %p5349_p11 = pmov %p5342_p2 }
  0xeb   : > { %v4147_v0 = vmov 0.0|0.0   ;;  %vm4148_vm0 = vmmov 0   ;;  %v4149_v1 = vmov 0.0   ;;  %v751_v2 = vld [vmem:[%s5312_s3] sm:$0xff]  ;;  %v752_v3 = vld [vmem:[%s5312_s3 + $0x8] sm:$0xff]  ;;  %s5350_s0 = sld [smem:[#allocation23_spill]] }
  0xec   : > { %4133 = vsyncadd (%p5349_p11), [#allocation14], 4294967264  ;;  %3513 = vmatprep.subr.bf16.mxu1 %v4147_v0  ;;  %3489 = vmatprep.subr.bf16.mxu0 %v4147_v0  ;;  %v3514_v5 = vpack.c.bf16 %v752_v3, %v751_v2  ;;  %v753_v7 = vld [vmem:[%s5312_s3 + $0x10] sm:$0xff]  ;;  %v754_v8 = vld [vmem:[%s5312_s3 + $0x18] sm:$0xff]  ;;  %p649_p12 = scmp.lt.s32.totalorder %s4253_s27, 1  ;;  %s5351_s20 = sld [smem:[#allocation22_spill]] }
  0xed   : > { %3336 = vmatprep.mubr.msk.f32.mxu1 %vm4148_vm0, %v4149_v1  ;;  %3301 = vmatprep.mubr.msk.f32.mxu0 %vm4148_vm0, %v4149_v1  ;;  %v3517_v12 = vpack.c.bf16 %v754_v8, %v753_v7  ;;  %v755_v14 = vld [vmem:[%s5312_s3 + $0x20] sm:$0xff]  ;;  %v756_v15 = vld [vmem:[%s5312_s3 + $0x28] sm:$0xff]  ;;  %v757_v20 = vld [vmem:[%s5312_s3 + $0x30] sm:$0xff]  ;;  %vm937_vm1 = vcmask 130048   ;;  %s4150_s17 = smov 112   ;;  %vm1015_vm2 = vcmask 64512  }
  0xee   : > { %3515 = vmatpush3.bf16.msra.mxu1 %v3514_v5  ;;  %v3520_v18 = vpack.c.bf16 %v756_v15, %v755_v14  ;;  %v758_v21 = vld [vmem:[%s5312_s3 + $0x38] sm:$0xff]  ;;  %v759_v26 = vld [vmem:[%s5312_s3 + $0x40] sm:$0xff]  ;;  %v760_v27 = vld [vmem:[%s5312_s3 + $0x48] sm:$0xff]  ;;  %s5356_s27 = smov (!%p649_p12, %s4253_s27), 1  ;;  %s4151_s19 = smov 96   ;;  %vm2292_vm3 = vcmask 261120  }
  0xef   : > { %3516 = vmatprep.subr.bf16.mxu1 %v4147_v0  ;;  %v3523_v24 = vpack.c.bf16 %v758_v21, %v757_v20  ;;  %v3526_v30 = vpack.c.bf16 %v760_v27, %v759_v26  ;;  %v761_v32 = vld [vmem:[%s5312_s3 + $0x50] sm:$0xff]  ;;  %v762_v33 = vld [vmem:[%s5312_s3 + $0x58] sm:$0xff]  ;;  %v763_v38 = vld [vmem:[%s5312_s3 + $0x60] sm:$0xff]  ;;  %s3062_s26 = sshll.u32 %s5356_s27, 3  ;;  %s4152_s30 = smov 80   ;;  %vm2294_vm4 = vcmask 392192  }
  0xf0   : > { %v3529_v36 = vpack.c.bf16 %v762_v33, %v761_v32  ;;  %v764_v39 = vld [vmem:[%s5312_s3 + $0x68] sm:$0xff]  ;;  %v765_v44 = vld [vmem:[%s5312_s3 + $0x70] sm:$0xff]  ;;  %v766_v45 = vld [vmem:[%s5312_s3 + $0x78] sm:$0xff]  ;;  %s4153_s21 = smov 64   ;;  %s4154_s18 = smov 48   ;;  %vm2296_vm5 = vcmask 523264  }
  0xf1   : > { %v658_v4 = vld [vmem:[%s5350_s0] sm:$0xff]  ;;  %v659_v6 = vld [vmem:[%s5350_s0 + $0x8] sm:$0xff]  ;;  %v660_v10 = vld [vmem:[%s5350_s0 + $0x10] sm:$0xff]  ;;  %v3532_v42 = vpack.c.bf16 %v764_v39, %v763_v38  ;;  %v3535_v48 = vpack.c.bf16 %v766_v45, %v765_v44  ;;  %s4155_s12 = smov 32   ;;  %vm2298_vm6 = vcmask 654336   ;;  %vm2300_vm7 = vcmask 785408  }
  0xf2   : > { %v3490_v9 = vpack.c.bf16 %v659_v6, %v658_v4  ;;  %v661_v11 = vld [vmem:[%s5350_s0 + $0x18] sm:$0xff]  ;;  %v662_v16 = vld [vmem:[%s5350_s0 + $0x20] sm:$0xff]  ;;  %v663_v17 = vld [vmem:[%s5350_s0 + $0x28] sm:$0xff]  ;;  %3518 = vmatpush3.bf16.msra.mxu1 %v3517_v12  ;;  %s652_s23 = scalar_lea.vmem %s5351_s20, %s3062_s26  ;;  %s4156_s20 = smov 16   ;;  %vm2302_vm8 = vcmask 916480  }
  0xf3   : > { %v3493_v13 = vpack.c.bf16 %v661_v11, %v660_v10  ;;  %3519 = vmatprep.subr.bf16.mxu1 %v4147_v0  ;;  %v3496_v19 = vpack.c.bf16 %v663_v17, %v662_v16  ;;  %v664_v22 = vld [vmem:[%s5350_s0 + $0x30] sm:$0xff]  ;;  %v665_v23 = vld [vmem:[%s5350_s0 + $0x38] sm:$0xff]  ;;  %v666_v28 = vld [vmem:[%s5350_s0 + $0x40] sm:$0xff]  ;;  %s5353_s29 = sld [smem:[#allocation25_spill]] }
  0xf4   : > { %3491 = vmatpush3.bf16.msra.mxu0 %v3490_v9  ;;  %v3499_v25 = vpack.c.bf16 %v665_v23, %v664_v22  ;;  %v667_v29 = vld [vmem:[%s5350_s0 + $0x48] sm:$0xff]  ;;  %v668_v34 = vld [vmem:[%s5350_s0 + $0x50] sm:$0xff]  ;;  %v669_v35 = vld [vmem:[%s5350_s0 + $0x58] sm:$0xff] }
  0xf5   : > { %3492 = vmatprep.subr.bf16.mxu0 %v4147_v0  ;;  %v3502_v31 = vpack.c.bf16 %v667_v29, %v666_v28  ;;  %v3505_v37 = vpack.c.bf16 %v669_v35, %v668_v34  ;;  %v670_v40 = vld [vmem:[%s5350_s0 + $0x60] sm:$0xff]  ;;  %v671_v41 = vld [vmem:[%s5350_s0 + $0x68] sm:$0xff]  ;;  %v672_v46 = vld [vmem:[%s5350_s0 + $0x70] sm:$0xff] }
  0xf6   : > { %3521 = vmatpush3.bf16.msra.mxu1 %v3520_v18  ;;  %v3508_v43 = vpack.c.bf16 %v671_v41, %v670_v40  ;;  %v673_v47 = vld [vmem:[%s5350_s0 + $0x78] sm:$0xff]  ;;  %v4618_v50 = vld [vmem:[%s652_s23] sm:$0xff]  ;;  %v845_v60 = vld [vmem:[%s5314_s5 + $0x8] sm:$0xff] }
  0xf7   : > { %3522 = vmatprep.subr.bf16.mxu1 %v4147_v0  ;;  %v3511_v49 = vpack.c.bf16 %v673_v47, %v672_v46  ;;  %v3065_v51 = vld [vmem:[#allocation4] ss:$0 sm:$0xff]  ;;  %v3064_v52 = vld [vmem:[#allocation2] ss:$0 sm:$0xff]  ;;  %v846_v61 = vld [vmem:[%s5314_s5 + $0x10] sm:$0xff] }
  0xf8   : > { %3494 = vmatpush3.bf16.msra.mxu0 %v3493_v13  ;;  %v844_v59 = vld [vmem:[%s5314_s5] sm:$0xff]  ;;  %v847_v63 = vld [vmem:[%s5314_s5 + $0x18] sm:$0xff]  ;;  %v849_v4 = vld [vmem:[%s5314_s5 + $0x28] sm:$0xff] }
  0xf9   : > { %3495 = vmatprep.subr.bf16.mxu0 %v4147_v0  ;;  %v3538_v62 = vpack.c.bf16 %v845_v60, %v844_v59  ;;  %v3541_v2 = vpack.c.bf16 %v847_v63, %v846_v61  ;;  %v848_v3 = vld [vmem:[%s5314_s5 + $0x20] sm:$0xff]  ;;  %v850_v6 = vld [vmem:[%s5314_s5 + $0x30] sm:$0xff]  ;;  %v851_v7 = vld [vmem:[%s5314_s5 + $0x38] sm:$0xff]  ;;  %s656_s22 = scalar_lea.vmem %s5353_s29, %s3062_s26 }
  0xfa   : > { %3524 = vmatpush3.bf16.msra.mxu1 %v3523_v24  ;;  %v3544_v5 = vpack.c.bf16 %v849_v4, %v848_v3  ;;  %v3547_v8 = vpack.c.bf16 %v851_v7, %v850_v6  ;;  %v852_v9 = vld [vmem:[%s5314_s5 + $0x40] sm:$0xff]  ;;  %v853_v10 = vld [vmem:[%s5314_s5 + $0x48] sm:$0xff]  ;;  %v854_v12 = vld [vmem:[%s5314_s5 + $0x50] sm:$0xff] }
  0xfb   : > { %3525 = vmatprep.subr.bf16.mxu1 %v4147_v0  ;;  %v3550_v11 = vpack.c.bf16 %v853_v10, %v852_v9  ;;  %v855_v13 = vld [vmem:[%s5314_s5 + $0x58] sm:$0xff]  ;;  %v856_v15 = vld [vmem:[%s5314_s5 + $0x60] sm:$0xff]  ;;  %v857_v16 = vld [vmem:[%s5314_s5 + $0x68] sm:$0xff] }
  0xfc   : > { %3497 = vmatpush3.bf16.msra.mxu0 %v3496_v19  ;;  %v3553_v14 = vpack.c.bf16 %v855_v13, %v854_v12  ;;  %v3556_v17 = vpack.c.bf16 %v857_v16, %v856_v15  ;;  %v858_v18 = vld [vmem:[%s5314_s5 + $0x70] sm:$0xff]  ;;  %v859_v19 = vld [vmem:[%s5314_s5 + $0x78] sm:$0xff] }
  0xfd   : > { %3498 = vmatprep.subr.bf16.mxu0 %v4147_v0  ;;  %v3559_v20 = vpack.c.bf16 %v859_v19, %v858_v18 }
  0xfe   : > { %3527 = vmatpush3.bf16.msra.mxu1 %v3526_v30  ;;  %v3066_v30 = vld [vmem:[#allocation6] ss:$0 sm:$0xff] }
  0xff   : > { %3528 = vmatprep.subr.bf16.mxu1 %v4147_v0 }
 0x100   : > { %3500 = vmatpush3.bf16.msra.mxu0 %v3499_v25 }
 0x101   : > { %3501 = vmatprep.subr.bf16.mxu0 %v4147_v0 }
 0x102   : > { %3530 = vmatpush3.bf16.msra.mxu1 %v3529_v36 }
 0x103   : > { %3531 = vmatprep.subr.bf16.mxu1 %v4147_v0 }
 0x104   : > { %3503 = vmatpush3.bf16.msra.mxu0 %v3502_v31 }
 0x105   : > { %3504 = vmatprep.subr.bf16.mxu0 %v4147_v0 }
 0x106   : > { %3533 = vmatpush3.bf16.msra.mxu1 %v3532_v42 }
 0x107   : > { %3534 = vmatprep.subr.bf16.mxu1 %v4147_v0 }
 0x108   : > { %3506 = vmatpush3.bf16.msra.mxu0 %v3505_v37 }
 0x109   : > { %3507 = vmatprep.subr.bf16.mxu0 %v4147_v0 }
 0x10a   : > { %3536 = vmatpush3.bf16.msra.mxu1 %v3535_v48 }
 0x10b   : > { %3374 = vmatprep.subr.mxu1 %v4149_v1 }
 0x10c   : > { %3509 = vmatpush3.bf16.msra.mxu0 %v3508_v43 }
 0x10d   : > { %3510 = vmatprep.subr.bf16.mxu0 %v4147_v0  ;;  %3337 = vmatmul.mubr.f32.vlgmr.msra.gmra.mrb[0].mxu1 %v4618_v50 }
 0x10e   : > { %3376 = vmatprep.mubr.msk.f32.mxu1 %vm4148_vm0, %v4149_v1 }
 0x110   : > { %3512 = vmatpush3.bf16.msra.mxu0 %v3511_v49 }
 0x111   : > { %3537 = vmatprep.subr.bf16.mxu0 %v4147_v0 }
 0x113   : > { %3302 = vmatmul.mubr.f32.vlgmr.msra.gmra.mrb[0].mxu0 %v4618_v50 }
 0x114   : > { %3371 = vmatprep.mubr.msk.f32.mxu0 %vm4148_vm0, %v4149_v1  ;;  %3539 = vmatpush3.bf16.msra.mxu0 %v3538_v62 }
 0x115   : > { %3540 = vmatprep.subr.bf16.mxu0 %v4147_v0 }
 0x118   : > { %3542 = vmatpush3.bf16.msra.mxu0 %v3541_v2 }
 0x119   : > { %3543 = vmatprep.subr.bf16.mxu0 %v4147_v0 }
 0x11c   : > { %3545 = vmatpush3.bf16.msra.mxu0 %v3544_v5 }
 0x11d   : > { %3546 = vmatprep.subr.bf16.mxu0 %v4147_v0 }
 0x120   : > { %3548 = vmatpush3.bf16.msra.mxu0 %v3547_v8 }
 0x121   : > { %3549 = vmatprep.subr.bf16.mxu0 %v4147_v0 }
 0x124   : > { %3551 = vmatpush3.bf16.msra.mxu0 %v3550_v11 }
 0x125   : > { %3552 = vmatprep.subr.bf16.mxu0 %v4147_v0 }
 0x128   : > { %3554 = vmatpush3.bf16.msra.mxu0 %v3553_v14 }
 0x129   : > { %3555 = vmatprep.subr.bf16.mxu0 %v4147_v0 }
 0x12c   : > { %3557 = vmatpush3.bf16.msra.mxu0 %v3556_v17 }
 0x12d   : > { %3558 = vmatprep.subr.bf16.mxu0 %v4147_v0 }
 0x130   : > { %3560 = vmatpush3.bf16.msra.mxu0 %v3559_v20 }
 0x131   : > { %3561 = vmatprep.subr.bf16.mxu0 %v4147_v0 }
 0x133   : > { %3372 = vmatmul.mubr.f32.vlgmr.msra.gmra.mrb[2].mxu0 %v4618_v50 }
 0x134   : > { %3486 = vmatprep.mubr.msk.f32.mxu0 %vm4148_vm0, %v4149_v1 }
 0x1e0   : > { %v840_v53 = vpop.f32.mrb[0].mxu1 }
 0x1e1   : > { %v4628_v54 = vadd.f32 %v3065_v51, %v840_v53  ;;  %v3338_v55 = vpop.f32.mrb[1].mxu1 }
 0x1e3   : > { %1102 = vrot.lane.b32.xlu1 %v4628_v54, %s4150_s17  ;;  %3375 = vmatpush3.xpose.msk.msra.mxu1 %vm937_vm1, %v4628_v54 }
 0x1e4   : > { %3379 = vmatprep.subr.mxu1 %v4149_v1 }
 0x1e6   : > { %v747_v56 = vpop.f32.mrb[0].mxu0 }
 0x1e7   : > { %v4630_v57 = vadd.f32 %v3064_v52, %v747_v56  ;;  %v3303_v58 = vpop.f32.mrb[1].mxu0 }
 0x1e9   : > { %3377 = vmatmul.mubr.msk.f32.vlgmr.msra.gmra.mrb[2].mxu1 %vm937_vm1, %v4630_v57  ;;  %1100 = vrot.lane.b32.xlu1 %v4630_v57, %s4150_s17 }
 0x1ea   : > { %3381 = vmatprep.mubr.msk.f32.mxu1 %vm4148_vm0, %v4149_v1 }
 0x206   : > { %v933_v31 = vpop.f32.mrb[2].mxu0 }
 0x207   : > { %v4704_v32 = vadd.f32 %v3066_v30, %v933_v31  ;;  %v3373_v33 = vpop.f32.mrb[3].mxu0 }
 0x209   : > { %3380 = vmatpush3.msra.mxu1 %v4704_v32 }
 0x20a   : > { %3384 = vmatprep.subr.mxu1 %v4149_v1 }
 0x255   : > { %v1103_v36 = vpop.permute.xlu1 %1102 }
 0x25b   : > { %v1101_v38 = vpop.permute.xlu1 %1100 }
 0x2bc   : > { %v1010_v21 = vpop.f32.mrb[2].mxu1 }
 0x2bd   : > { %v1014_v22 = vmul.f32 0.25, %v1010_v21  ;;  %v3378_v23 = vpop.f32.mrb[3].mxu1 }
 0x2bf   : > { %v1016_v24 = vsel %vm1015_vm2, %v1014_v22, -inf }
 0x2c0   : > { %1017 = vmax.xlane.f32.xlu0 %v1016_v24 }
 0x34d   : > { %v1018_v25 = vpop.xlane.xlu0 %1017 }
 0x34e   : > { %v1019_v26 = vsub.f32 %v1014_v22, %v1018_v25 }
 0x350   : > { %v1020_v27 = vmul.f32 1.442695, %v1019_v26 }
 0x352   : > { %3822 = vpow2.f32 %v1020_v27 }
 0x35c   : > { %v3823_v28 = vpop.eup %3822 }
 0x35d   : > { %v1022_v29 = vsel %vm1015_vm2, %v3823_v28, 0.0 }
 0x35e   : > { %1023 = vadd.xlane.f32.xlu0 %v1022_v29 }
 0x3eb   : > { %v1024_v34 = vpop.xlane.xlu0 %1023 }
 0x3ec   : > { %3824 = vrcp.f32 %v1024_v34 }
 0x3f6   : > { %v3825_v35 = vpop.eup %3824 }
 0x3f7   : > { %v1026_v37 = vmul.f32 %v3825_v35, %v3823_v28 }
 0x3f9   : > { %3382 = vmatmul.mubr.msk.f32.vlgmr.msra.gmra.mrb[4].mxu1 %vm1015_vm2, %v1026_v37 }
 0x3fa   : > { %3385 = vmatpush3.xpose.msk.msra.mxu1 %vm937_vm1, %v1103_v36  ;;  %3386 = vmatprep.mubr.msk.f32.mxu1 %vm4148_vm0, %v4149_v1 }
 0x3fb   : > { %3389 = vmatprep.subr.mxu1 %v4149_v1 }
 0x3fd   : > { %3387 = vmatmul.mubr.msk.f32.vlgmr.msra.gmra.mrb[6].mxu1 %vm937_vm1, %v1101_v38 }
 0x3fe   : > { %3391 = vmatprep.mubr.msk.f32.mxu1 %vm4148_vm0, %v4149_v1 }
 0x4cc   : > { %v4716_v39 = vpop.f32.mrb[4].mxu1 }
 0x4cd   : > { %v3383_v40 = vpop.f32.mrb[5].mxu1 }
 0x4d0   : > { %v1174_v41 = vpop.f32.mrb[6].mxu1 }
 0x4d1   : > { %v1178_v42 = vmul.f32 0.25, %v1174_v41  ;;  %v3388_v43 = vpop.f32.mrb[7].mxu1 }
 0x4d3   : > { %v1179_v44 = vsel %vm1015_vm2, %v1178_v42, -inf }
 0x4d4   : > { %1180 = vmax.xlane.f32.xlu0 %v1179_v44 }
 0x4ea   : > { %1191 = vrot.lane.b32.xlu0 %v4704_v32, %s4150_s17 }
 0x4ee   : > { %1269 = vrot.lane.b32.xlu0 %v4628_v54, %s4151_s19 }
 0x4f2   : > { %1267 = vrot.lane.b32.xlu0 %v4630_v57, %s4151_s19 }
 0x561   : > { %v1181_v45 = vpop.xlane.xlu0 %1180 }
 0x562   : > { %v1182_v46 = vsub.f32 %v1178_v42, %v1181_v45 }
 0x564   : > { %v1183_v47 = vmul.f32 1.442695, %v1182_v46 }
 0x565   : > { %v1192_v48 = vpop.permute.xlu0 %1191 }
 0x566   : > { %3826 = vpow2.f32 %v1183_v47  ;;  %3390 = vmatpush3.msra.mxu1 %v1192_v48 }
 0x567   : > { %3394 = vmatprep.subr.mxu1 %v4149_v1 }
 0x569   : > { %v1270_v55 = vpop.permute.xlu0 %1269 }
 0x56d   : > { %v1268_v58 = vpop.permute.xlu0 %1267 }
 0x570   : > { %v3827_v49 = vpop.eup %3826 }
 0x571   : > { %v1185_v51 = vsel %vm1015_vm2, %v3827_v49, 0.0 }
 0x572   : > { %1186 = vadd.xlane.f32.xlu1 %v1185_v51 }
 0x583   : > { %1357 = vrot.lane.b32.xlu1 %v4704_v32, %s4151_s19 }
 0x587   : > { %1435 = vrot.lane.b32.xlu1 %v4628_v54, %s4152_s30 }
 0x5ff   : > { %v1187_v52 = vpop.xlane.xlu1 %1186 }
 0x600   : > { %3828 = vrcp.f32 %v1187_v52 }
 0x603   : > { %v1358_v59 = vpop.permute.xlu1 %1357 }
 0x607   : > { %v1436_v9 = vpop.permute.xlu1 %1435 }
 0x60a   : > { %v3829_v53 = vpop.eup %3828 }
 0x60b   : > { %v1189_v56 = vmul.f32 %v3829_v53, %v3827_v49 }
 0x60d   : > { %3392 = vmatmul.mubr.msk.f32.vlgmr.msra.gmra.mrb[8].mxu1 %vm1015_vm2, %v1189_v56 }
 0x60e   : > { %3395 = vmatpush3.xpose.msk.msra.mxu1 %vm937_vm1, %v1270_v55  ;;  %3396 = vmatprep.mubr.msk.f32.mxu1 %vm4148_vm0, %v4149_v1 }
 0x60f   : > { %3399 = vmatprep.subr.mxu1 %v4149_v1 }
 0x611   : > { %3397 = vmatmul.mubr.msk.f32.vlgmr.msra.gmra.mrb[10].mxu1 %vm937_vm1, %v1268_v58 }
 0x612   : > { %3400 = vmatpush3.msra.mxu1 %v1358_v59  ;;  %3401 = vmatprep.mubr.msk.f32.mxu1 %vm4148_vm0, %v4149_v1 }
 0x613   : > { %3404 = vmatprep.subr.mxu1 %v4149_v1 }
 0x6e0   : > { %v4740_v60 = vpop.f32.mrb[8].mxu1 }
 0x6e1   : > { %v3393_v61 = vpop.f32.mrb[9].mxu1 }
 0x6e4   : > { %v1341_v62 = vpop.f32.mrb[10].mxu1 }
 0x6e5   : > { %v1345_v63 = vmul.f32 0.25, %v1341_v62  ;;  %v3398_v2 = vpop.f32.mrb[11].mxu1 }
 0x6e7   : > { %v1346_v3 = vsel %vm1015_vm2, %v1345_v63, -inf }
 0x6e8   : > { %1347 = vmax.xlane.f32.xlu0 %v1346_v3 }
 0x775   : > { %v1348_v4 = vpop.xlane.xlu0 %1347 }
 0x776   : > { %v1349_v5 = vsub.f32 %v1345_v63, %v1348_v4 }
 0x778   : > { %v1350_v6 = vmul.f32 1.442695, %v1349_v5 }
 0x77a   : > { %3830 = vpow2.f32 %v1350_v6 }
 0x784   : > { %v3831_v7 = vpop.eup %3830 }
 0x785   : > { %v1352_v8 = vsel %vm1015_vm2, %v3831_v7, 0.0 }
 0x786   : > { %1353 = vadd.xlane.f32.xlu1 %v1352_v8 }
 0x797   : > { %1433 = vrot.lane.b32.xlu1 %v4630_v57, %s4152_s30 }
 0x813   : > { %v1354_v10 = vpop.xlane.xlu1 %1353 }
 0x814   : > { %3832 = vrcp.f32 %v1354_v10 }
 0x817   : > { %v1434_v13 = vpop.permute.xlu1 %1433 }
 0x81e   : > { %v3833_v11 = vpop.eup %3832 }
 0x81f   : > { %v1356_v12 = vmul.f32 %v3833_v11, %v3831_v7 }
 0x821   : > { %3402 = vmatmul.mubr.msk.f32.vlgmr.msra.gmra.mrb[12].mxu1 %vm1015_vm2, %v1356_v12 }
 0x822   : > { %3405 = vmatpush3.xpose.msk.msra.mxu1 %vm937_vm1, %v1436_v9  ;;  %3406 = vmatprep.mubr.msk.f32.mxu1 %vm4148_vm0, %v4149_v1 }
 0x823   : > { %3409 = vmatprep.subr.mxu1 %v4149_v1 }
 0x825   : > { %3407 = vmatmul.mubr.msk.f32.vlgmr.msra.gmra.mrb[14].mxu1 %vm937_vm1, %v1434_v13 }
 0x826   : > { %3411 = vmatprep.mubr.msk.f32.mxu1 %vm4148_vm0, %v4149_v1 }
 0x8f4   : > { %v4754_v14 = vpop.f32.mrb[12].mxu1 }
 0x8f5   : > { %v3403_v15 = vpop.f32.mrb[13].mxu1 }
 0x8f8   : > { %v1507_v16 = vpop.f32.mrb[14].mxu1 }
 0x8f9   : > { %v1511_v17 = vmul.f32 0.25, %v1507_v16  ;;  %v3408_v18 = vpop.f32.mrb[15].mxu1 }
 0x8fb   : > { %v1512_v19 = vsel %vm1015_vm2, %v1511_v17, -inf }
 0x8fc   : > { %1513 = vmax.xlane.f32.xlu0 %v1512_v19 }
 0x912   : > { %1523 = vrot.lane.b32.xlu0 %v4704_v32, %s4152_s30 }
 0x916   : > { %1601 = vrot.lane.b32.xlu0 %v4628_v54, %s4153_s21 }
 0x91a   : > { %1599 = vrot.lane.b32.xlu0 %v4630_v57, %s4153_s21 }
 0x989   : > { %v1514_v20 = vpop.xlane.xlu0 %1513 }
 0x98a   : > { %v1515_v21 = vsub.f32 %v1511_v17, %v1514_v20 }
 0x98c   : > { %v1516_v22 = vmul.f32 1.442695, %v1515_v21 }
 0x98d   : > { %v1524_v23 = vpop.permute.xlu0 %1523 }
 0x98e   : > { %3834 = vpow2.f32 %v1516_v22  ;;  %3410 = vmatpush3.msra.mxu1 %v1524_v23 }
 0x98f   : > { %3414 = vmatprep.subr.mxu1 %v4149_v1 }
 0x991   : > { %v1602_v28 = vpop.permute.xlu0 %1601 }
 0x995   : > { %v1600_v30 = vpop.permute.xlu0 %1599 }
 0x998   : > { %v3835_v24 = vpop.eup %3834 }
 0x999   : > { %v1518_v25 = vsel %vm1015_vm2, %v3835_v24, 0.0 }
 0x99a   : > { %1519 = vadd.xlane.f32.xlu1 %v1518_v25 }
 0x9ab   : > { %1689 = vrot.lane.b32.xlu1 %v4704_v32, %s4153_s21 }
 0x9af   : > { %1767 = vrot.lane.b32.xlu1 %v4628_v54, %s4154_s18 }
 0xa27   : > { %v1520_v26 = vpop.xlane.xlu1 %1519 }
 0xa28   : > { %3836 = vrcp.f32 %v1520_v26 }
 0xa2b   : > { %v1690_v31 = vpop.permute.xlu1 %1689 }
 0xa2f   : > { %v1768_v45 = vpop.permute.xlu1 %1767 }
 0xa32   : > { %v3837_v27 = vpop.eup %3836 }
 0xa33   : > { %v1522_v29 = vmul.f32 %v3837_v27, %v3835_v24 }
 0xa35   : > { %3412 = vmatmul.mubr.msk.f32.vlgmr.msra.gmra.mrb[16].mxu1 %vm1015_vm2, %v1522_v29 }
 0xa36   : > { %3415 = vmatpush3.xpose.msk.msra.mxu1 %vm937_vm1, %v1602_v28  ;;  %3416 = vmatprep.mubr.msk.f32.mxu1 %vm4148_vm0, %v4149_v1 }
 0xa37   : > { %3419 = vmatprep.subr.mxu1 %v4149_v1 }
 0xa39   : > { %3417 = vmatmul.mubr.msk.f32.vlgmr.msra.gmra.mrb[18].mxu1 %vm937_vm1, %v1600_v30 }
 0xa3a   : > { %3420 = vmatpush3.msra.mxu1 %v1690_v31  ;;  %3421 = vmatprep.mubr.msk.f32.mxu1 %vm4148_vm0, %v4149_v1 }
 0xa3b   : > { %3424 = vmatprep.subr.mxu1 %v4149_v1 }
 0xb08   : > { %v4778_v33 = vpop.f32.mrb[16].mxu1 }
 0xb09   : > { %v3413_v34 = vpop.f32.mrb[17].mxu1 }
 0xb0c   : > { %v1673_v35 = vpop.f32.mrb[18].mxu1 }
 0xb0d   : > { %v1677_v36 = vmul.f32 0.25, %v1673_v35  ;;  %v3418_v37 = vpop.f32.mrb[19].mxu1 }
 0xb0f   : > { %v1678_v38 = vsel %vm1015_vm2, %v1677_v36, -inf }
 0xb10   : > { %1679 = vmax.xlane.f32.xlu0 %v1678_v38  ;;  %v2304_v38 = vld [vmem:[%s5316_s7] sm:$0xff] }
 0xb9d   : > { %v1680_v40 = vpop.xlane.xlu0 %1679 }
 0xb9e   : > { %v1681_v41 = vsub.f32 %v1677_v36, %v1680_v40  ;;  %v2305_v40 = vld [vmem:[%s5316_s7 + $0x8] sm:$0xff] }
 0xba0   : > { %v1682_v42 = vmul.f32 1.442695, %v1681_v41  ;;  %v2306_v41 = vld [vmem:[%s5316_s7 + $0x10] sm:$0xff] }
 0xba2   : > { %3838 = vpow2.f32 %v1682_v42  ;;  %v3562_v42 = vpack.c.bf16 %v2305_v40, %v2304_v38  ;;  %v2438_v38 = vld [vmem:[%s5320_s11 + $0x60] sm:$0xff]  ;;  %v2436_v40 = vld [vmem:[%s5320_s11 + $0x50] sm:$0xff] }
 0xba4   : > { %3563 = vmatpush3.bf16.msra.mxu0 %v3562_v42  ;;  %v2440_v42 = vld [vmem:[%s5320_s11 + $0x70] sm:$0xff] }
 0xba5   : > { %3564 = vmatprep.subr.bf16.mxu0 %v4147_v0 }
 0xbac   : > { %v3839_v43 = vpop.eup %3838 }
 0xbad   : > { %v1684_v44 = vsel %vm1015_vm2, %v3839_v43, 0.0 }
 0xbae   : > { %1685 = vadd.xlane.f32.xlu1 %v1684_v44 }
 0xbbf   : > { %1765 = vrot.lane.b32.xlu1 %v4630_v57, %s4154_s18 }
 0xc3b   : > { %v1686_v46 = vpop.xlane.xlu1 %1685 }
 0xc3c   : > { %3840 = vrcp.f32 %v1686_v46  ;;  %v2309_v46 = vld [vmem:[%s5316_s7 + $0x28] sm:$0xff] }
 0xc3f   : > { %v1766_v49 = vpop.permute.xlu1 %1765 }
 0xc46   : > { %v3841_v47 = vpop.eup %3840 }
 0xc47   : > { %v1688_v48 = vmul.f32 %v3841_v47, %v3839_v43  ;;  %v2307_v43 = vld [vmem:[%s5316_s7 + $0x18] sm:$0xff] }
 0xc48   : > { %v3565_v44 = vpack.c.bf16 %v2307_v43, %v2306_v41  ;;  %v2443_v43 = vld [vmem:[%s5320_s11 + $0x88] sm:$0xff] }
 0xc49   : > { %3422 = vmatmul.mubr.msk.f32.vlgmr.msra.gmra.mrb[20].mxu1 %vm1015_vm2, %v1688_v48  ;;  %v2310_v48 = vld [vmem:[%s5316_s7 + $0x30] sm:$0xff] }
 0xc4a   : > { %3425 = vmatpush3.xpose.msk.msra.mxu1 %vm937_vm1, %v1768_v45  ;;  %3426 = vmatprep.mubr.msk.f32.mxu1 %vm4148_vm0, %v4149_v1  ;;  %v2308_v45 = vld [vmem:[%s5316_s7 + $0x20] sm:$0xff] }
 0xc4b   : > { %3429 = vmatprep.subr.mxu1 %v4149_v1  ;;  %3566 = vmatpush3.bf16.msra.mxu0 %v3565_v44  ;;  %v3568_v47 = vpack.c.bf16 %v2309_v46, %v2308_v45  ;;  %v2447_v44 = vld [vmem:[%s5320_s11 + $0xa8] sm:$0xff]  ;;  %v3623_v45 = vpack.c.bf16 %v2440_v42, %v2436_v40  ;;  %v2476_v40 = vld [vmem:[%s5320_s11 + $0x190] sm:$0xff] }
 0xc4c   : > { %3567 = vmatprep.subr.bf16.mxu0 %v4147_v0  ;;  %v3593_v46 = vpack.c.bf16 %v2447_v44, %v2443_v43  ;;  %v2483_v43 = vld [vmem:[%s5320_s11 + $0x1c8] sm:$0xff] }
 0xc4d   : > { %3427 = vmatmul.mubr.msk.f32.vlgmr.msra.gmra.mrb[22].mxu1 %vm937_vm1, %v1766_v49  ;;  %v2311_v49 = vld [vmem:[%s5316_s7 + $0x38] sm:$0xff]  ;;  %v2487_v44 = vld [vmem:[%s5320_s11 + $0x1e8] sm:$0xff] }
 0xc4e   : > { %3431 = vmatprep.mubr.msk.f32.mxu1 %vm4148_vm0, %v4149_v1 }
 0xc4f   : > { %3569 = vmatpush3.bf16.msra.mxu0 %v3568_v47  ;;  %v2445_v47 = vld [vmem:[%s5320_s11 + $0x98] sm:$0xff] }
 0xc50   : > { %3570 = vmatprep.subr.bf16.mxu0 %v4147_v0 }
 0xd1c   : > { %v4792_v51 = vpop.f32.mrb[20].mxu1 }
 0xd1d   : > { %v3423_v52 = vpop.f32.mrb[21].mxu1 }
 0xd1e   : > { %v2312_v52 = vld [vmem:[%s5316_s7 + $0x40] sm:$0xff] }
 0xd20   : > { %v1839_v53 = vpop.f32.mrb[22].mxu1 }
 0xd21   : > { %v1843_v55 = vmul.f32 0.25, %v1839_v53  ;;  %v3428_v56 = vpop.f32.mrb[23].mxu1  ;;  %v2313_v53 = vld [vmem:[%s5316_s7 + $0x48] sm:$0xff] }
 0xd22   : > { %v2314_v56 = vld [vmem:[%s5316_s7 + $0x50] sm:$0xff] }
 0xd23   : > { %v1844_v58 = vsel %vm1015_vm2, %v1843_v55, -inf }
 0xd24   : > { %1845 = vmax.xlane.f32.xlu0 %v1844_v58  ;;  %v2315_v58 = vld [vmem:[%s5316_s7 + $0x58] sm:$0xff] }
 0xd3a   : > { %1855 = vrot.lane.b32.xlu0 %v4704_v32, %s4154_s18 }
 0xd3e   : > { %1933 = vrot.lane.b32.xlu0 %v4628_v54, %s4155_s12 }
 0xd42   : > { %1931 = vrot.lane.b32.xlu0 %v4630_v57, %s4155_s12 }
 0xdb1   : > { %v1846_v59 = vpop.xlane.xlu0 %1845 }
 0xdb2   : > { %v1847_v61 = vsub.f32 %v1843_v55, %v1846_v59  ;;  %v3574_v55 = vpack.c.bf16 %v2313_v53, %v2312_v52  ;;  %v3577_v59 = vpack.c.bf16 %v2315_v58, %v2314_v56  ;;  %v2446_v52 = vld [vmem:[%s5320_s11 + $0xa0] sm:$0xff]  ;;  %v2444_v53 = vld [vmem:[%s5320_s11 + $0x90] sm:$0xff] }
 0xdb4   : > { %v1848_v62 = vmul.f32 1.442695, %v1847_v61  ;;  %v2316_v61 = vld [vmem:[%s5316_s7 + $0x60] sm:$0xff] }
 0xdb5   : > { %v1856_v63 = vpop.permute.xlu0 %1855 }
 0xdb6   : > { %3842 = vpow2.f32 %v1848_v62  ;;  %3430 = vmatpush3.msra.mxu1 %v1856_v63  ;;  %v2317_v62 = vld [vmem:[%s5316_s7 + $0x68] sm:$0xff] }
 0xdb7   : > { %3434 = vmatprep.subr.mxu1 %v4149_v1  ;;  %v3580_v63 = vpack.c.bf16 %v2317_v62, %v2316_v61 }
 0xdb9   : > { %v1934_v6 = vpop.permute.xlu0 %1933 }
 0xdbd   : > { %v1932_v8 = vpop.permute.xlu0 %1931 }
 0xdc0   : > { %v3843_v2 = vpop.eup %3842 }
 0xdc1   : > { %v1850_v3 = vsel %vm1015_vm2, %v3843_v2, 0.0 }
 0xdc2   : > { %1851 = vadd.xlane.f32.xlu1 %v1850_v3  ;;  %v2319_v3 = vld [vmem:[%s5316_s7 + $0x78] sm:$0xff] }
 0xdd3   : > { %2021 = vrot.lane.b32.xlu1 %v4704_v32, %s4155_s12 }
 0xdd7   : > { %2099 = vrot.lane.b32.xlu1 %v4628_v54, %s4156_s20 }
 0xe4f   : > { %v1852_v4 = vpop.xlane.xlu1 %1851 }
 0xe50   : > { %3844 = vrcp.f32 %v1852_v4 }
 0xe53   : > { %v2022_v9 = vpop.permute.xlu1 %2021 }
 0xe57   : > { %v2100_v21 = vpop.permute.xlu1 %2099 }
 0xe5a   : > { %v3845_v5 = vpop.eup %3844 }
 0xe5b   : > { %v1854_v7 = vmul.f32 %v3845_v5, %v3843_v2  ;;  %v2318_v2 = vld [vmem:[%s5316_s7 + $0x70] sm:$0xff] }
 0xe5c   : > { %v3583_v4 = vpack.c.bf16 %v2319_v3, %v2318_v2  ;;  %v2451_v2 = vld [vmem:[%s5320_s11 + $0xc8] sm:$0xff] }
 0xe5d   : > { %3432 = vmatmul.mubr.msk.f32.vlgmr.msra.gmra.mrb[24].mxu1 %vm1015_vm2, %v1854_v7  ;;  %v2455_v3 = vld [vmem:[%s5320_s11 + $0xe8] sm:$0xff] }
 0xe5e   : > { %3435 = vmatpush3.xpose.msk.msra.mxu1 %vm937_vm1, %v1934_v6  ;;  %3436 = vmatprep.mubr.msk.f32.mxu1 %vm4148_vm0, %v4149_v1 }
 0xe5f   : > { %3439 = vmatprep.subr.mxu1 %v4149_v1 }
 0xe61   : > { %3437 = vmatmul.mubr.msk.f32.vlgmr.msra.gmra.mrb[26].mxu1 %vm937_vm1, %v1932_v8 }
 0xe62   : > { %3440 = vmatpush3.msra.mxu1 %v2022_v9  ;;  %3441 = vmatprep.mubr.msk.f32.mxu1 %vm4148_vm0, %v4149_v1 }
 0xe63   : > { %3444 = vmatprep.subr.mxu1 %v4149_v1 }
 0xf30   : > { %v1927_v54 = vpop.f32.mrb[24].mxu1 }
 0xf31   : > { %v3433_v10 = vpop.f32.mrb[25].mxu1 }
 0xf34   : > { %v2005_v11 = vpop.f32.mrb[26].mxu1 }
 0xf35   : > { %v2009_v12 = vmul.f32 0.25, %v2005_v11  ;;  %v3438_v13 = vpop.f32.mrb[27].mxu1 }
 0xf37   : > { %v2010_v15 = vsel %vm1015_vm2, %v2009_v12, -inf }
 0xf38   : > { %2011 = vmax.xlane.f32.xlu0 %v2010_v15 }
 0xfc5   : > { %v2012_v16 = vpop.xlane.xlu0 %2011 }
 0xfc6   : > { %v2013_v17 = vsub.f32 %v2009_v12, %v2012_v16 }
 0xfc8   : > { %v2014_v18 = vmul.f32 1.442695, %v2013_v17 }
 0xfca   : > { %3846 = vpow2.f32 %v2014_v18 }
 0xfd4   : > { %v3847_v19 = vpop.eup %3846 }
 0xfd5   : > { %v2016_v20 = vsel %vm1015_vm2, %v3847_v19, 0.0 }
 0xfd6   : > { %2017 = vadd.xlane.f32.xlu1 %v2016_v20  ;;  %v3091_v20 = vld [vmem:[#allocation7] ss:$0 sm:$0xff] }
 0xfe7   : > { %2097 = vrot.lane.b32.xlu1 %v4630_v57, %s4156_s20 }
0x1063   : > { %v2018_v22 = vpop.xlane.xlu1 %2017 }
0x1064   : > { %3848 = vrcp.f32 %v2018_v22 }
0x1067   : > { %v2098_v25 = vpop.permute.xlu1 %2097 }
0x106e   : > { %v3849_v23 = vpop.eup %3848 }
0x106f   : > { %v2020_v24 = vmul.f32 %v3849_v23, %v3847_v19 }
0x1071   : > { %3442 = vmatmul.mubr.msk.f32.vlgmr.msra.gmra.mrb[28].mxu1 %vm1015_vm2, %v2020_v24  ;;  %v2427_v24 = vld [vmem:[%s5320_s11 + $0x8] sm:$0xff] }
0x1072   : > { %3445 = vmatpush3.xpose.msk.msra.mxu1 %vm937_vm1, %v2100_v21  ;;  %3446 = vmatprep.mubr.msk.f32.mxu1 %vm4148_vm0, %v4149_v1 }
0x1073   : > { %3449 = vmatprep.subr.mxu1 %v4149_v1 }
0x1075   : > { %3447 = vmatmul.mubr.msk.f32.vlgmr.msra.gmra.mrb[30].mxu1 %vm937_vm1, %v2098_v25  ;;  %v2431_v25 = vld [vmem:[%s5320_s11 + $0x28] sm:$0xff] }
0x1076   : > { %3451 = vmatprep.mubr.msk.f32.mxu1 %vm4148_vm0, %v4149_v1 }
0x1144   : > { %v2093_v57 = vpop.f32.mrb[28].mxu1 }
0x1145   : > { %v3443_v26 = vpop.f32.mrb[29].mxu1 }
0x1146   : > { %v2433_v26 = vld [vmem:[%s5320_s11 + $0x38] sm:$0xff] }
0x1148   : > { %v2171_v27 = vpop.f32.mrb[30].mxu1 }
0x1149   : > { %v2175_v28 = vmul.f32 0.25, %v2171_v27  ;;  %v3448_v29 = vpop.f32.mrb[31].mxu1  ;;  %v2430_v27 = vld [vmem:[%s5320_s11 + $0x20] sm:$0xff] }
0x114b   : > { %v2176_v30 = vsel %vm1015_vm2, %v2175_v28, -inf }
0x114c   : > { %2177 = vmax.xlane.f32.xlu0 %v2176_v30  ;;  %v2428_v30 = vld [vmem:[%s5320_s11 + $0x10] sm:$0xff] }
0x1162   : > { %2187 = vrot.lane.b32.xlu0 %v4704_v32, %s4156_s20 }
0x1166   : > { %2264 = vrot.lane.b32.xlu0 %v4740_v60, %s4156_s20 }
0x116a   : > { %2268 = vrot.lane.b32.xlu0 %v4754_v14, %s4155_s12  ;;  %s5352_s12 = sld [smem:[#allocation24_spill]] }
0x116e   : > { %2272 = vrot.lane.b32.xlu0 %v4778_v33, %s4154_s18 }
0x1172   : > { %2280 = vrot.lane.b32.xlu0 %v1927_v54, %s4152_s30 }
0x1176   : > { %2284 = vrot.lane.b32.xlu0 %v2093_v57, %s4151_s19  ;;  %v2429_v57 = vld [vmem:[%s5320_s11 + $0x18] sm:$0xff] }
0x11d9   : > { %v2178_v31 = vpop.xlane.xlu0 %2177 }
0x11da   : > { %v2179_v34 = vsub.f32 %v2175_v28, %v2178_v31  ;;  %v3617_v28 = vpack.c.bf16 %v2433_v26, %v2429_v57  ;;  %v2432_v31 = vld [vmem:[%s5320_s11 + $0x30] sm:$0xff]  ;;  %v2469_v57 = vld [vmem:[%s5320_s11 + $0x158] sm:$0xff] }
0x11dc   : > { %v2180_v35 = vmul.f32 1.442695, %v2179_v34  ;;  %v2435_v34 = vld [vmem:[%s5320_s11 + $0x48] sm:$0xff] }
0x11dd   : > { %v2188_v36 = vpop.permute.xlu0 %2187 }
0x11de   : > { %3850 = vpow2.f32 %v2180_v35  ;;  %3450 = vmatpush3.msra.mxu1 %v2188_v36  ;;  %v3619_v35 = vpack.c.bf16 %v2432_v31, %v2428_v30  ;;  %v2439_v36 = vld [vmem:[%s5320_s11 + $0x68] sm:$0xff]  ;;  %v2472_v31 = vld [vmem:[%s5320_s11 + $0x170] sm:$0xff] }
0x11e1   : > { %v2265_v7 = vpop.permute.xlu0 %2264 }
0x11e2   : > { %v2291_v10 = vsel %vm937_vm1, %v4716_v39, %v2265_v7  ;;  %v2450_v7 = vld [vmem:[%s5320_s11 + $0xc0] sm:$0xff] }
0x11e5   : > { %v2269_v8 = vpop.permute.xlu0 %2268 }
0x11e6   : > { %v2293_v12 = vsel %vm2292_vm3, %v2291_v10, %v2269_v8  ;;  %v2454_v8 = vld [vmem:[%s5320_s11 + $0xe0] sm:$0xff]  ;;  %v2452_v10 = vld [vmem:[%s5320_s11 + $0xd0] sm:$0xff] }
0x11e8   : > { %v3851_v32 = vpop.eup %3850 }
0x11e9   : > { %v2182_v37 = vsel %vm1015_vm2, %v3851_v32, 0.0  ;;  %v2273_v9 = vpop.permute.xlu0 %2272 }
0x11ea   : > { %2183 = vadd.xlane.f32.xlu1 %v2182_v37  ;;  %v2295_v13 = vsel %vm2294_vm4, %v2293_v12, %v2273_v9  ;;  %v2441_v37 = vld [vmem:[%s5320_s11 + $0x78] sm:$0xff] }
0x11ed   : > { %v2281_v54 = vpop.permute.xlu0 %2280 }
0x11f1   : > { %v2285_v15 = vpop.permute.xlu0 %2284 }
0x11fb   : > { %2276 = vrot.lane.b32.xlu1 %v4792_v51, %s4153_s21  ;;  %v3571_v51 = vpack.c.bf16 %v2311_v49, %v2310_v48  ;;  %v2449_v48 = vld [vmem:[%s5320_s11 + $0xb8] sm:$0xff]  ;;  %v2442_v49 = vld [vmem:[%s5320_s11 + $0x80] sm:$0xff] }
0x11fc   : > { %v3595_v56 = vpack.c.bf16 %v2446_v52, %v2442_v49  ;;  %v2482_v49 = vld [vmem:[%s5320_s11 + $0x1c0] sm:$0xff] }
0x11fd   : > { %3572 = vmatpush3.bf16.msra.mxu0 %v3571_v51  ;;  %v3625_v51 = vpack.c.bf16 %v2449_v48, %v2445_v47  ;;  %v3613_v47 = vpack.c.bf16 %v2487_v44, %v2483_v43  ;;  %v2489_v48 = vld [vmem:[%s5320_s11 + $0x1f8] sm:$0xff] }
0x11fe   : > { %3573 = vmatprep.subr.bf16.mxu0 %v4147_v0 }
0x1201   : > { %3575 = vmatpush3.bf16.msra.mxu0 %v3574_v55  ;;  %v2448_v55 = vld [vmem:[%s5320_s11 + $0xb0] sm:$0xff] }
0x1202   : > { %3576 = vmatprep.subr.bf16.mxu0 %v4147_v0  ;;  %v3627_v58 = vpack.c.bf16 %v2448_v55, %v2444_v53  ;;  %v2484_v53 = vld [vmem:[%s5320_s11 + $0x1d0] sm:$0xff] }
0x1203   : > { %v2488_v55 = vld [vmem:[%s5320_s11 + $0x1f0] sm:$0xff] }
0x1205   : > { %3578 = vmatpush3.bf16.msra.mxu0 %v3577_v59 }
0x1206   : > { %3579 = vmatprep.subr.bf16.mxu0 %v4147_v0 }
0x1209   : > { %3581 = vmatpush3.bf16.msra.mxu0 %v3580_v63 }
0x120a   : > { %3582 = vmatprep.subr.bf16.mxu0 %v4147_v0 }
0x120d   : > { %3584 = vmatpush3.bf16.msra.mxu0 %v3583_v4  ;;  %v2453_v4 = vld [vmem:[%s5320_s11 + $0xd8] sm:$0xff] }
0x120e   : > { %3618 = vmatprep.subr.bf16.mxu0 %v3617_v28  ;;  %v2470_v28 = vld [vmem:[%s5320_s11 + $0x160] sm:$0xff] }
0x1277   : > { %v2184_v60 = vpop.xlane.xlu1 %2183 }
0x1278   : > { %3852 = vrcp.f32 %v2184_v60  ;;  %v3589_v60 = vpack.c.bf16 %v2439_v36, %v2435_v34  ;;  %v2475_v34 = vld [vmem:[%s5320_s11 + $0x188] sm:$0xff] }
0x127b   : > { %v2277_v11 = vpop.permute.xlu1 %2276 }
0x127c   : > { %v2297_v0 = vsel %vm2296_vm5, %v2295_v13, %v2277_v11  ;;  %v2456_v11 = vld [vmem:[%s5320_s11 + $0xf0] sm:$0xff]  ;;  %v2459_v13 = vld [vmem:[%s5320_s11 + $0x108] sm:$0xff] }
0x127d   : > { %v2299_v16 = vsel %vm2298_vm6, %v2297_v0, %v2281_v54  ;;  %v3599_v54 = vpack.c.bf16 %v2454_v8, %v2450_v7  ;;  %v3631_v12 = vpack.c.bf16 %v2456_v11, %v2452_v10  ;;  %v2463_v0 = vld [vmem:[%s5320_s11 + $0x128] sm:$0xff]  ;;  %v2658_v10 = vld [vmem:[%s5322_s13] sm:$0xff] }
0x127e   : > { %v2301_v17 = vsel %vm2300_vm7, %v2299_v16, %v2285_v15  ;;  %v2461_v15 = vld [vmem:[%s5320_s11 + $0x118] sm:$0xff]  ;;  %v3601_v16 = vpack.c.bf16 %v2463_v0, %v2459_v13  ;;  %v3092_v8 = vld [vmem:[#allocation9] ss:$0 sm:$0xff]  ;;  %v2690_v13 = vld [vmem:[%s5322_s13 + $0x100] sm:$0xff] }
0x127f   : > { %v2659_v11 = vld [vmem:[%s5322_s13 + $0x8] sm:$0xff] }
0x1280   : > { %v2691_v0 = vld [vmem:[%s5322_s13 + $0x108] sm:$0xff] }
0x1282   : > { %v3853_v14 = vpop.eup %3852 }
0x1283   : > { %v2186_v33 = vmul.f32 %v3853_v14, %v3851_v32  ;;  %v2437_v32 = vld [vmem:[%s5320_s11 + $0x58] sm:$0xff] }
0x1284   : > { %v3621_v14 = vpack.c.bf16 %v2441_v37, %v2437_v32  ;;  %v2477_v37 = vld [vmem:[%s5320_s11 + $0x198] sm:$0xff] }
0x1285   : > { %3452 = vmatmul.mubr.msk.f32.vlgmr.msra.gmra.mrb[32].mxu1 %vm1015_vm2, %v2186_v33  ;;  %v2434_v33 = vld [vmem:[%s5320_s11 + $0x40] sm:$0xff] }
0x1286   : > { %2576 = vmatprep.mubr.f32.mxu1 %v4149_v1  ;;  %v3591_v41 = vpack.c.bf16 %v2438_v38, %v2434_v33  ;;  %v2478_v38 = vld [vmem:[%s5320_s11 + $0x1a0] sm:$0xff] }
0x1358   : > { %v2259_v5 = vpop.f32.mrb[32].mxu1 }
0x1359   : > { %2288 = vrot.lane.b32.xlu0 %v2259_v5, %s4150_s17  ;;  %v3453_v6 = vpop.f32.mrb[33].mxu1  ;;  %v3597_v5 = vpack.c.bf16 %v2455_v3, %v2451_v2  ;;  %v2707_v3 = vld [vmem:[%s5322_s13 + $0x188] sm:$0xff] }
0x135a   : > { %v2457_v6 = vld [vmem:[%s5320_s11 + $0xf8] sm:$0xff] }
0x135b   : > { %v3629_v9 = vpack.c.bf16 %v2457_v6, %v2453_v4 }
0x13cb   : > { %v2289_v18 = vpop.permute.xlu0 %2288 }
0x13cc   : > { %v2303_v19 = vsel %vm2302_vm8, %v2301_v17, %v2289_v18  ;;  %v2465_v17 = vld [vmem:[%s5320_s11 + $0x138] sm:$0xff]  ;;  %v2458_v18 = vld [vmem:[%s5320_s11 + $0x100] sm:$0xff] }
0x13cd   : > { %3487 = vmatmul.mubr.f32.vlgmr.msra.gmra.mrb[4].mxu0 %v2303_v19  ;;  %v2462_v19 = vld [vmem:[%s5320_s11 + $0x120] sm:$0xff] }
0x13ce   : > { %2647 = vmatprep.mubr.f32.mxu0 %v4149_v1  ;;  %v3585_v1 = vpack.c.bf16 %v2431_v25, %v2427_v24  ;;  %3620 = vmatpush1.bf16.msra.mxu0 %v3619_v35  ;;  %v2471_v25 = vld [vmem:[%s5320_s11 + $0x168] sm:$0xff] }
0x13cf   : > { %3622 = vmatprep.subr.bf16.mxu0 %v3621_v14  ;;  %v2479_v35 = vld [vmem:[%s5320_s11 + $0x1a8] sm:$0xff]  ;;  %v2474_v14 = vld [vmem:[%s5320_s11 + $0x180] sm:$0xff] }
0x13d0   : > { %3586 = vmatprep.subr.bf16.mxu1 %v3585_v1  ;;  %v2473_v1 = vld [vmem:[%s5320_s11 + $0x178] sm:$0xff]  ;;  %v3609_v32 = vpack.c.bf16 %v2479_v35, %v2475_v34  ;;  %v3611_v42 = vpack.c.bf16 %v2478_v38, %v2474_v14  ;;  %v2712_v14 = vld [vmem:[%s5322_s13 + $0x1b0] sm:$0xff] }
0x13d2   : > { %3624 = vmatpush1.bf16.msra.mxu0 %v3623_v45  ;;  %v2485_v45 = vld [vmem:[%s5320_s11 + $0x1d8] sm:$0xff] }
0x13d3   : > { %3626 = vmatprep.subr.bf16.mxu0 %v3625_v51  ;;  %v2486_v51 = vld [vmem:[%s5320_s11 + $0x1e0] sm:$0xff]  ;;  %v3645_v52 = vpack.c.bf16 %v2489_v48, %v2485_v45  ;;  %v2696_v45 = vld [vmem:[%s5322_s13 + $0x130] sm:$0xff]  ;;  %v2683_v48 = vld [vmem:[%s5322_s13 + $0xc8] sm:$0xff] }
0x13d6   : > { %3628 = vmatpush1.bf16.msra.mxu0 %v3627_v58  ;;  %v3647_v58 = vpack.c.bf16 %v2488_v55, %v2484_v53  ;;  %v2666_v55 = vld [vmem:[%s5322_s13 + $0x40] sm:$0xff] }
0x13d7   : > { %3630 = vmatprep.subr.bf16.mxu0 %v3629_v9 }
0x13da   : > { %3632 = vmatpush1.bf16.msra.mxu0 %v3631_v12 }
0x14a0   : > { %v2393_v21 = vpop.f32.mrb[4].mxu0 }
0x14a1   : > { %v2394_v22 = vadd.f32 %v3091_v20, %v2393_v21  ;;  %v3488_v39 = vpop.f32.mrb[5].mxu0  ;;  %v3633_v20 = vpack.c.bf16 %v2465_v17, %v2461_v15  ;;  %v3603_v21 = vpack.c.bf16 %v2462_v19, %v2458_v18  ;;  %v2676_v15 = vld [vmem:[%s5322_s13 + $0x90] sm:$0xff]  ;;  %v2709_v17 = vld [vmem:[%s5322_s13 + $0x198] sm:$0xff]  ;;  %v3651_v19 = vpack.c.bf16 %v2659_v11, %v2658_v10 }
0x14a2   : > { %v2464_v39 = vld [vmem:[%s5320_s11 + $0x130] sm:$0xff] }
0x14a3   : > { %v2397_v23 = vadd.f32 %v2394_v22, %v4618_v50  ;;  %v2426_v50 = vld [vmem:[%s5320_s11] sm:$0xff]  ;;  %v2460_v22 = vld [vmem:[%s5320_s11 + $0x110] sm:$0xff]  ;;  %3634 = vmatprep.subr.bf16.mxu0 %v3633_v20  ;;  %v3683_v20 = vpack.c.bf16 %v2691_v0, %v2690_v13  ;;  %v2687_v0 = vld [vmem:[%s5322_s13 + $0xe8] sm:$0xff] }
0x14a4   : > { %v3587_v29 = vpack.c.bf16 %v2430_v27, %v2426_v50  ;;  %v3635_v24 = vpack.c.bf16 %v2464_v39, %v2460_v22  ;;  %v3637_v50 = vpack.c.bf16 %v2473_v1, %v2469_v57  ;;  %v2466_v27 = vld [vmem:[%s5320_s11 + $0x140] sm:$0xff]  ;;  %v2661_v22 = vld [vmem:[%s5322_s13 + $0x18] sm:$0xff]  ;;  %v2700_v11 = vld [vmem:[%s5322_s13 + $0x150] sm:$0xff] }
0x14a5   : > { %2400 = vadd.xlane.f32.xlu0 %v2397_v23  ;;  %v3607_v30 = vpack.c.bf16 %v2470_v28, %v2466_v27  ;;  %v2693_v57 = vld [vmem:[%s5322_s13 + $0x118] sm:$0xff]  ;;  %v2678_v1 = vld [vmem:[%s5322_s13 + $0xa0] sm:$0xff]  ;;  %v2711_v27 = vld [vmem:[%s5322_s13 + $0x1a8] sm:$0xff] }
0x14a6   : > { %3588 = vmatpush1.bf16.msra.mxu1 %v3587_v29  ;;  %v2468_v29 = vld [vmem:[%s5320_s11 + $0x150] sm:$0xff]  ;;  %3636 = vmatpush1.bf16.msra.mxu0 %v3635_v24  ;;  %v2686_v13 = vld [vmem:[%s5322_s13 + $0xe0] sm:$0xff] }
0x14a7   : > { %3590 = vmatprep.subr.bf16.mxu1 %v3589_v60  ;;  %3638 = vmatprep.subr.bf16.mxu0 %v3637_v50  ;;  %v3639_v36 = vpack.c.bf16 %v2472_v31, %v2468_v29  ;;  %v2481_v60 = vld [vmem:[%s5320_s11 + $0x1b8] sm:$0xff]  ;;  %v2710_v50 = vld [vmem:[%s5322_s13 + $0x1a0] sm:$0xff]  ;;  %v2663_v31 = vld [vmem:[%s5322_s13 + $0x28] sm:$0xff] }
0x14a8   : > { %v3641_v33 = vpack.c.bf16 %v2481_v60, %v2477_v37  ;;  %v3689_v35 = vpack.c.bf16 %v2711_v27, %v2710_v50  ;;  %v2680_v37 = vld [vmem:[%s5322_s13 + $0xb0] sm:$0xff]  ;;  %v2681_v60 = vld [vmem:[%s5322_s13 + $0xb8] sm:$0xff] }
0x14a9   : > { %v3661_v43 = vpack.c.bf16 %v2681_v60, %v2680_v37  ;;  %v2721_v27 = vld [vmem:[%s5322_s13 + $0x1f8] sm:$0xff] }
0x14aa   : > { %3592 = vmatpush1.bf16.msra.mxu1 %v3591_v41  ;;  %v2480_v41 = vld [vmem:[%s5320_s11 + $0x1b0] sm:$0xff]  ;;  %3640 = vmatpush1.bf16.msra.mxu0 %v3639_v36  ;;  %v2694_v36 = vld [vmem:[%s5322_s13 + $0x120] sm:$0xff] }
0x14ab   : > { %3594 = vmatprep.subr.bf16.mxu1 %v3593_v46  ;;  %v3643_v46 = vpack.c.bf16 %v2480_v41, %v2476_v40  ;;  %3642 = vmatprep.subr.bf16.mxu0 %v3641_v33  ;;  %v2713_v33 = vld [vmem:[%s5322_s13 + $0x1b8] sm:$0xff]  ;;  %v2664_v41 = vld [vmem:[%s5322_s13 + $0x30] sm:$0xff] }
0x14ac   : > { %v3693_v44 = vpack.c.bf16 %v2713_v33, %v2712_v14  ;;  %v2490_v33 = vld [vmem:[%s5352_s12] sm:$0xf] }
0x14ae   : > { %3596 = vmatpush1.bf16.msra.mxu1 %v3595_v56  ;;  %v3615_v56 = vpack.c.bf16 %v2486_v51, %v2482_v49  ;;  %3644 = vmatpush1.bf16.msra.mxu0 %v3643_v46  ;;  %v2697_v46 = vld [vmem:[%s5322_s13 + $0x138] sm:$0xff]  ;;  %v2714_v49 = vld [vmem:[%s5322_s13 + $0x1c0] sm:$0xff]  ;;  %v2715_v51 = vld [vmem:[%s5322_s13 + $0x1c8] sm:$0xff] }
0x14af   : > { %3598 = vmatprep.subr.bf16.mxu1 %v3597_v5  ;;  %3646 = vmatprep.subr.bf16.mxu0 %v3645_v52  ;;  %v3695_v53 = vpack.c.bf16 %v2697_v46, %v2696_v45 }
0x14b2   : > { %3600 = vmatpush1.bf16.msra.mxu1 %v3599_v54  ;;  %3648 = vmatpush1.bf16.msra.mxu0 %v3647_v58  ;;  %v3093_v54 = vld [vmem:[#allocation10] ss:$0 sm:$0xff] }
0x14b3   : > { %3602 = vmatprep.subr.bf16.mxu1 %v3601_v16  ;;  %v2677_v16 = vld [vmem:[%s5322_s13 + $0x98] sm:$0xff] }
0x14b6   : > { %3604 = vmatpush1.bf16.msra.mxu1 %v3603_v21  ;;  %v2660_v21 = vld [vmem:[%s5322_s13 + $0x10] sm:$0xff] }
0x14b7   : > { %v3655_v28 = vpack.c.bf16 %v2661_v22, %v2660_v21  ;;  %v2671_v21 = vld [vmem:[%s5322_s13 + $0x68] sm:$0xff]  ;;  %v2702_v22 = vld [vmem:[%s5322_s13 + $0x160] sm:$0xff] }
0x1532   : > { %v2401_v59 = vpop.xlane.xlu0 %2400 }
0x1533   : > { %v2403_v61 = vmul.f32 0.0078125, %v2401_v59  ;;  %v2674_v59 = vld [vmem:[%s5322_s13 + $0x80] sm:$0xff] }
0x1535   : > { %v4976_v62 = vsub.f32 %v2397_v23, %v2403_v61  ;;  %v2467_v23 = vld [vmem:[%s5320_s11 + $0x148] sm:$0xff] }
0x1536   : > { %v3605_v26 = vpack.c.bf16 %v2471_v25, %v2467_v23  ;;  %v2675_v61 = vld [vmem:[%s5322_s13 + $0x88] sm:$0xff]  ;;  %v3653_v23 = vpack.c.bf16 %v2677_v16, %v2676_v15  ;;  %v2692_v25 = vld [vmem:[%s5322_s13 + $0x110] sm:$0xff]  ;;  %v2718_v15 = vld [vmem:[%s5322_s13 + $0x1e0] sm:$0xff] }
0x1537   : > { %v2405_v63 = vmul.f32 %v4976_v62, %v4976_v62  ;;  %v3649_v2 = vpack.c.bf16 %v2675_v61, %v2674_v59  ;;  %v3687_v29 = vpack.c.bf16 %v2693_v57, %v2692_v25  ;;  %v3697_v59 = vpack.c.bf16 %v2715_v51, %v2714_v49  ;;  %v2698_v61 = vld [vmem:[%s5322_s13 + $0x140] sm:$0xff]  ;;  %v2719_v16 = vld [vmem:[%s5322_s13 + $0x1e8] sm:$0xff]  ;;  %v2688_v57 = vld [vmem:[%s5322_s13 + $0xf0] sm:$0xff] }
0x1538   : > { %3606 = vmatprep.subr.bf16.mxu1 %v3605_v26  ;;  %v2679_v26 = vld [vmem:[%s5322_s13 + $0xa8] sm:$0xff] }
0x1539   : > { %2406 = vadd.xlane.f32.xlu1 %v2405_v63  ;;  %3608 = vmatpush1.bf16.msra.mxu1 %v3607_v30  ;;  %v2706_v63 = vld [vmem:[%s5322_s13 + $0x180] sm:$0xff]  ;;  %v3657_v34 = vpack.c.bf16 %v2679_v26, %v2678_v1  ;;  %v2689_v1 = vld [vmem:[%s5322_s13 + $0xf8] sm:$0xff]  ;;  %v2720_v26 = vld [vmem:[%s5322_s13 + $0x1f0] sm:$0xff] }
0x153a   : > { %3610 = vmatprep.subr.bf16.mxu1 %v3609_v32  ;;  %v3681_v4 = vpack.c.bf16 %v2707_v3, %v2706_v63  ;;  %v2662_v30 = vld [vmem:[%s5322_s13 + $0x20] sm:$0xff]  ;;  %v2695_v32 = vld [vmem:[%s5322_s13 + $0x128] sm:$0xff]  ;;  %v2685_v3 = vld [vmem:[%s5322_s13 + $0xd8] sm:$0xff]  ;;  %v3677_v50 = vpack.c.bf16 %v2689_v1, %v2688_v57 }
0x153b   : > { %v3659_v38 = vpack.c.bf16 %v2663_v31, %v2662_v30  ;;  %v3691_v40 = vpack.c.bf16 %v2695_v32, %v2694_v36  ;;  %v2699_v63 = vld [vmem:[%s5322_s13 + $0x148] sm:$0xff]  ;;  %v3709_v30 = vpack.c.bf16 %v2721_v27, %v2720_v26  ;;  %v2492_v32 = vlaneseq }
0x153c   : > { %3682 = vmatprep.subr.bf16.mxu0 %v3681_v4  ;;  %v2716_v4 = vld [vmem:[%s5322_s13 + $0x1d0] sm:$0xff] }
0x153d   : > { %3612 = vmatpush1.bf16.msra.mxu1 %v3611_v42  ;;  %v2665_v42 = vld [vmem:[%s5322_s13 + $0x38] sm:$0xff]  ;;  %v2493_v37 = vshrl.u32 %v2492_v32, 7 }
0x153e   : > { %3614 = vmatprep.subr.bf16.mxu1 %v3613_v47  ;;  %v2682_v47 = vld [vmem:[%s5322_s13 + $0xc0] sm:$0xff]  ;;  %v3663_v52 = vpack.c.bf16 %v2665_v42, %v2664_v41 }
0x153f   : > { %v3665_v58 = vpack.c.bf16 %v2683_v48, %v2682_v47  ;;  %v2494_v60 = vsub.s32 0, %v2493_v37  ;;  %v2502_v14 = vsub.s32 2, %v2493_v37 }
0x1541   : > { %3616 = vmatpush1.bf16.msra.mxu1 %v3615_v56  ;;  %v2667_v56 = vld [vmem:[%s5322_s13 + $0x48] sm:$0xff]  ;;  %v2495_v41 = vrot.slane %v2490_v33, %v2494_v60  ;;  %v2503_v42 = vrot.slane %v2490_v33, %v2502_v14 }
0x1542   : > { %3650 = vmatprep.subr.bf16.mxu1 %v3649_v2  ;;  %v2684_v2 = vld [vmem:[%s5322_s13 + $0xd0] sm:$0xff] }
0x15c6   : > { %v2407_v5 = vpop.xlane.xlu1 %2406 }
0x15c7   : > { %v2408_v6 = vmul.f32 0.0078125, %v2407_v5  ;;  %v2717_v5 = vld [vmem:[%s5322_s13 + $0x1d8] sm:$0xff] }
0x15c8   : > { %v3701_v10 = vpack.c.bf16 %v2717_v5, %v2716_v4 }
0x15c9   : > { %v2409_v7 = vadd.f32 1e-05, %v2408_v6  ;;  %v3667_v6 = vpack.c.bf16 %v2667_v56, %v2666_v55 }
0x15cb   : > { %3854 = vrsqrt.f32 %v2409_v7  ;;  %v3699_v7 = vpack.c.bf16 %v2699_v63, %v2698_v61 }
0x15d5   : > { %v3855_v9 = vpop.eup %3854 }
0x15d6   : > { %v2411_v12 = vmul.f32 %v3855_v9, %v4976_v62  ;;  %v2708_v62 = vld [vmem:[%s5322_s13 + $0x190] sm:$0xff]  ;;  %v2669_v9 = vld [vmem:[%s5322_s13 + $0x58] sm:$0xff] }
0x15d7   : > { %v3685_v24 = vpack.c.bf16 %v2709_v17, %v2708_v62 }
0x15d8   : > { %v2418_v18 = vmul.f32 %v3092_v8, %v2411_v12  ;;  %v2668_v8 = vld [vmem:[%s5322_s13 + $0x50] sm:$0xff]  ;;  %v2701_v12 = vld [vmem:[%s5322_s13 + $0x158] sm:$0xff] }
0x15d9   : > { %v3671_v62 = vpack.c.bf16 %v2669_v9, %v2668_v8  ;;  %v3703_v17 = vpack.c.bf16 %v2701_v12, %v2700_v11 }
0x15da   : > { %v5143_v39 = vadd.f32 %v3093_v54, %v2418_v18  ;;  %v3669_v54 = vpack.c.bf16 %v2685_v3, %v2684_v2  ;;  %v3673_v18 = vpack.c.bf16 %v2687_v0, %v2686_v13  ;;  %v3094_v2 = vld [vmem:[#allocation12] ss:$0 sm:$0xff] }
0x15dc   : > { %2577 = vmatmul.mubr.f32.vlgmr.msra.gmra.mrb[34].mxu1 %v5143_v39  ;;  %2648 = vmatmul.mubr.f32.vlgmr.msra.gmra.mrb[6].mxu0 %v5143_v39 }
0x15dd   : > { %3652 = vmatpush3.bf16.msra.mxu1 %v3651_v19  ;;  %3684 = vmatpush3.bf16.msra.mxu0 %v3683_v20  ;;  %v3705_v19 = vpack.c.bf16 %v2719_v16, %v2718_v15  ;;  %v2670_v20 = vld [vmem:[%s5322_s13 + $0x60] sm:$0xff] }
0x15de   : > { %3654 = vmatprep.subr.bf16.mxu1 %v3653_v23  ;;  %3686 = vmatprep.subr.bf16.mxu0 %v3685_v24  ;;  %v3675_v23 = vpack.c.bf16 %v2671_v21, %v2670_v20  ;;  %v2703_v24 = vld [vmem:[%s5322_s13 + $0x168] sm:$0xff] }
0x15df   : > { %v3707_v25 = vpack.c.bf16 %v2703_v24, %v2702_v22 }
0x15e1   : > { %3656 = vmatpush3.bf16.msra.mxu1 %v3655_v28  ;;  %3688 = vmatpush3.bf16.msra.mxu0 %v3687_v29  ;;  %v2672_v28 = vld [vmem:[%s5322_s13 + $0x70] sm:$0xff]  ;;  %v2673_v29 = vld [vmem:[%s5322_s13 + $0x78] sm:$0xff] }
0x15e2   : > { %3658 = vmatprep.subr.bf16.mxu1 %v3657_v34  ;;  %3690 = vmatprep.subr.bf16.mxu0 %v3689_v35  ;;  %v3679_v31 = vpack.c.bf16 %v2673_v29, %v2672_v28  ;;  %v2704_v34 = vld [vmem:[%s5322_s13 + $0x170] sm:$0xff]  ;;  %v2705_v35 = vld [vmem:[%s5322_s13 + $0x178] sm:$0xff] }
0x15e3   : > { %v3711_v36 = vpack.c.bf16 %v2705_v35, %v2704_v34 }
0x15e5   : > { %3660 = vmatpush3.bf16.msra.mxu1 %v3659_v38  ;;  %3692 = vmatpush3.bf16.msra.mxu0 %v3691_v40  ;;  %v2498_v38 = vsub.s32 1, %v2493_v37  ;;  %v2506_v40 = vsub.s32 3, %v2493_v37 }
0x15e6   : > { %3662 = vmatprep.subr.bf16.mxu1 %v3661_v43  ;;  %3694 = vmatprep.subr.bf16.mxu0 %v3693_v44 }
0x15e7   : > { %v2499_v43 = vrot.slane %v2490_v33, %v2498_v38  ;;  %v2507_v44 = vrot.slane %v2490_v33, %v2506_v40 }
0x15e9   : > { %3664 = vmatpush3.bf16.msra.mxu1 %v3663_v52  ;;  %3696 = vmatpush3.bf16.msra.mxu0 %v3695_v53 }
0x15ea   : > { %3666 = vmatprep.subr.bf16.mxu1 %v3665_v58  ;;  %3698 = vmatprep.subr.bf16.mxu0 %v3697_v59 }
0x15ed   : > { %3668 = vmatpush3.bf16.msra.mxu1 %v3667_v6  ;;  %3700 = vmatpush3.bf16.msra.mxu0 %v3699_v7 }
0x15ee   : > { %3670 = vmatprep.subr.bf16.mxu1 %v3669_v54  ;;  %3702 = vmatprep.subr.bf16.mxu0 %v3701_v10 }
0x15f1   : > { %3672 = vmatpush3.bf16.msra.mxu1 %v3671_v62  ;;  %3704 = vmatpush3.bf16.msra.mxu0 %v3703_v17  ;;  %v3095_v62 = vld [vmem:[#allocation13] ss:$0 sm:$0xff] }
0x15f2   : > { %3674 = vmatprep.subr.bf16.mxu1 %v3673_v18  ;;  %3706 = vmatprep.subr.bf16.mxu0 %v3705_v19  ;;  %v3096_v18 = vld [vmem:[#allocation15] ss:$0 sm:$0xff] }
0x15f5   : > { %3676 = vmatpush3.bf16.msra.mxu1 %v3675_v23  ;;  %3708 = vmatpush3.bf16.msra.mxu0 %v3707_v25 }
0x15f6   : > { %3678 = vmatprep.subr.bf16.mxu1 %v3677_v50  ;;  %3710 = vmatprep.subr.bf16.mxu0 %v3709_v30 }
0x15f9   : > { %3680 = vmatpush3.bf16.msra.mxu1 %v3679_v31  ;;  %3712 = vmatpush3.bf16.msra.mxu0 %v3711_v36 }
0x16af   : > { %v2578_v45 = vpop.f32.mrb[34].mxu1  ;;  %v2649_v46 = vpop.f32.mrb[6].mxu0 }
0x16b0   : > { %v2579_v47 = vadd.f32 %v2578_v45, %v2495_v41  ;;  %v2650_v48 = vadd.f32 %v2649_v46, %v2503_v42  ;;  %v2580_v49 = vpop.f32.mrb[35].mxu1  ;;  %v2651_v51 = vpop.f32.mrb[7].mxu0 }
0x16b1   : > { %v2581_v52 = vadd.f32 %v2580_v49, %v2499_v43  ;;  %v2652_v53 = vadd.f32 %v2651_v51, %v2507_v44 }
0x16b2   : > { %v2654_v58 = vmax.f32 %v2579_v47, 0.0  ;;  %v2656_v59 = vmax.f32 %v2650_v48, 0.0 }
0x16b3   : > { %v2655_v55 = vmax.f32 %v2581_v52, 0.0  ;;  %v2657_v56 = vmax.f32 %v2652_v53, 0.0 }
0x16b5   : > { %2793 = vmatprep.mubr.f32.mxu1 %v2655_v55  ;;  %2863 = vmatprep.mubr.f32.mxu0 %v2657_v56 }
0x16b6   : > { %2794 = vmatmul.mubr.f32.vlgmr.msra.gmra.mrb[36].mxu1 %v2654_v58  ;;  %2864 = vmatmul.mubr.f32.vlgmr.msra.gmra.mrb[8].mxu0 %v2656_v59 }
0x1789   : > { %v3231_v61 = vpop.f32.mrb[36].mxu1  ;;  %v3266_v63 = vpop.f32.mrb[8].mxu0 }
0x178a   : > { %v3232_v3 = vpop.f32.mrb[37].mxu1  ;;  %v3267_v4 = vpop.f32.mrb[9].mxu0 }
0x178b   : > { %v3233_v5 = vadd.f32 %v3232_v3, %v3231_v61  ;;  %v3268_v6 = vadd.f32 %v3267_v4, %v3266_v63 }
0x178d   : > { %v2796_v7 = vadd.f32 %v3233_v5, %v3094_v2 }
0x178f   : > { %v2866_v8 = vadd.f32 %v3268_v6, %v2796_v7 }
0x1791   : > { %v2869_v9 = vadd.f32 %v2866_v8, %v5143_v39 }
0x1793   : > { %2872 = vadd.xlane.f32.xlu0 %v2869_v9 }
0x1820   : > { %v2873_v54 = vpop.xlane.xlu0 %2872 }
0x1821   : > { %v2874_v10 = vmul.f32 0.0078125, %v2873_v54 }
0x1823   : > { %v2875_v11 = vsub.f32 %v2869_v9, %v2874_v10 }
0x1825   : > { %v2876_v12 = vmul.f32 %v2875_v11, %v2875_v11 }
0x1827   : > { %2877 = vadd.xlane.f32.xlu0 %v2876_v12 }
0x18b4   : > { %v2878_v13 = vpop.xlane.xlu0 %2877 }
0x18b5   : > { %v2879_v0 = vmul.f32 0.0078125, %v2878_v13 }
0x18b7   : > { %v2880_v15 = vadd.f32 1e-05, %v2879_v0 }
0x18b9   : > { %3856 = vrsqrt.f32 %v2880_v15 }
0x18c3   : > { %v3857_v16 = vpop.eup %3856 }
0x18c4   : > { %v2882_v17 = vmul.f32 %v3857_v16, %v2875_v11 }
0x18c6   : > { %v2889_v19 = vmul.f32 %v3095_v62, %v2882_v17 }
0x18c8   : > { %v2896_v39 = vadd.f32 %v3096_v18, %v2889_v19 }
0x18ca   : > { %2897 = vst [vmem:[%s656_s22] sm:$0xff] %v2896_v39 }
0x18cb PF: > { %s5354_s1 = sld [smem:[#allocation21_spill]] }
0x18d1   : > { %s32_s24 = sadd.s32 1, %s5354_s1  }
0x18d2   : > { %p29_p13 = scmp.ge.s32.totalorder %s32_s24, 4  }
0x18d4   :  { %31 = sbr.rel (!%p29_p13) target bundleno = 10 (0xa), region = 155 }
0x18db   :  { %2917 = vsyncpa [#allocation3], 1 }
0x18dc   :  { %2919 = vsyncpa [#allocation3 + $0x1], 1 }
0x18dd   :  { %2920 = vsyncpa [#allocation5], 1 }
0x18de   :  { %2921 = vsyncpa [#allocation8], 1 }
0x18df   :  { %2922 = vsyncpa [#allocation11], 1 }
0x18e0   :  { %2923 = vsyncpa [#allocation14], 1 }

</bundles_post_ra>
